<compile_context>
chip_gen: v5e
topology: v5e:2x2
jax: 0.10.0
libtpu: 0.0.40
codegen_flags: <defaults>
</compile_context>

<pallas_src>
import functools

import jax
import jax.numpy as jnp
from jax import lax
from jax.experimental import pallas as pl
from jax.experimental.pallas import tpu as pltpu

RGB_MEAN = (0.4488, 0.4371, 0.4040)
RGB_STD = (1.0, 1.0, 1.0)
HALO = 3  # three stacked 3x3 convs -> 3-pixel halo per side


# ----------------------------- kernel helpers ------------------------------

def _conv3x3_valid(x, w, b, *, relu):
    """Valid 3x3 conv.

    x: (Hin, Win, Cin) bf16, w: (3, 3*Cin, Cout) bf16, b: (1, Cout) f32.
    Returns (Hin-2, Win-2, Cout) f32.  One K=3*Cin matmul per dy (3 total).
    """
    hin, win, _ = x.shape
    ho, wo = hin - 2, win - 2
    acc = None
    for dy in range(3):
        rows = x[dy:dy + ho]                                   # (ho, win, Cin)
        # dx = 0,1,2 shifts packed along the lane axis -> deep contraction.
        patch = jnp.concatenate(
            [rows[:, 0:wo], rows[:, 1:wo + 1], rows[:, 2:wo + 2]], axis=-1)
        part = jnp.einsum("hwk,ko->hwo", patch, w[dy],
                          preferred_element_type=jnp.float32)
        acc = part if acc is None else acc + part
    y = acc + b                                                # f32 epilogue
    if relu:
        y = jnp.maximum(y, 0.0)
    return y


def _zero_outside(y, row0, n_rows, col_halo, n_cols):
    """Zero rows/cols of y that fall outside the original image.

    Row p of y maps to global image row (row0 + p); valid iff in [0, n_rows).
    Col q is valid iff in [col_halo, col_halo + n_cols).
    Keeps the fused valid-conv chain numerically identical to three separate
    zero-'same'-padded convs.
    """
    p, q, _ = y.shape
    rr = lax.broadcasted_iota(jnp.int32, (p, q, 1), 0) + row0
    cc = lax.broadcasted_iota(jnp.int32, (p, q, 1), 1)
    ok = (rr >= 0) & (rr < n_rows) & (cc >= col_halo) & (cc < col_halo + n_cols)
    return jnp.where(ok, y, 0.0)


def _generator_fused_kernel(x_ref, hw_ref, hb_ref, bw_ref, bb_ref,
                            tw_ref, tb_ref, o_ref, act0_ref, act1_ref,
                            *, img_h, img_w, tile_h):
    # x_ref: (1, 1, th+6, W+6, 3) bf16 -- sub_mean already applied, zero halo.
    t = pl.program_id(1)
    row_base = t * tile_h

    x = x_ref[0, 0]

    # head 3x3 + ReLU: (th+6, W+6, 3) -> (th+4, W+4, w0)
    y0 = _conv3x3_valid(x, hw_ref[...], hb_ref[...], relu=True)
    y0 = _zero_outside(y0, row_base - 2, img_h, 2, img_w)
    act0_ref[...] = y0.astype(act0_ref.dtype)          # bf16, VMEM-resident

    # body 3x3 + ReLU: -> (th+2, W+2, w1)
    y1 = _conv3x3_valid(act0_ref[...], bw_ref[...], bb_ref[...], relu=True)
    y1 = _zero_outside(y1, row_base - 1, img_h, 1, img_w)
    act1_ref[...] = y1.astype(act1_ref.dtype)

    # tail 3x3 (add_mean folded into tw/tb): -> (th, W, 3*scale*scale)
    y2 = _conv3x3_valid(act1_ref[...], tw_ref[...], tb_ref[...], relu=False)
    o_ref[0, 0] = y2.astype(o_ref.dtype)


# ------------------------------ glue helpers -------------------------------

def pixel_shuffle_nhwc(x, r):
    """PyTorch-ordering pixel shuffle, NHWC: (N,H,W,C*r*r) -> (N,H*r,W*r,C)."""
    N, H, W, Crr = x.shape
    C = Crr // (r * r)
    x = x.reshape(N, H, W, C, r, r)
    x = jnp.transpose(x, (0, 1, 4, 2, 5, 3))
    return x.reshape(N, H * r, W * r, C)


def init_generator_params(key, feature_widths=(32, 16), scale=2):
    # Real model uses FeatureWidths=[512, 256] for scale 2; kept small here
    # for the synthetic test.  Deterministic init.
    w0, w1 = feature_widths
    k1, k2, k3 = jax.random.split(key, 3)
    s = 0.05
    cout = 3 * scale * scale
    return {
        "head_w": jax.random.normal(k1, (3, 3, 3, w0), jnp.float32) * s,
        "head_b": jnp.zeros((w0,), jnp.float32),
        "body_w": jax.random.normal(k2, (3, 3, w0, w1), jnp.float32) * s,
        "body_b": jnp.zeros((w1,), jnp.float32),
        "tail_w": jax.random.normal(k3, (3, 3, w1, cout), jnp.float32) * s,
        "tail_b": jnp.zeros((cout,), jnp.float32),
    }


def cs143_forward(x_nchw, gen_params, *, rgb_range=255.0, scale=2, tile_h=8):
    """Forward pass. x_nchw: (N, 3, H, W) f32 -> (N, 3, H*scale, W*scale) f32."""
    N, C, H, W = x_nchw.shape
    r = scale
    cout = 3 * r * r

    std = jnp.asarray(RGB_STD, jnp.float32)
    mean = jnp.asarray(RGB_MEAN, jnp.float32)

    # NCHW -> NHWC; sub_mean (MeanShift sign=-1) applied exactly, fused by XLA
    # into the single zero-pad pass the three 3x3 convs share.
    x = jnp.transpose(x_nchw, (0, 2, 3, 1)).astype(jnp.float32)
    x = (x - rgb_range * mean) / std
    xp = jnp.pad(x, ((0, 0), (HALO, HALO), (HALO, HALO), (0, 0)))
    xp = xp.astype(jnp.bfloat16)

    # Row tiles with a 3-row halo (overlapping windows -> plain Blocked specs).
    th = tile_h if (tile_h > 0 and H % tile_h == 0) else H
    n_t = H // th
    xw = jnp.stack(
        [xp[:, t * th: t * th + th + 2 * HALO] for t in range(n_t)], axis=1)
    # xw: (N, n_t, th+6, W+6, 3) bf16

    w0 = gen_params["head_w"].shape[-1]
    w1 = gen_params["body_w"].shape[-1]

    # Weights in (3, 3*Cin, Cout) layout (dy-major, dx*Cin+c rows) as bf16.
    head_w = gen_params["head_w"].reshape(3, 3 * 3, w0).astype(jnp.bfloat16)
    head_b = gen_params["head_b"].reshape(1, w0).astype(jnp.float32)
    body_w = gen_params["body_w"].reshape(3, 3 * w0, w1).astype(jnp.bfloat16)
    body_b = gen_params["body_b"].reshape(1, w1).astype(jnp.float32)

    # add_mean (MeanShift sign=+1) folded exactly into the tail conv, using the
    # pixel-shuffle channel ordering k = c*r*r + i*r + j.
    ch_scale = jnp.repeat(1.0 / std, r * r)                  # (cout,)
    ch_shift = jnp.repeat(rgb_range * mean / std, r * r)     # (cout,)
    tail_w = (gen_params["tail_w"] * ch_scale).reshape(3, 3 * w1, cout)
    tail_w = tail_w.astype(jnp.bfloat16)
    tail_b = (gen_params["tail_b"].reshape(-1) * ch_scale + ch_shift)
    tail_b = tail_b.reshape(1, cout).astype(jnp.float32)

    kern = functools.partial(_generator_fused_kernel,
                             img_h=H, img_w=W, tile_h=th)

    out = pl.pallas_call(
        kern,
        out_shape=jax.ShapeDtypeStruct((N, n_t, th, W, cout), jnp.float32),
        grid=(N, n_t),
        in_specs=[
            pl.BlockSpec((1, 1, th + 2 * HALO, W + 2 * HALO, 3),
                         lambda n, t: (n, t, 0, 0, 0)),
            pl.BlockSpec((3, 3 * 3, w0), lambda n, t: (0, 0, 0)),
            pl.BlockSpec((1, w0), lambda n, t: (0, 0)),
            pl.BlockSpec((3, 3 * w0, w1), lambda n, t: (0, 0, 0)),
            pl.BlockSpec((1, w1), lambda n, t: (0, 0)),
            pl.BlockSpec((3, 3 * w1, cout), lambda n, t: (0, 0, 0)),
            pl.BlockSpec((1, cout), lambda n, t: (0, 0)),
        ],
        out_specs=pl.BlockSpec((1, 1, th, W, cout),
                               lambda n, t: (n, t, 0, 0, 0)),
        scratch_shapes=[
            pltpu.VMEM((th + 4, W + 4, w0), jnp.bfloat16),   # head activation
            pltpu.VMEM((th + 2, W + 2, w1), jnp.bfloat16),   # body activation
        ],
        compiler_params=pltpu.CompilerParams(
            dimension_semantics=("parallel", "parallel"),
            vmem_limit_bytes=32 * 1024 * 1024),
    )(xw, head_w, head_b, body_w, body_b, tail_w, tail_b)

    out = out.reshape(N, H, W, cout)            # contiguous row tiles
    out = pixel_shuffle_nhwc(out, r)            # (N, H*r, W*r, 3), add_mean folded
    return jnp.transpose(out, (0, 3, 1, 2))     # NHWC -> NCHW


# ---------------------------------- main ------------------------------------

if __name__ == "__main__":
    key = jax.random.PRNGKey(0)
    k_in, k_params = jax.random.split(key)

    N, C, H, W = 2, 3, 16, 16
    scale = 2
    rgb_range = 255.0

    x = jax.random.uniform(k_in, (N, C, H, W), jnp.float32) * rgb_range
    gen_params = init_generator_params(k_params, feature_widths=(32, 16),
                                       scale=scale)

    fwd = jax.jit(functools.partial(cs143_forward, rgb_range=rgb_range,
                                    scale=scale, tile_h=8))
    out = fwd(x, gen_params)
    out = jax.block_until_ready(out)

    assert out.shape == (N, 3, H * scale, W * scale), out.shape
    assert out.dtype == jnp.float32
    print("KERNEL_OK")
</pallas_src>

<mosaic_0001>
module attributes {stable_mosaic.version = 11 : i64} {
  func.func @_generator_fused_kernel(%arg0: i32, %arg1: i32, %arg2: memref<1x1x14x22x3xbf16, #tpu.memory_space<vmem>>, %arg3: memref<3x9x32xbf16, #tpu.memory_space<vmem>>, %arg4: memref<1x32xf32, #tpu.memory_space<vmem>>, %arg5: memref<3x96x16xbf16, #tpu.memory_space<vmem>>, %arg6: memref<1x16xf32, #tpu.memory_space<vmem>>, %arg7: memref<3x48x12xbf16, #tpu.memory_space<vmem>>, %arg8: memref<1x12xf32, #tpu.memory_space<vmem>>, %arg9: memref<1x1x8x16x12xf32, #tpu.memory_space<vmem>>, %arg10: memref<12x20x32xbf16, #tpu.memory_space<vmem>>, %arg11: memref<10x18x16xbf16, #tpu.memory_space<vmem>>) attributes {dimension_semantics = [#tpu.dimension_semantics<parallel>, #tpu.dimension_semantics<parallel>], iteration_bounds = array<i64: 2, 2>, scalar_prefetch = 0 : i64, scratch_operands = 2 : i64, tpu.core_type = #tpu.core_type<tc>, window_params = [{transform_indices = @transform_0, window_bounds = array<i64: 1, 1, 14, 22, 3>}, {pipeline_mode = #tpu.pipeline_mode<synchronous>, transform_indices = @transform_1, window_bounds = array<i64: 3, 9, 32>}, {pipeline_mode = #tpu.pipeline_mode<synchronous>, transform_indices = @transform_2, window_bounds = array<i64: 1, 32>}, {pipeline_mode = #tpu.pipeline_mode<synchronous>, transform_indices = @transform_3, window_bounds = array<i64: 3, 96, 16>}, {pipeline_mode = #tpu.pipeline_mode<synchronous>, transform_indices = @transform_4, window_bounds = array<i64: 1, 16>}, {pipeline_mode = #tpu.pipeline_mode<synchronous>, transform_indices = @transform_5, window_bounds = array<i64: 3, 48, 12>}, {pipeline_mode = #tpu.pipeline_mode<synchronous>, transform_indices = @transform_6, window_bounds = array<i64: 1, 12>}, {transform_indices = @transform_7, window_bounds = array<i64: 1, 1, 8, 16, 12>}]} {
    %c8_i32 = arith.constant 8 : i32
    %0 = arith.muli %arg1, %c8_i32 : i32
    %c0 = arith.constant 0 : index
    %c0_0 = arith.constant 0 : index
    %c0_1 = arith.constant 0 : index
    %c0_2 = arith.constant 0 : index
    %c0_3 = arith.constant 0 : index
    %1 = vector.load %arg2[%c0, %c0_0, %c0_1, %c0_2, %c0_3] : memref<1x1x14x22x3xbf16, #tpu.memory_space<vmem>>, vector<1x1x14x22x3xbf16>
    %2 = vector.shape_cast %1 : vector<1x1x14x22x3xbf16> to vector<14x22x3xbf16>
    %c0_4 = arith.constant 0 : index
    %c0_5 = arith.constant 0 : index
    %c0_6 = arith.constant 0 : index
    %3 = vector.load %arg3[%c0_4, %c0_5, %c0_6] : memref<3x9x32xbf16, #tpu.memory_space<vmem>>, vector<3x9x32xbf16>
    %c0_7 = arith.constant 0 : index
    %c0_8 = arith.constant 0 : index
    %4 = vector.load %arg4[%c0_7, %c0_8] : memref<1x32xf32, #tpu.memory_space<vmem>>, vector<1x32xf32>
    %5 = vector.extract_strided_slice %2 {offsets = [0, 0, 0], sizes = [12, 22, 3], strides = [1, 1, 1]} : vector<14x22x3xbf16> to vector<12x22x3xbf16>
    %6 = vector.extract_strided_slice %5 {offsets = [0, 0, 0], sizes = [12, 20, 3], strides = [1, 1, 1]} : vector<12x22x3xbf16> to vector<12x20x3xbf16>
    %7 = vector.extract_strided_slice %5 {offsets = [0, 1, 0], sizes = [12, 20, 3], strides = [1, 1, 1]} : vector<12x22x3xbf16> to vector<12x20x3xbf16>
    %8 = vector.extract_strided_slice %5 {offsets = [0, 2, 0], sizes = [12, 20, 3], strides = [1, 1, 1]} : vector<12x22x3xbf16> to vector<12x20x3xbf16>
    %9 = tpu.concatenate %6, %7, %8 in 2 : vector<12x20x3xbf16>, vector<12x20x3xbf16>, vector<12x20x3xbf16> -> vector<12x20x9xbf16>
    %10 = vector.extract_strided_slice %3 {offsets = [0, 0, 0], sizes = [1, 9, 32], strides = [1, 1, 1]} : vector<3x9x32xbf16> to vector<1x9x32xbf16>
    %11 = vector.shape_cast %10 : vector<1x9x32xbf16> to vector<9x32xbf16>
    "tpu.trace_start"() <{level = 10 : i32, message = "hwk,ko->hwo"}> : () -> ()
    %cst = arith.constant dense<0.000000e+00> : vector<12x20x32xf32>
    %12 = tpu.matmul %9, %11, %cst {dimension_numbers = #tpu.dot_dimension_numbers<[2], [0], [0, 1], [1], [0, 0, 0, 1, 1, 1], [], []>} : vector<12x20x9xbf16>, vector<9x32xbf16>, vector<12x20x32xf32> -> vector<12x20x32xf32>
    "tpu.trace_stop"() : () -> ()
    %13 = vector.extract_strided_slice %2 {offsets = [1, 0, 0], sizes = [12, 22, 3], strides = [1, 1, 1]} : vector<14x22x3xbf16> to vector<12x22x3xbf16>
    %14 = vector.extract_strided_slice %13 {offsets = [0, 0, 0], sizes = [12, 20, 3], strides = [1, 1, 1]} : vector<12x22x3xbf16> to vector<12x20x3xbf16>
    %15 = vector.extract_strided_slice %13 {offsets = [0, 1, 0], sizes = [12, 20, 3], strides = [1, 1, 1]} : vector<12x22x3xbf16> to vector<12x20x3xbf16>
    %16 = vector.extract_strided_slice %13 {offsets = [0, 2, 0], sizes = [12, 20, 3], strides = [1, 1, 1]} : vector<12x22x3xbf16> to vector<12x20x3xbf16>
    %17 = tpu.concatenate %14, %15, %16 in 2 : vector<12x20x3xbf16>, vector<12x20x3xbf16>, vector<12x20x3xbf16> -> vector<12x20x9xbf16>
    %18 = vector.extract_strided_slice %3 {offsets = [1, 0, 0], sizes = [1, 9, 32], strides = [1, 1, 1]} : vector<3x9x32xbf16> to vector<1x9x32xbf16>
    %19 = vector.shape_cast %18 : vector<1x9x32xbf16> to vector<9x32xbf16>
    "tpu.trace_start"() <{level = 10 : i32, message = "hwk,ko->hwo"}> : () -> ()
    %cst_9 = arith.constant dense<0.000000e+00> : vector<12x20x32xf32>
    %20 = tpu.matmul %17, %19, %cst_9 {dimension_numbers = #tpu.dot_dimension_numbers<[2], [0], [0, 1], [1], [0, 0, 0, 1, 1, 1], [], []>} : vector<12x20x9xbf16>, vector<9x32xbf16>, vector<12x20x32xf32> -> vector<12x20x32xf32>
    "tpu.trace_stop"() : () -> ()
    %21 = arith.addf %12, %20 : vector<12x20x32xf32>
    %22 = vector.extract_strided_slice %2 {offsets = [2, 0, 0], sizes = [12, 22, 3], strides = [1, 1, 1]} : vector<14x22x3xbf16> to vector<12x22x3xbf16>
    %23 = vector.extract_strided_slice %22 {offsets = [0, 0, 0], sizes = [12, 20, 3], strides = [1, 1, 1]} : vector<12x22x3xbf16> to vector<12x20x3xbf16>
    %24 = vector.extract_strided_slice %22 {offsets = [0, 1, 0], sizes = [12, 20, 3], strides = [1, 1, 1]} : vector<12x22x3xbf16> to vector<12x20x3xbf16>
    %25 = vector.extract_strided_slice %22 {offsets = [0, 2, 0], sizes = [12, 20, 3], strides = [1, 1, 1]} : vector<12x22x3xbf16> to vector<12x20x3xbf16>
    %26 = tpu.concatenate %23, %24, %25 in 2 : vector<12x20x3xbf16>, vector<12x20x3xbf16>, vector<12x20x3xbf16> -> vector<12x20x9xbf16>
    %27 = vector.extract_strided_slice %3 {offsets = [2, 0, 0], sizes = [1, 9, 32], strides = [1, 1, 1]} : vector<3x9x32xbf16> to vector<1x9x32xbf16>
    %28 = vector.shape_cast %27 : vector<1x9x32xbf16> to vector<9x32xbf16>
    "tpu.trace_start"() <{level = 10 : i32, message = "hwk,ko->hwo"}> : () -> ()
    %cst_10 = arith.constant dense<0.000000e+00> : vector<12x20x32xf32>
    %29 = tpu.matmul %26, %28, %cst_10 {dimension_numbers = #tpu.dot_dimension_numbers<[2], [0], [0, 1], [1], [0, 0, 0, 1, 1, 1], [], []>} : vector<12x20x9xbf16>, vector<9x32xbf16>, vector<12x20x32xf32> -> vector<12x20x32xf32>
    "tpu.trace_stop"() : () -> ()
    %30 = arith.addf %21, %29 : vector<12x20x32xf32>
    %31 = vector.shape_cast %4 : vector<1x32xf32> to vector<1x1x32xf32>
    %32 = vector.broadcast %31 : vector<1x1x32xf32> to vector<12x20x32xf32>
    %33 = arith.addf %30, %32 : vector<12x20x32xf32>
    %cst_11 = arith.constant 0.000000e+00 : f32
    %34 = vector.broadcast %cst_11 : f32 to vector<12x20x32xf32>
    %35 = arith.maximumf %33, %34 : vector<12x20x32xf32>
    %c2_i32 = arith.constant 2 : i32
    %36 = arith.subi %0, %c2_i32 : i32
    %37 = tpu.iota {dimensions = array<i32: 0>} : vector<12x20x1xi32>
    %38 = vector.broadcast %36 : i32 to vector<12x20x1xi32>
    %39 = arith.addi %37, %38 : vector<12x20x1xi32>
    %40 = tpu.iota {dimensions = array<i32: 1>} : vector<12x20x1xi32>
    %c0_i32 = arith.constant 0 : i32
    %41 = vector.broadcast %c0_i32 : i32 to vector<12x20x1xi32>
    %42 = arith.cmpi sge, %39, %41 : vector<12x20x1xi32>
    %c16_i32 = arith.constant 16 : i32
    %43 = vector.broadcast %c16_i32 : i32 to vector<12x20x1xi32>
    %44 = arith.cmpi slt, %39, %43 : vector<12x20x1xi32>
    %45 = arith.andi %42, %44 : vector<12x20x1xi1>
    %c2_i32_12 = arith.constant 2 : i32
    %46 = vector.broadcast %c2_i32_12 : i32 to vector<12x20x1xi32>
    %47 = arith.cmpi sge, %40, %46 : vector<12x20x1xi32>
    %48 = arith.andi %45, %47 : vector<12x20x1xi1>
    %c18_i32 = arith.constant 18 : i32
    %49 = vector.broadcast %c18_i32 : i32 to vector<12x20x1xi32>
    %50 = arith.cmpi slt, %40, %49 : vector<12x20x1xi32>
    %51 = arith.andi %48, %50 : vector<12x20x1xi1>
    %cst_13 = arith.constant 0.000000e+00 : f32
    %52 = vector.shape_cast %51 : vector<12x20x1xi1> to vector<12x20x1xi1>
    %53 = vector.broadcast %52 : vector<12x20x1xi1> to vector<12x20x32xi1>
    %54 = vector.broadcast %cst_13 : f32 to vector<12x20x32xf32>
    %55 = arith.select %53, %35, %54 : vector<12x20x32xi1>, vector<12x20x32xf32>
    %56 = arith.truncf %55 : vector<12x20x32xf32> to vector<12x20x32xbf16>
    %c0_14 = arith.constant 0 : index
    %c0_15 = arith.constant 0 : index
    %c0_16 = arith.constant 0 : index
    %57 = vector.load %arg10[%c0_14, %c0_15, %c0_16] : memref<12x20x32xbf16, #tpu.memory_space<vmem>>, vector<12x20x32xbf16>
    tpu.vector_store %arg10[%c0_14, %c0_15, %c0_16], %56 {strides = array<i32>} : memref<12x20x32xbf16, #tpu.memory_space<vmem>>, vector<12x20x32xbf16>,
    %c0_17 = arith.constant 0 : index
    %c0_18 = arith.constant 0 : index
    %c0_19 = arith.constant 0 : index
    %58 = vector.load %arg10[%c0_17, %c0_18, %c0_19] : memref<12x20x32xbf16, #tpu.memory_space<vmem>>, vector<12x20x32xbf16>
    %c0_20 = arith.constant 0 : index
    %c0_21 = arith.constant 0 : index
    %c0_22 = arith.constant 0 : index
    %59 = vector.load %arg5[%c0_20, %c0_21, %c0_22] : memref<3x96x16xbf16, #tpu.memory_space<vmem>>, vector<3x96x16xbf16>
    %c0_23 = arith.constant 0 : index
    %c0_24 = arith.constant 0 : index
    %60 = vector.load %arg6[%c0_23, %c0_24] : memref<1x16xf32, #tpu.memory_space<vmem>>, vector<1x16xf32>
    %61 = vector.extract_strided_slice %58 {offsets = [0, 0, 0], sizes = [10, 20, 32], strides = [1, 1, 1]} : vector<12x20x32xbf16> to vector<10x20x32xbf16>
    %62 = vector.extract_strided_slice %61 {offsets = [0, 0, 0], sizes = [10, 18, 32], strides = [1, 1, 1]} : vector<10x20x32xbf16> to vector<10x18x32xbf16>
    %63 = vector.extract_strided_slice %61 {offsets = [0, 1, 0], sizes = [10, 18, 32], strides = [1, 1, 1]} : vector<10x20x32xbf16> to vector<10x18x32xbf16>
    %64 = vector.extract_strided_slice %61 {offsets = [0, 2, 0], sizes = [10, 18, 32], strides = [1, 1, 1]} : vector<10x20x32xbf16> to vector<10x18x32xbf16>
    %65 = tpu.concatenate %62, %63, %64 in 2 : vector<10x18x32xbf16>, vector<10x18x32xbf16>, vector<10x18x32xbf16> -> vector<10x18x96xbf16>
    %66 = vector.extract_strided_slice %59 {offsets = [0, 0, 0], sizes = [1, 96, 16], strides = [1, 1, 1]} : vector<3x96x16xbf16> to vector<1x96x16xbf16>
    %67 = vector.shape_cast %66 : vector<1x96x16xbf16> to vector<96x16xbf16>
    "tpu.trace_start"() <{level = 10 : i32, message = "hwk,ko->hwo"}> : () -> ()
    %cst_25 = arith.constant dense<0.000000e+00> : vector<10x18x16xf32>
    %68 = tpu.matmul %65, %67, %cst_25 {dimension_numbers = #tpu.dot_dimension_numbers<[2], [0], [0, 1], [1], [0, 0, 0, 1, 1, 1], [], []>} : vector<10x18x96xbf16>, vector<96x16xbf16>, vector<10x18x16xf32> -> vector<10x18x16xf32>
    "tpu.trace_stop"() : () -> ()
    %69 = vector.extract_strided_slice %58 {offsets = [1, 0, 0], sizes = [10, 20, 32], strides = [1, 1, 1]} : vector<12x20x32xbf16> to vector<10x20x32xbf16>
    %70 = vector.extract_strided_slice %69 {offsets = [0, 0, 0], sizes = [10, 18, 32], strides = [1, 1, 1]} : vector<10x20x32xbf16> to vector<10x18x32xbf16>
    %71 = vector.extract_strided_slice %69 {offsets = [0, 1, 0], sizes = [10, 18, 32], strides = [1, 1, 1]} : vector<10x20x32xbf16> to vector<10x18x32xbf16>
    %72 = vector.extract_strided_slice %69 {offsets = [0, 2, 0], sizes = [10, 18, 32], strides = [1, 1, 1]} : vector<10x20x32xbf16> to vector<10x18x32xbf16>
    %73 = tpu.concatenate %70, %71, %72 in 2 : vector<10x18x32xbf16>, vector<10x18x32xbf16>, vector<10x18x32xbf16> -> vector<10x18x96xbf16>
    %74 = vector.extract_strided_slice %59 {offsets = [1, 0, 0], sizes = [1, 96, 16], strides = [1, 1, 1]} : vector<3x96x16xbf16> to vector<1x96x16xbf16>
    %75 = vector.shape_cast %74 : vector<1x96x16xbf16> to vector<96x16xbf16>
    "tpu.trace_start"() <{level = 10 : i32, message = "hwk,ko->hwo"}> : () -> ()
    %cst_26 = arith.constant dense<0.000000e+00> : vector<10x18x16xf32>
    %76 = tpu.matmul %73, %75, %cst_26 {dimension_numbers = #tpu.dot_dimension_numbers<[2], [0], [0, 1], [1], [0, 0, 0, 1, 1, 1], [], []>} : vector<10x18x96xbf16>, vector<96x16xbf16>, vector<10x18x16xf32> -> vector<10x18x16xf32>
    "tpu.trace_stop"() : () -> ()
    %77 = arith.addf %68, %76 : vector<10x18x16xf32>
    %78 = vector.extract_strided_slice %58 {offsets = [2, 0, 0], sizes = [10, 20, 32], strides = [1, 1, 1]} : vector<12x20x32xbf16> to vector<10x20x32xbf16>
    %79 = vector.extract_strided_slice %78 {offsets = [0, 0, 0], sizes = [10, 18, 32], strides = [1, 1, 1]} : vector<10x20x32xbf16> to vector<10x18x32xbf16>
    %80 = vector.extract_strided_slice %78 {offsets = [0, 1, 0], sizes = [10, 18, 32], strides = [1, 1, 1]} : vector<10x20x32xbf16> to vector<10x18x32xbf16>
    %81 = vector.extract_strided_slice %78 {offsets = [0, 2, 0], sizes = [10, 18, 32], strides = [1, 1, 1]} : vector<10x20x32xbf16> to vector<10x18x32xbf16>
    %82 = tpu.concatenate %79, %80, %81 in 2 : vector<10x18x32xbf16>, vector<10x18x32xbf16>, vector<10x18x32xbf16> -> vector<10x18x96xbf16>
    %83 = vector.extract_strided_slice %59 {offsets = [2, 0, 0], sizes = [1, 96, 16], strides = [1, 1, 1]} : vector<3x96x16xbf16> to vector<1x96x16xbf16>
    %84 = vector.shape_cast %83 : vector<1x96x16xbf16> to vector<96x16xbf16>
    "tpu.trace_start"() <{level = 10 : i32, message = "hwk,ko->hwo"}> : () -> ()
    %cst_27 = arith.constant dense<0.000000e+00> : vector<10x18x16xf32>
    %85 = tpu.matmul %82, %84, %cst_27 {dimension_numbers = #tpu.dot_dimension_numbers<[2], [0], [0, 1], [1], [0, 0, 0, 1, 1, 1], [], []>} : vector<10x18x96xbf16>, vector<96x16xbf16>, vector<10x18x16xf32> -> vector<10x18x16xf32>
    "tpu.trace_stop"() : () -> ()
    %86 = arith.addf %77, %85 : vector<10x18x16xf32>
    %87 = vector.shape_cast %60 : vector<1x16xf32> to vector<1x1x16xf32>
    %88 = vector.broadcast %87 : vector<1x1x16xf32> to vector<10x18x16xf32>
    %89 = arith.addf %86, %88 : vector<10x18x16xf32>
    %cst_28 = arith.constant 0.000000e+00 : f32
    %90 = vector.broadcast %cst_28 : f32 to vector<10x18x16xf32>
    %91 = arith.maximumf %89, %90 : vector<10x18x16xf32>
    %c1_i32 = arith.constant 1 : i32
    %92 = arith.subi %0, %c1_i32 : i32
    %93 = tpu.iota {dimensions = array<i32: 0>} : vector<10x18x1xi32>
    %94 = vector.broadcast %92 : i32 to vector<10x18x1xi32>
    %95 = arith.addi %93, %94 : vector<10x18x1xi32>
    %96 = tpu.iota {dimensions = array<i32: 1>} : vector<10x18x1xi32>
    %c0_i32_29 = arith.constant 0 : i32
    %97 = vector.broadcast %c0_i32_29 : i32 to vector<10x18x1xi32>
    %98 = arith.cmpi sge, %95, %97 : vector<10x18x1xi32>
    %c16_i32_30 = arith.constant 16 : i32
    %99 = vector.broadcast %c16_i32_30 : i32 to vector<10x18x1xi32>
    %100 = arith.cmpi slt, %95, %99 : vector<10x18x1xi32>
    %101 = arith.andi %98, %100 : vector<10x18x1xi1>
    %c1_i32_31 = arith.constant 1 : i32
    %102 = vector.broadcast %c1_i32_31 : i32 to vector<10x18x1xi32>
    %103 = arith.cmpi sge, %96, %102 : vector<10x18x1xi32>
    %104 = arith.andi %101, %103 : vector<10x18x1xi1>
    %c17_i32 = arith.constant 17 : i32
    %105 = vector.broadcast %c17_i32 : i32 to vector<10x18x1xi32>
    %106 = arith.cmpi slt, %96, %105 : vector<10x18x1xi32>
    %107 = arith.andi %104, %106 : vector<10x18x1xi1>
    %cst_32 = arith.constant 0.000000e+00 : f32
    %108 = vector.shape_cast %107 : vector<10x18x1xi1> to vector<10x18x1xi1>
    %109 = vector.broadcast %108 : vector<10x18x1xi1> to vector<10x18x16xi1>
    %110 = vector.broadcast %cst_32 : f32 to vector<10x18x16xf32>
    %111 = arith.select %109, %91, %110 : vector<10x18x16xi1>, vector<10x18x16xf32>
    %112 = arith.truncf %111 : vector<10x18x16xf32> to vector<10x18x16xbf16>
    %c0_33 = arith.constant 0 : index
    %c0_34 = arith.constant 0 : index
    %c0_35 = arith.constant 0 : index
    %113 = vector.load %arg11[%c0_33, %c0_34, %c0_35] : memref<10x18x16xbf16, #tpu.memory_space<vmem>>, vector<10x18x16xbf16>
    tpu.vector_store %arg11[%c0_33, %c0_34, %c0_35], %112 {strides = array<i32>} : memref<10x18x16xbf16, #tpu.memory_space<vmem>>, vector<10x18x16xbf16>,
    %c0_36 = arith.constant 0 : index
    %c0_37 = arith.constant 0 : index
    %c0_38 = arith.constant 0 : index
    %114 = vector.load %arg11[%c0_36, %c0_37, %c0_38] : memref<10x18x16xbf16, #tpu.memory_space<vmem>>, vector<10x18x16xbf16>
    %c0_39 = arith.constant 0 : index
    %c0_40 = arith.constant 0 : index
    %c0_41 = arith.constant 0 : index
    %115 = vector.load %arg7[%c0_39, %c0_40, %c0_41] : memref<3x48x12xbf16, #tpu.memory_space<vmem>>, vector<3x48x12xbf16>
    %c0_42 = arith.constant 0 : index
    %c0_43 = arith.constant 0 : index
    %116 = vector.load %arg8[%c0_42, %c0_43] : memref<1x12xf32, #tpu.memory_space<vmem>>, vector<1x12xf32>
    %117 = vector.extract_strided_slice %114 {offsets = [0, 0, 0], sizes = [8, 18, 16], strides = [1, 1, 1]} : vector<10x18x16xbf16> to vector<8x18x16xbf16>
    %118 = vector.extract_strided_slice %117 {offsets = [0, 0, 0], sizes = [8, 16, 16], strides = [1, 1, 1]} : vector<8x18x16xbf16> to vector<8x16x16xbf16>
    %119 = vector.extract_strided_slice %117 {offsets = [0, 1, 0], sizes = [8, 16, 16], strides = [1, 1, 1]} : vector<8x18x16xbf16> to vector<8x16x16xbf16>
    %120 = vector.extract_strided_slice %117 {offsets = [0, 2, 0], sizes = [8, 16, 16], strides = [1, 1, 1]} : vector<8x18x16xbf16> to vector<8x16x16xbf16>
    %121 = tpu.concatenate %118, %119, %120 in 2 : vector<8x16x16xbf16>, vector<8x16x16xbf16>, vector<8x16x16xbf16> -> vector<8x16x48xbf16>
    %122 = vector.extract_strided_slice %115 {offsets = [0, 0, 0], sizes = [1, 48, 12], strides = [1, 1, 1]} : vector<3x48x12xbf16> to vector<1x48x12xbf16>
    %123 = vector.shape_cast %122 : vector<1x48x12xbf16> to vector<48x12xbf16>
    "tpu.trace_start"() <{level = 10 : i32, message = "hwk,ko->hwo"}> : () -> ()
    %cst_44 = arith.constant dense<0.000000e+00> : vector<8x16x12xf32>
    %124 = tpu.matmul %121, %123, %cst_44 {dimension_numbers = #tpu.dot_dimension_numbers<[2], [0], [0, 1], [1], [0, 0, 0, 1, 1, 1], [], []>} : vector<8x16x48xbf16>, vector<48x12xbf16>, vector<8x16x12xf32> -> vector<8x16x12xf32>
    "tpu.trace_stop"() : () -> ()
    %125 = vector.extract_strided_slice %114 {offsets = [1, 0, 0], sizes = [8, 18, 16], strides = [1, 1, 1]} : vector<10x18x16xbf16> to vector<8x18x16xbf16>
    %126 = vector.extract_strided_slice %125 {offsets = [0, 0, 0], sizes = [8, 16, 16], strides = [1, 1, 1]} : vector<8x18x16xbf16> to vector<8x16x16xbf16>
    %127 = vector.extract_strided_slice %125 {offsets = [0, 1, 0], sizes = [8, 16, 16], strides = [1, 1, 1]} : vector<8x18x16xbf16> to vector<8x16x16xbf16>
    %128 = vector.extract_strided_slice %125 {offsets = [0, 2, 0], sizes = [8, 16, 16], strides = [1, 1, 1]} : vector<8x18x16xbf16> to vector<8x16x16xbf16>
    %129 = tpu.concatenate %126, %127, %128 in 2 : vector<8x16x16xbf16>, vector<8x16x16xbf16>, vector<8x16x16xbf16> -> vector<8x16x48xbf16>
    %130 = vector.extract_strided_slice %115 {offsets = [1, 0, 0], sizes = [1, 48, 12], strides = [1, 1, 1]} : vector<3x48x12xbf16> to vector<1x48x12xbf16>
    %131 = vector.shape_cast %130 : vector<1x48x12xbf16> to vector<48x12xbf16>
    "tpu.trace_start"() <{level = 10 : i32, message = "hwk,ko->hwo"}> : () -> ()
    %cst_45 = arith.constant dense<0.000000e+00> : vector<8x16x12xf32>
    %132 = tpu.matmul %129, %131, %cst_45 {dimension_numbers = #tpu.dot_dimension_numbers<[2], [0], [0, 1], [1], [0, 0, 0, 1, 1, 1], [], []>} : vector<8x16x48xbf16>, vector<48x12xbf16>, vector<8x16x12xf32> -> vector<8x16x12xf32>
    "tpu.trace_stop"() : () -> ()
    %133 = arith.addf %124, %132 : vector<8x16x12xf32>
    %134 = vector.extract_strided_slice %114 {offsets = [2, 0, 0], sizes = [8, 18, 16], strides = [1, 1, 1]} : vector<10x18x16xbf16> to vector<8x18x16xbf16>
    %135 = vector.extract_strided_slice %134 {offsets = [0, 0, 0], sizes = [8, 16, 16], strides = [1, 1, 1]} : vector<8x18x16xbf16> to vector<8x16x16xbf16>
    %136 = vector.extract_strided_slice %134 {offsets = [0, 1, 0], sizes = [8, 16, 16], strides = [1, 1, 1]} : vector<8x18x16xbf16> to vector<8x16x16xbf16>
    %137 = vector.extract_strided_slice %134 {offsets = [0, 2, 0], sizes = [8, 16, 16], strides = [1, 1, 1]} : vector<8x18x16xbf16> to vector<8x16x16xbf16>
    %138 = tpu.concatenate %135, %136, %137 in 2 : vector<8x16x16xbf16>, vector<8x16x16xbf16>, vector<8x16x16xbf16> -> vector<8x16x48xbf16>
    %139 = vector.extract_strided_slice %115 {offsets = [2, 0, 0], sizes = [1, 48, 12], strides = [1, 1, 1]} : vector<3x48x12xbf16> to vector<1x48x12xbf16>
    %140 = vector.shape_cast %139 : vector<1x48x12xbf16> to vector<48x12xbf16>
    "tpu.trace_start"() <{level = 10 : i32, message = "hwk,ko->hwo"}> : () -> ()
    %cst_46 = arith.constant dense<0.000000e+00> : vector<8x16x12xf32>
    %141 = tpu.matmul %138, %140, %cst_46 {dimension_numbers = #tpu.dot_dimension_numbers<[2], [0], [0, 1], [1], [0, 0, 0, 1, 1, 1], [], []>} : vector<8x16x48xbf16>, vector<48x12xbf16>, vector<8x16x12xf32> -> vector<8x16x12xf32>
    "tpu.trace_stop"() : () -> ()
    %142 = arith.addf %133, %141 : vector<8x16x12xf32>
    %143 = vector.shape_cast %116 : vector<1x12xf32> to vector<1x1x12xf32>
    %144 = vector.broadcast %143 : vector<1x1x12xf32> to vector<8x16x12xf32>
    %145 = arith.addf %142, %144 : vector<8x16x12xf32>
    %c0_47 = arith.constant 0 : index
    %c0_48 = arith.constant 0 : index
    %c0_49 = arith.constant 0 : index
    %c0_50 = arith.constant 0 : index
    %c0_51 = arith.constant 0 : index
    %146 = vector.load %arg9[%c0_47, %c0_48, %c0_49, %c0_50, %c0_51] : memref<1x1x8x16x12xf32, #tpu.memory_space<vmem>>, vector<1x1x8x16x12xf32>
    %147 = vector.shape_cast %146 : vector<1x1x8x16x12xf32> to vector<8x16x12xf32>
    %148 = vector.shape_cast %145 : vector<8x16x12xf32> to vector<1x1x8x16x12xf32>
    tpu.vector_store %arg9[%c0_47, %c0_48, %c0_49, %c0_50, %c0_51], %148 {strides = array<i32>} : memref<1x1x8x16x12xf32, #tpu.memory_space<vmem>>, vector<1x1x8x16x12xf32>,
    return
  }
  func.func @transform_0(%arg0: i32, %arg1: i32) -> (i32, i32, i32, i32, i32) {
    %c0_i32 = arith.constant 0 : i32
    %c0_i32_0 = arith.constant 0 : i32
    %c0_i32_1 = arith.constant 0 : i32
    %c0_i32_2 = arith.constant 0 : i32
    return %arg0, %arg1, %c0_i32, %c0_i32_0, %c0_i32_1 : i32, i32, i32, i32, i32
  }
  func.func @transform_1(%arg0: i32, %arg1: i32) -> (i32, i32, i32) {
    %c0_i32 = arith.constant 0 : i32
    %c0_i32_0 = arith.constant 0 : i32
    %c0_i32_1 = arith.constant 0 : i32
    %c0_i32_2 = arith.constant 0 : i32
    return %c0_i32, %c0_i32_0, %c0_i32_1 : i32, i32, i32
  }
  func.func @transform_2(%arg0: i32, %arg1: i32) -> (i32, i32) {
    %c0_i32 = arith.constant 0 : i32
    %c0_i32_0 = arith.constant 0 : i32
    %c0_i32_1 = arith.constant 0 : i32
    return %c0_i32, %c0_i32_0 : i32, i32
  }
  func.func @transform_3(%arg0: i32, %arg1: i32) -> (i32, i32, i32) {
    %c0_i32 = arith.constant 0 : i32
    %c0_i32_0 = arith.constant 0 : i32
    %c0_i32_1 = arith.constant 0 : i32
    %c0_i32_2 = arith.constant 0 : i32
    return %c0_i32, %c0_i32_0, %c0_i32_1 : i32, i32, i32
  }
  func.func @transform_4(%arg0: i32, %arg1: i32) -> (i32, i32) {
    %c0_i32 = arith.constant 0 : i32
    %c0_i32_0 = arith.constant 0 : i32
    %c0_i32_1 = arith.constant 0 : i32
    return %c0_i32, %c0_i32_0 : i32, i32
  }
  func.func @transform_5(%arg0: i32, %arg1: i32) -> (i32, i32, i32) {
    %c0_i32 = arith.constant 0 : i32
    %c0_i32_0 = arith.constant 0 : i32
    %c0_i32_1 = arith.constant 0 : i32
    %c0_i32_2 = arith.constant 0 : i32
    return %c0_i32, %c0_i32_0, %c0_i32_1 : i32, i32, i32
  }
  func.func @transform_6(%arg0: i32, %arg1: i32) -> (i32, i32) {
    %c0_i32 = arith.constant 0 : i32
    %c0_i32_0 = arith.constant 0 : i32
    %c0_i32_1 = arith.constant 0 : i32
    return %c0_i32, %c0_i32_0 : i32, i32
  }
  func.func @transform_7(%arg0: i32, %arg1: i32) -> (i32, i32, i32, i32, i32) {
    %c0_i32 = arith.constant 0 : i32
    %c0_i32_0 = arith.constant 0 : i32
    %c0_i32_1 = arith.constant 0 : i32
    %c0_i32_2 = arith.constant 0 : i32
    return %arg0, %arg1, %c0_i32, %c0_i32_0, %c0_i32_1 : i32, i32, i32, i32, i32
  }
}

</mosaic_0001>

<bundles_post_ra>
// kernel: cs143_forward.1
= control target key start
LH: loop header
LB: loop body
LE: loop exit
PB: predicated region body
PF: predicated region fallthrough
CT: control target
= control target key end

     0   :  { %s6446_s24 = smov 0   ;;  %s6448_s25 = smov 0   ;;  %s9581_s0 = inlined_call_operand.vmem [shape: bf16[2,2,14,22,3], index: 0, kind: input, shape index: {}]   ;;  %s9582_s1 = inlined_call_operand.vmem [shape: bf16[3,9,32], index: 1, kind: input, shape index: {}]   ;;  %s9583_s2 = inlined_call_operand.vmem [shape: f32[1,32], index: 2, kind: input, shape index: {}]   ;;  %s9584_s3 = inlined_call_operand.vmem [shape: bf16[3,96,16], index: 3, kind: input, shape index: {}]   ;;  %s9585_s4 = inlined_call_operand.vmem [shape: f32[1,16], index: 4, kind: input, shape index: {}]   ;;  %s9586_s5 = inlined_call_operand.vmem [shape: bf16[3,48,12], index: 5, kind: input, shape index: {}]   ;;  %s9587_s6 = inlined_call_operand.vmem [shape: f32[1,12], index: 6, kind: input, shape index: {}]   ;;  %s9588_s7 = inlined_call_operand.vmem [shape: f32[2,2,8,16,12], index: 7, kind: output, shape index: {}]  }
   0x1   :  { %s6450_s26 = smov 0   ;;  %s6452_s27 = smov 0  }
   0x2   :  { %s6454_s28 = smov 0  }
   0x3 LB: > { %s26_s29 = sadd.s32 1, %s6390_s26  ;;  %s29_s30 = sadd.s32 1, %s6394_s27  ;;  %s6398_s28 = sphi %s6454_s28, %s17_s28   ;;  %s6394_s27 = sphi %s6452_s27, %s9926_s27   ;;  %s6390_s26 = sphi %s6450_s26, %s9925_s26   ;;  %s6386_s25 = sphi %s6448_s25, %s9924_s25   ;;  %s6382_s24 = sphi %s6446_s24, %s9923_s24  }
   0x4   : > { %p27_p0 = scmp.ge.s32.totalorder %s26_s29, 2  ;;  %p5853_p1 = scmp.ge.s32.totalorder %s6398_s28, 1 }
   0x5   : > { %p257_p2 = scmp.lt.s32.totalorder %s6398_s28, 5 }
   0x6   : > { %s9928_s29 = smov (%p27_p0, %s26_s29), 0  ;;  %s9930_s30 = smov (!%p27_p0, %s29_s30), %s6394_s27 }
   0x7   : > { %p258_p3 = pnand %p5853_p1, %p257_p2  ;;  %p31_p4 = scmp.ge.s32.totalorder %s9930_s30, 2 }
   0x9   : > { %s9932_s30 = smov (%p31_p4, %s9930_s30), 0  ;;  %261 = sbr.rel (%p258_p3) target bundleno = 1876 (0x754), region = 48 }
   0xe   : > { %p297_p5 = scmp.lt.s32.totalorder %s6386_s25, 1  ;;  %p299_p6 = scmp.lt.s32.totalorder %s6382_s24, 1  ;;  %vm691_vm0 = vcmask 1046528   ;;  %vm462_vm1 = vsmask.f32 7424  ;;  %vm1118_vm2 = vcmask 1043456  }
   0xf   : > { %s6400_s16 = smov 6   ;;  %s6401_s17 = smov 3   ;;  %vm1119_vm3 = vcmask 1044480   ;;  %vm776_vm4 = vcmask 23552   ;;  %vm825_vm5 = vcmask 48128   ;;  %vm1087_vm6 = vcmask 72704  }
  0x10   : > { %s9934_s25 = smov (!%p297_p5, %s6386_s25), 1  ;;  %vm2512_vm12 = vcmask 257024   ;;  %s6403_s19 = smov 64  }
  0x11   : > { %s6482_s8 = scalar_select %p299_p6, %s6382_s24, 1 }
  0x12   : > { %s6300_s9 = smul.u32 84, %s9934_s25  ;;  %s6404_s20 = smov 32  }
  0x13   : > { %s6299_s10 = smul.u32 42, %s6482_s8 }
  0x15   : > { %s303_s11 = sadd.s32 %s6300_s9, %s6299_s10 }
  0x16   : > { %s5854_s12 = sshll.u32 %s303_s11, 2  ;;  %s5855_s11 = sshll.u32 %s6482_s8, 4 }
  0x17   : > { %s6489_s15 = scalar_lea.vmem %s9581_s0, %s5854_s12  ;;  %s6405_s12 = smov 16  }
  0x18   : > { %v6492_v0 = vld [vmem:[%s6489_s15 + $0xc] sm:$0xff]  ;;  %v322_v1 = vld [vmem:[%s6489_s15 + $0x14] sm:$0x7]  ;;  %v6496_v2 = vld [vmem:[%s6489_s15 + $0x18] sm:$0xff] }
  0x19   : > { %v407_v3 = vunpack.c.l.b16 %v322_v1  ;;  %v325_v4 = vld [vmem:[%s6489_s15 + $0x20] sm:$0x7]  ;;  %v479_v5 = vshrl.u32 %v6492_v0, 16  ;;  %v481_v6 = vshll.u32 %v6492_v0, 16  ;;  %v695_v9 = vrot.slane %v6492_v0, 1  ;;  %v6514_v23 = vld [vmem:[%s6489_s15 + $0x24] sm:$0xff] }
  0x1a   : > { %v410_v7 = vunpack.c.l.b16 %v325_v4  ;;  %v496_v10 = vshll.u32 %v6496_v2, 16  ;;  %v328_v11 = vld [vmem:[%s6489_s15 + $0x2c] sm:$0x7]  ;;  %v494_v17 = vshrl.u32 %v6496_v2, 16  ;;  %v698_v25 = vrot.slane %v6496_v2, 1  ;;  %v6529_v34 = vld [vmem:[%s6489_s15 + $0x30] sm:$0xff] }
  0x1b   : > { %v6501_v8 = vpack.c.b16 %v407_v3, %v407_v3  ;;  %v483_v12 = vrot.slane %v481_v6, 1  ;;  %v413_v18 = vunpack.c.l.b16 %v328_v11  ;;  %v331_v28 = vld [vmem:[%s6489_s15 + $0x38] sm:$0x7]  ;;  %v511_v31 = vshll.u32 %v6514_v23, 16  ;;  %v334_v53 = vld [vmem:[%s6489_s15 + $0x44] sm:$0x7] }
  0x1c   : > { %v6506_v13 = vpack.c.b16 %v410_v7, %v410_v7  ;;  %v498_v21 = vrot.slane %v496_v10, 1  ;;  %v416_v35 = vunpack.c.l.b16 %v331_v28  ;;  %v509_v37 = vshrl.u32 %v6514_v23, 16  ;;  %v6551_v55 = vld [vmem:[%s6489_s15 + $0x3c] sm:$0xff]  ;;  %v337_v11 = vld [vmem:[%s6489_s15 + $0x50] sm:$0x7] }
  0x1d   : > { %v696_v14 = vrot.slane %v6501_v8, 1  ;;  %v486_v15 = vshll.u32 %v6501_v8, 16  ;;  %v484_v16 = vor.u32 %v483_v12, %v479_v5  ;;  %v6522_v27 = vpack.c.b16 %v413_v18, %v413_v18 }
  0x1e   : > { %v501_v22 = vshll.u32 %v6506_v13, 16  ;;  %v699_v26 = vrot.slane %v6506_v13, 1  ;;  %v499_v29 = vor.u32 %v498_v21, %v494_v17  ;;  %v490_v32 = vshrl.u32 %v6501_v8, 16  ;;  %v6574_v17 = vld [vmem:[%s6489_s15 + $0x48] sm:$0xff] }
  0x1f   : > { %v697_v19 = vsel %vm691_vm0, %v695_v9, %v696_v14  ;;  %v488_v20 = vrot.slane %v486_v15, 1  ;;  %734 = vrot.lane.b32.xlu2 %v696_v14, %s6400_s16  ;;  %v513_v39 = vrot.slane %v511_v31, 1  ;;  %v516_v40 = vshll.u32 %v6522_v27, 16  ;;  %v340_v9 = vld [vmem:[%s6489_s15 + $0x5c] sm:$0x7]  ;;  %v6571_v15 = vld [vmem:[%s6489_s15 + $0x54] sm:$0xff] }
  0x20   : > { %732 = vrot.lane.b32.xlu1 %v697_v19, %s6400_s16  ;;  %v503_v30 = vrot.slane %v501_v22, 1  ;;  %v700_v33 = vsel %vm691_vm0, %v698_v25, %v699_v26  ;;  %v505_v41 = vshrl.u32 %v6506_v13, 16  ;;  %v701_v42 = vrot.slane %v6514_v23, 1 }
  0x21   : > { %v489_v24 = vsel %vm462_vm1, %v484_v16, %v488_v20  ;;  %v492_v36 = vor.u32 %v490_v32, %v488_v20  ;;  %v702_v43 = vrot.slane %v6522_v27, 1  ;;  %v6539_v44 = vpack.c.b16 %v416_v35, %v416_v35 }
  0x22   : > { %647 = vrot.lane.b32.xlu0 %v489_v24, %s6401_s17  ;;  %v504_v38 = vsel %vm462_vm1, %v499_v29, %v503_v30  ;;  %v526_v45 = vshll.u32 %v6529_v34, 16  ;;  %v514_v46 = vor.u32 %v513_v39, %v509_v37  ;;  %v518_v47 = vrot.slane %v516_v40, 1 }
  0x23   : > { %v507_v48 = vor.u32 %v505_v41, %v503_v30  ;;  %v703_v49 = vsel %vm691_vm0, %v701_v42, %v702_v43  ;;  %v524_v50 = vshrl.u32 %v6529_v34, 16  ;;  %v531_v52 = vshll.u32 %v6539_v44, 16 }
  0x24   : > { %v528_v51 = vrot.slane %v526_v45, 1  ;;  %v519_v54 = vsel %vm462_vm1, %v514_v46, %v518_v47  ;;  %v419_v56 = vunpack.c.l.b16 %v334_v53  ;;  %v520_v59 = vshrl.u32 %v6522_v27, 16  ;;  %v343_v45 = vld [vmem:[%s6489_s15 + $0x68] sm:$0x7] }
  0x25   : > { %v533_v58 = vrot.slane %v531_v52, 1  ;;  %v541_v60 = vshll.u32 %v6551_v55, 16  ;;  %v539_v62 = vshrl.u32 %v6551_v55, 16  ;;  %v704_v6 = vrot.slane %v6529_v34, 1 }
  0x26   : > { %v529_v57 = vor.u32 %v528_v51, %v524_v50  ;;  %v6556_v61 = vpack.c.b16 %v419_v56, %v419_v56  ;;  %v522_v3 = vor.u32 %v520_v59, %v518_v47  ;;  %v705_v7 = vrot.slane %v6539_v44, 1  ;;  %v6607_v51 = vld [vmem:[%s6489_s15 + $0x60] sm:$0xff] }
  0x27   : > { %649 = vrot.lane.b32.xlu2 %v492_v36, %s6401_s17  ;;  %v543_v63 = vrot.slane %v541_v60, 1  ;;  %v425_v16 = vunpack.c.l.b16 %v340_v9  ;;  %v422_v18 = vunpack.c.l.b16 %v337_v11  ;;  %v535_v19 = vshrl.u32 %v6539_v44, 16 }
  0x28   : > { %736 = vrot.lane.b32.xlu1 %v700_v33, %s6400_s16  ;;  %v534_v1 = vsel %vm462_vm1, %v529_v57, %v533_v58  ;;  %v546_v4 = vshll.u32 %v6556_v61, 16  ;;  %v706_v14 = vsel %vm691_vm0, %v704_v6, %v705_v7  ;;  %v571_v21 = vshll.u32 %v6571_v15, 16 }
  0x29   : > { %v544_v5 = vor.u32 %v543_v63, %v539_v62  ;;  %v6579_v20 = vpack.c.b16 %v425_v16, %v425_v16  ;;  %v707_v22 = vrot.slane %v6551_v55, 1  ;;  %v708_v24 = vrot.slane %v6556_v61, 1 }
  0x2a   : > { %651 = vrot.lane.b32.xlu0 %v504_v38, %s6401_s17  ;;  %v548_v10 = vrot.slane %v546_v4, 1  ;;  %v6585_v25 = vpack.c.b16 %v422_v18, %v422_v18  ;;  %v537_v28 = vor.u32 %v535_v19, %v533_v58  ;;  %v569_v29 = vshrl.u32 %v6571_v15, 16 }
  0x2b   : > { %v573_v30 = vrot.slane %v571_v21, 1  ;;  %v576_v31 = vshll.u32 %v6579_v20, 16  ;;  %v709_v32 = vsel %vm691_vm0, %v707_v22, %v708_v24  ;;  %v554_v33 = vshrl.u32 %v6574_v17, 16  ;;  %v349_v21 = vld [vmem:[%s6489_s15 + $0x80] sm:$0x7] }
  0x2c   : > { %v549_v12 = vsel %vm462_vm1, %v544_v5, %v548_v10  ;;  %v561_v36 = vshll.u32 %v6585_v25, 16  ;;  %v710_v37 = vrot.slane %v6574_v17, 1  ;;  %v711_v40 = vrot.slane %v6585_v25, 1  ;;  %v346_v5 = vld [vmem:[%s6489_s15 + $0x74] sm:$0x7] }
  0x2d   : > { %v574_v38 = vor.u32 %v573_v30, %v569_v29  ;;  %v578_v39 = vrot.slane %v576_v31, 1  ;;  %v550_v50 = vshrl.u32 %v6556_v61, 16  ;;  %v713_v52 = vrot.slane %v6571_v15, 1 }
  0x2e   : > { %v563_v42 = vrot.slane %v561_v36, 1  ;;  %v714_v53 = vrot.slane %v6579_v20, 1  ;;  %v586_v57 = vshll.u32 %v6607_v51, 16  ;;  %v584_v59 = vshrl.u32 %v6607_v51, 16 }
  0x2f   : > { %653 = vrot.lane.b32.xlu2 %v507_v48, %s6401_s17  ;;  %v579_v46 = vsel %vm462_vm1, %v574_v38, %v578_v39  ;;  %v428_v48 = vunpack.c.l.b16 %v343_v45  ;;  %v552_v58 = vor.u32 %v550_v50, %v548_v10  ;;  %v431_v9 = vunpack.c.l.b16 %v346_v5  ;;  %v6628_v10 = vld [vmem:[%s6489_s15 + $0x6c] sm:$0xff] }
  0x30   : > { %740 = vrot.lane.b32.xlu1 %v703_v49, %s6400_s16  ;;  %v565_v49 = vshrl.u32 %v6585_v25, 16  ;;  %v588_v60 = vrot.slane %v586_v57, 1  ;;  %v715_v63 = vsel %vm691_vm0, %v713_v52, %v714_v53  ;;  %v716_v11 = vrot.slane %v6607_v51, 1  ;;  %v6247_v5 = vld [vmem:[%s9582_s1 + $0x8] sm:$0x10] }
  0x31   : > { %v601_v16 = vshll.u32 %v6628_v10, 16  ;;  %v6634_v19 = vpack.c.b16 %v431_v9, %v431_v9  ;;  %v599_v22 = vshrl.u32 %v6628_v10, 16  ;;  %v434_v30 = vunpack.c.l.b16 %v349_v21  ;;  %v6689_v21 = vld [vmem:[%s6489_s15 + $0x90] sm:$0xff] }
  0x32   : > { %655 = vrot.lane.b32.xlu0 %v519_v54, %s6401_s17  ;;  %v6612_v54 = vpack.c.b16 %v428_v48, %v428_v48  ;;  %v567_v56 = vor.u32 %v565_v49, %v563_v42  ;;  %v6661_v49 = vld [vmem:[%s6489_s15 + $0x84] sm:$0xff] }
  0x33   : > { %v720_v45 = vrot.slane %v6634_v19, 1  ;;  %v631_v57 = vshll.u32 %v6661_v49, 16 }
  0x34   : > { %v591_v62 = vshll.u32 %v6612_v54, 16  ;;  %v595_v6 = vshrl.u32 %v6612_v54, 16 }
  0x37   : > { %738 = vrot.lane.b32.xlu2 %v699_v26, %s6400_s16  ;;  %v556_v26 = vshll.u32 %v6574_v17, 16 }
  0x38   : > { %659 = vrot.lane.b32.xlu1 %v534_v1, %s6401_s17  ;;  %v589_v1 = vor.u32 %v588_v60, %v584_v59  ;;  %v633_v59 = vrot.slane %v631_v57, 1 }
  0x39   : > { %v558_v35 = vrot.slane %v556_v26, 1  ;;  %v603_v26 = vrot.slane %v601_v16, 1 }
  0x3a   : > { %657 = vrot.lane.b32.xlu0 %v522_v3, %s6401_s17  ;;  %v593_v3 = vrot.slane %v591_v62, 1 }
  0x3b   : > { %v559_v41 = vor.u32 %v558_v35, %v554_v33  ;;  %v604_v31 = vor.u32 %v603_v26, %v599_v22  ;;  %v6646_v33 = vpack.c.b16 %v434_v30, %v434_v30  ;;  %v319_v30 = vld [vmem:[%s6489_s15 + $0x8] sm:$0x7] }
  0x3c   : > { %v594_v4 = vsel %vm462_vm1, %v589_v1, %v593_v3 }
  0x3d   : > { %v564_v47 = vsel %vm462_vm1, %v559_v41, %v563_v42  ;;  %v723_v41 = vrot.slane %v6646_v33, 1  ;;  %v625_v26 = vshrl.u32 %v6646_v33, 16 }
  0x3f   : > { %663 = vrot.lane.b32.xlu2 %v549_v12, %s6401_s17  ;;  %v717_v12 = vrot.slane %v6612_v54, 1 }
  0x40   : > { %744 = vrot.lane.b32.xlu1 %v706_v14, %s6400_s16  ;;  %v597_v14 = vor.u32 %v595_v6, %v593_v3  ;;  %v610_v3 = vshrl.u32 %v6634_v19, 16  ;;  %v355_v6 = vld [vmem:[%s6489_s15 + $0x98] sm:$0x7] }
  0x41   : > { %v718_v29 = vsel %vm691_vm0, %v716_v11, %v717_v12  ;;  %v6402_v11 = vmov 65535   ;;  %v879_v22 = vunpack.c.l.b16 %v355_v6 }
  0x42   : > { %742 = vrot.lane.b32.xlu0 %v702_v43, %s6400_s16  ;;  %v712_v43 = vsel %vm691_vm0, %v710_v37, %v711_v40  ;;  %v352_v37 = vld [vmem:[%s6489_s15 + $0x8c] sm:$0x7] }
  0x47   : > { %746 = vrot.lane.b32.xlu2 %v705_v7, %s6400_s16  ;;  %v580_v7 = vshrl.u32 %v6579_v20, 16 }
  0x48   : > { %661 = vrot.lane.b32.xlu1 %v537_v28, %s6401_s17  ;;  %v606_v28 = vshll.u32 %v6634_v19, 16 }
  0x49   : > { %v582_v18 = vor.u32 %v580_v7, %v578_v39 }
  0x4a   : > { %748 = vrot.lane.b32.xlu0 %v709_v32, %s6400_s16  ;;  %v608_v32 = vrot.slane %v606_v28, 1 }
  0x4c   : > { %v609_v36 = vsel %vm462_vm1, %v604_v31, %v608_v32  ;;  %v612_v16 = vor.u32 %v610_v3, %v608_v32  ;;  %v725_v31 = vrot.slane %v6661_v49, 1 }
  0x4f   : > { %752 = vrot.lane.b32.xlu2 %v712_v43, %s6400_s16  ;;  %v719_v43 = vrot.slane %v6628_v10, 1 }
  0x50   : > { %671 = vrot.lane.b32.xlu1 %v579_v46, %s6401_s17  ;;  %v437_v46 = vunpack.c.l.b16 %v352_v37  ;;  %v885_v37 = vshll.u32 %v6689_v21, 16 }
  0x51   : > { %v721_v52 = vsel %vm691_vm0, %v719_v43, %v720_v45 }
  0x52   : > { %667 = vrot.lane.b32.xlu0 %v564_v47, %s6401_s17 }
  0x57   : > { %669 = vrot.lane.b32.xlu2 %v567_v56, %s6401_s17  ;;  %v6667_v56 = vpack.c.b16 %v437_v46, %v437_v46  ;;  %v887_v46 = vrot.slane %v885_v37, 1 }
  0x58   : > { %665 = vrot.lane.b32.xlu1 %v552_v58, %s6401_s17 }
  0x59   : > { %v636_v60 = vshll.u32 %v6667_v56, 16  ;;  %v640_v28 = vshrl.u32 %v6667_v56, 16  ;;  %v726_v32 = vrot.slane %v6667_v56, 1 }
  0x5a   : > { %756 = vrot.lane.b32.xlu0 %v715_v63, %s6400_s16 }
  0x5b   : > { %v638_v1 = vrot.slane %v636_v60, 1  ;;  %v727_v43 = vsel %vm691_vm0, %v725_v31, %v726_v32 }
  0x5f   : > { %675 = vrot.lane.b32.xlu2 %v594_v4, %s6401_s17  ;;  %v5913_v4 = vld [vmem:[%s9582_s1 + $0x8] sm:$0xf] }
  0x60   : > { %754 = vrot.lane.b32.xlu1 %v711_v40, %s6400_s16  ;;  %v621_v40 = vshll.u32 %v6646_v33, 16  ;;  %v5914_v9 = vor.u32 %v6247_v5, %v5913_v4 }
  0x62   : > { %750 = vrot.lane.b32.xlu0 %v708_v24, %s6400_s16  ;;  %v6641_v24 = vld [vmem:[%s6489_s15 + $0x78] sm:$0xff]  ;;  %v623_v48 = vrot.slane %v621_v40, 1 }
  0x63   : > { %v616_v35 = vshll.u32 %v6641_v24, 16  ;;  %v614_v38 = vshrl.u32 %v6641_v24, 16  ;;  %v722_v42 = vrot.slane %v6641_v24, 1 }
  0x64   : > { %v627_v40 = vor.u32 %v625_v26, %v623_v48  ;;  %v6749_v26 = vld [vmem:[%s6489_s15] sm:$0xff] }
  0x65   : > { %v618_v39 = vrot.slane %v616_v35, 1  ;;  %v724_v50 = vsel %vm691_vm0, %v722_v42, %v723_v41  ;;  %v404_v42 = vunpack.c.l.b16 %v319_v30 }
  0x67   : > { %677 = vrot.lane.b32.xlu2 %v597_v14, %s6401_s17  ;;  %v619_v47 = vor.u32 %v618_v39, %v614_v38  ;;  %v642_v39 = vor.u32 %v640_v28, %v638_v1 }
  0x68   : > { %673 = vrot.lane.b32.xlu1 %v582_v18, %s6401_s17 }
  0x69   : > { %v624_v58 = vsel %vm462_vm1, %v619_v47, %v623_v48 }
  0x6a   : > { %760 = vrot.lane.b32.xlu0 %v718_v29, %s6400_s16 }
  0x6f   : > { %679 = vrot.lane.b32.xlu2 %v609_v36, %s6401_s17  ;;  %v6701_v36 = vpack.c.b16 %v879_v22, %v879_v22 }
  0x70   : > { %762 = vrot.lane.b32.xlu1 %v717_v12, %s6400_s16  ;;  %v1120_v12 = vsel %vm1118_vm2, 4294967295, %v6402_v11 }
  0x71   : > { %v6685_v14 = vsel %vm1119_vm3, %v1120_v12, 0  ;;  %v890_v47 = vshll.u32 %v6701_v36, 16  ;;  %vm2515_vm3 = vcmask 254976  }
  0x72   : > { %758 = vrot.lane.b32.xlu0 %v714_v53, %s6400_s16  ;;  %v629_v53 = vshrl.u32 %v6661_v49, 16  ;;  %v1123_v18 = vand.u32 %v5914_v9, %v6685_v14 }
  0x74   : > { %v634_v63 = vor.u32 %v633_v59, %v629_v53  ;;  %1132 = vmatpush.bf16.msra.mxu0 %v1123_v18 }
  0x76   : > { %v639_v7 = vsel %vm462_vm1, %v634_v63, %v638_v1  ;;  %v901_v63 = vrot.slane %v6689_v21, 1  ;;  %v902_v1 = vrot.slane %v6701_v36, 1 }
  0x77   : > { %768 = vrot.lane.b32.xlu2 %v724_v50, %s6400_s16 }
  0x78   : > { %764 = vrot.lane.b32.xlu1 %v721_v52, %s6400_s16  ;;  %v892_v52 = vrot.slane %v890_v47, 1  ;;  %v903_v12 = vsel %vm691_vm0, %v901_v63, %v902_v1 }
  0x79   : > { %v735_v62 = vpop.permute.xlu2 %734 }
  0x7a   : > { %683 = vrot.lane.b32.xlu0 %v624_v58, %s6401_s17 }
  0x7f   : > { %687 = vrot.lane.b32.xlu2 %v639_v7, %s6401_s17 }
  0x80   : > { %766 = vrot.lane.b32.xlu1 %v720_v45, %s6400_s16  ;;  %v883_v45 = vshrl.u32 %v6689_v21, 16 }
  0x81   : > { %v650_v29 = vpop.permute.xlu2 %649 }
  0x82   : > { %681 = vrot.lane.b32.xlu0 %v612_v16, %s6401_s17  ;;  %v784_v35 = vsel %vm776_vm4, %v6501_v8, %v650_v29  ;;  %v6713_v8 = vpack.c.b16 %v404_v42, %v404_v42  ;;  %v888_v48 = vor.u32 %v887_v46, %v883_v45  ;;  %v692_v46 = vrot.slane %v6749_v26, 1 }
  0x83   : > { %v6705_v38 = vsel %vm825_vm5, %v784_v35, %v735_v62 }
  0x84   : > { %975 = vst [vmem:[#allocation1 + $0x20] ss:$4 sm:$0xff] %v6705_v38  ;;  %v471_v57 = vshll.u32 %v6713_v8, 16  ;;  %v893_v58 = vsel %vm462_vm1, %v888_v48, %v892_v52  ;;  %v475_v59 = vshrl.u32 %v6713_v8, 16  ;;  %v693_v31 = vrot.slane %v6713_v8, 1 }
  0x86   : > { %v473_v53 = vrot.slane %v471_v57, 1 }
  0x87   : > { %689 = vrot.lane.b32.xlu2 %v642_v39, %s6401_s17 }
  0x88   : > { %685 = vrot.lane.b32.xlu1 %v627_v40, %s6401_s17  ;;  %v477_v4 = vor.u32 %v475_v59, %v473_v53 }
  0x89   : > { %v654_v50 = vpop.permute.xlu2 %653 }
  0x8a   : > { %772 = vrot.lane.b32.xlu0 %v727_v43, %s6400_s16  ;;  %v788_v30 = vsel %vm776_vm4, %v6506_v13, %v654_v50 }
  0x8f   : > { %774 = vrot.lane.b32.xlu2 %v726_v32, %s6400_s16  ;;  %v466_v32 = vshll.u32 %v6749_v26, 16 }
  0x90   : > { %770 = vrot.lane.b32.xlu1 %v723_v41, %s6400_s16  ;;  %v894_v41 = vshrl.u32 %v6701_v36, 16 }
  0x91   : > { %v739_v60 = vpop.permute.xlu2 %738  ;;  %v468_v13 = vrot.slane %v466_v32, 1 }
  0x92   : > { %v733_v62 = vpop.permute.xlu1 %732  ;;  %897 = vrot.lane.b32.xlu0 %v893_v58, %s6401_s17  ;;  %v896_v16 = vor.u32 %v894_v41, %v892_v52  ;;  %v6774_v40 = vsel %vm825_vm5, %v788_v30, %v739_v60 }
  0x94   : > { %v648_v3 = vpop.permute.xlu0 %647 }
  0x95   : > { %v782_v5 = vsel %vm776_vm4, %v6492_v0, %v648_v3 }
  0x96   : > { %v6729_v6 = vsel %vm825_vm5, %v782_v5, %v733_v62 }
  0x97   : > { %v9590_v7 = vrot.slane %v6729_v6, 2  ;;  %v9591_v9 = vrot.slane %v6729_v6, 4  ;;  %v9589_v11 = vrot.slane %v6729_v6, 6  ;;  %964 = vst [vmem:[#allocation1] ss:$4 sm:$0xff] %v6729_v6  ;;  %899 = vrot.lane.b32.xlu2 %v896_v16, %s6401_s17 }
  0x98   : > { %645 = vrot.lane.b32.xlu1 %v477_v4, %s6401_s17 }
  0x99   : > { %967 = vst [vmem:[#allocation1 + $0x1] ss:$4 sm:$0xff] %v9590_v7  ;;  %v6740_v0 = vpop.permute.xlu2 %663 }
  0x9a   : > { %970 = vst [vmem:[#allocation1 + $0x2] ss:$4 sm:$0xff] %v9591_v9  ;;  %v737_v18 = vpop.permute.xlu1 %736  ;;  %904 = vrot.lane.b32.xlu0 %v903_v12, %s6400_s16 }
  0x9b   : > { %973 = vst [vmem:[#allocation1 + $0x3] ss:$4 sm:$0xff] %v9589_v11 }
  0x9c   : > { %v652_v22 = vpop.permute.xlu0 %651 }
  0x9d   : > { %v786_v28 = vsel %vm776_vm4, %v6496_v2, %v652_v22  ;;  %v464_v2 = vshrl.u32 %v6749_v26, 16 }
  0x9e   : > { %v6754_v29 = vsel %vm825_vm5, %v786_v28, %v737_v18 }
  0x9f   : > { %v6761_v35 = vrot.slane %v6754_v29, 2  ;;  %v6764_v37 = vrot.slane %v6754_v29, 4  ;;  %v6767_v39 = vrot.slane %v6754_v29, 6  ;;  %977 = vst [vmem:[#allocation1 + $0x21] ss:$4 sm:$0xff] %v6754_v29  ;;  %v469_v45 = vor.u32 %v468_v13, %v464_v2 }
  0xa0   : > { %906 = vrot.lane.b32.xlu1 %v902_v1, %s6400_s16 }
  0xa1   : > { %980 = vst [vmem:[#allocation1 + $0x22] ss:$4 sm:$0xff] %v6761_v35  ;;  %v747_v47 = vpop.permute.xlu2 %746  ;;  %v474_v48 = vsel %vm462_vm1, %v469_v45, %v473_v53  ;;  %v694_v53 = vsel %vm691_vm0, %v692_v46, %v693_v31 }
  0xa2   : > { %v984_v42 = vld.sshfl [vmem:[#allocation1] sm:$0xff pattern:$0x73625140]  ;;  %983 = vst [vmem:[#allocation1 + $0x23] ss:$4 sm:$0xff] %v6764_v37  ;;  %v741_v43 = vpop.permute.xlu1 %740  ;;  %730 = vrot.lane.b32.xlu0 %v693_v31, %s6400_s16  ;;  %643 = vrot.lane.b32.xlu2 %v474_v48, %s6401_s17  ;;  %v798_v31 = vsel %vm776_vm4, %v6551_v55, %v6740_v0 }
  0xa3   : > { %987 = vst [vmem:[#allocation1] ss:$4 sm:$0xff] %v6767_v39  ;;  %5915 = vmatmul.msk.bf16.vlgmr.msra.gmra.mxu0 %vm1087_vm6, %v984_v42 }
  0xa4   : > { %v656_v50 = vpop.permute.xlu0 %655  ;;  %988 = vst [vmem:[#allocation1 + $0x1] ss:$4 sm:$0xff] %v6774_v40 }
  0xa5   : > { %v790_v52 = vsel %vm776_vm4, %v6514_v23, %v656_v50 }
  0xa6   : > { %v6787_v57 = vsel %vm825_vm5, %v790_v52, %v741_v43 }
  0xa7   : > { %v6790_v58 = vrot.slane %v6787_v57, 2  ;;  %v6793_v59 = vrot.slane %v6787_v57, 4  ;;  %v6796_v60 = vrot.slane %v6787_v57, 6  ;;  %989 = vst [vmem:[#allocation1 + $0x2] ss:$4 sm:$0xff] %v6787_v57 }
  0xa9   : > { %v985_v62 = vld.sshfl [vmem:[#allocation1 + $0x20] sm:$0xff pattern:$0x73625140]  ;;  %991 = vst [vmem:[#allocation1 + $0x3] ss:$4 sm:$0xff] %v6790_v58  ;;  %v753_v1 = vpop.permute.xlu2 %752 }
  0xaa   : > { %995 = vst [vmem:[#allocation1 + $0x21] ss:$4 sm:$0xff] %v6796_v60  ;;  %v660_v23 = vpop.permute.xlu1 %659  ;;  %728 = vrot.lane.b32.xlu0 %v694_v53, %s6400_s16 }
  0xab   : > { %993 = vst [vmem:[#allocation1 + $0x20] ss:$4 sm:$0xff] %v6793_v59  ;;  %v794_v3 = vsel %vm776_vm4, %v6529_v34, %v660_v23 }
  0xac   : > { %v658_v63 = vpop.permute.xlu0 %657 }
  0xad   : > { %v792_v34 = vsel %vm776_vm4, %v6522_v27, %v658_v63 }
  0xb0   : > { %v998_v22 = vld.sshfl [vmem:[#allocation1] sm:$0xff pattern:$0x73625140] }
  0xb1   : > { %v670_v30 = vpop.permute.xlu2 %669 }
  0xb2   : > { %v745_v4 = vpop.permute.xlu1 %744 }
  0xb3   : > { %5916 = vmatmul.msk.bf16.gmra.mxu0 %vm1087_vm6, %v985_v62  ;;  %v6808_v5 = vsel %vm825_vm5, %v794_v3, %v745_v4 }
  0xb4   : > { %v6811_v41 = vrot.slane %v6808_v5, 2  ;;  %v6814_v12 = vrot.slane %v6808_v5, 4  ;;  %v6817_v16 = vrot.slane %v6808_v5, 6  ;;  %997 = vst [vmem:[#allocation1 + $0x23] ss:$4 sm:$0xff] %v6808_v5  ;;  %v743_v18 = vpop.permute.xlu0 %742 }
  0xb5   : > { %v6824_v28 = vsel %vm825_vm5, %v792_v34, %v743_v18 }
  0xb6   : > { %1003 = vst [vmem:[#allocation1 + $0x1] ss:$4 sm:$0xff] %v6814_v12 }
  0xb7   : > { %1005 = vst [vmem:[#allocation1 + $0x2] ss:$4 sm:$0xff] %v6817_v16 }
  0xb8   : > { %1001 = vst [vmem:[#allocation1] ss:$4 sm:$0xff] %v6811_v41 }
  0xb9   : > { %996 = vst [vmem:[#allocation1 + $0x22] ss:$4 sm:$0xff] %v6824_v28 }
  0xba   : > { %v662_v32 = vpop.permute.xlu1 %661 }
  0xbb   : > { %v796_v27 = vsel %vm776_vm4, %v6539_v44, %v662_v32  ;;  %v676_v44 = vpop.permute.xlu2 %675 }
  0xbc   : > { %v6835_v2 = vsel %vm825_vm5, %v796_v27, %v747_v47  ;;  %v749_v13 = vpop.permute.xlu0 %748 }
  0xbd   : > { %1006 = vst [vmem:[#allocation1 + $0x3] ss:$4 sm:$0xff] %v6835_v2  ;;  %v6839_v42 = vsel %vm825_vm5, %v798_v31, %v749_v13 }
  0xbe   : > { %v6842_v43 = vrot.slane %v6839_v42, 6  ;;  %v6845_v45 = vrot.slane %v6839_v42, 2  ;;  %v6848_v0 = vrot.slane %v6839_v42, 4 }
  0xc0   : > { %v999_v55 = vld.sshfl [vmem:[#allocation1 + $0x20] sm:$0xff pattern:$0x73625140] }
  0xc1   : > { %1007 = vst [vmem:[#allocation1 + $0x20] ss:$4 sm:$0xff] %v6839_v42 }
  0xc2   : > { %1013 = vst [vmem:[#allocation1 + $0x23] ss:$4 sm:$0xff] %v6842_v43  ;;  %v672_v46 = vpop.permute.xlu1 %671 }
  0xc3   : > { %1009 = vst [vmem:[#allocation1 + $0x21] ss:$4 sm:$0xff] %v6845_v45  ;;  %5917 = vmatmul.msk.bf16.gmra.mxu0 %vm1087_vm6, %v998_v22  ;;  %v806_v3 = vsel %vm776_vm4, %v6571_v15, %v672_v46  ;;  %v804_v22 = vsel %vm776_vm4, %v6585_v25, %v670_v30  ;;  %v810_v25 = vsel %vm776_vm4, %v6607_v51, %v676_v44 }
  0xc4   : > { %1011 = vst [vmem:[#allocation1 + $0x22] ss:$4 sm:$0xff] %v6848_v0  ;;  %v668_v47 = vpop.permute.xlu0 %667  ;;  %v1014_v48 = vld.sshfl [vmem:[#allocation1] sm:$0xff pattern:$0x73625140] }
  0xc5   : > { %v802_v50 = vsel %vm776_vm4, %v6574_v17, %v668_v47 }
  0xc6   : > { %v6858_v52 = vsel %vm825_vm5, %v802_v50, %v753_v1  ;;  %v678_v1 = vpop.permute.xlu2 %677 }
  0xc7   : > { %v6861_v53 = vrot.slane %v6858_v52, 2  ;;  %v6864_v62 = vrot.slane %v6858_v52, 4  ;;  %1017 = vst [vmem:[#allocation1 + $0x1] ss:$4 sm:$0xff] %v6858_v52  ;;  %v6868_v23 = vrot.slane %v6858_v52, 6 }
  0xc9   : > { %1019 = vst [vmem:[#allocation1 + $0x2] ss:$4 sm:$0xff] %v6861_v53 }
  0xca   : > { %1021 = vst [vmem:[#allocation1 + $0x3] ss:$4 sm:$0xff] %v6864_v62  ;;  %v666_v17 = vpop.permute.xlu1 %665 }
  0xcb   : > { %v6872_v63 = vld.sshfl [vmem:[#allocation1 + $0x20] sm:$0xff pattern:$0x73625140]  ;;  %v800_v32 = vsel %vm776_vm4, %v6556_v61, %v666_v17 }
  0xcc   : > { %1023 = vst [vmem:[#allocation1 + $0x20] ss:$4 sm:$0xff] %v6868_v23  ;;  %v757_v4 = vpop.permute.xlu0 %756 }
  0xcd   : > { %v6878_v18 = vsel %vm825_vm5, %v806_v3, %v757_v4 }
  0xce   : > { %v6881_v34 = vrot.slane %v6878_v18, 2  ;;  %1025 = vst [vmem:[#allocation1 + $0x22] ss:$4 sm:$0xff] %v6878_v18  ;;  %v680_v46 = vpop.permute.xlu2 %679  ;;  %v6904_v50 = vrot.slane %v6878_v18, 6 }
  0xd0   : > { %1027 = vst [vmem:[#allocation1 + $0x23] ss:$4 sm:$0xff] %v6881_v34 }
  0xd2   : > { %v755_v31 = vpop.permute.xlu1 %754 }
  0xd3   : > { %5918 = vmatmul.msk.bf16.gmra.mxu0 %vm1087_vm6, %v999_v55  ;;  %v6889_v15 = vsel %vm825_vm5, %v804_v22, %v755_v31  ;;  %v6901_v55 = vrot.slane %v6878_v18, 4  ;;  %v812_v22 = vsel %vm776_vm4, %v6612_v54, %v678_v1 }
  0xd4   : > { %1024 = vst [vmem:[#allocation1 + $0x21] ss:$4 sm:$0xff] %v6889_v15  ;;  %v751_v27 = vpop.permute.xlu0 %750 }
  0xd5   : > { %v6895_v13 = vsel %vm825_vm5, %v800_v32, %v751_v27 }
  0xd6   : > { %1016 = vst [vmem:[#allocation1] ss:$4 sm:$0xff] %v6895_v13  ;;  %v769_v4 = vpop.permute.xlu2 %768 }
  0xda   : > { %v674_v30 = vpop.permute.xlu1 %673 }
  0xdb   : > { %v6924_v31 = vld.sshfl [vmem:[#allocation1 + $0x20] sm:$0xff pattern:$0x73625140]  ;;  %v808_v54 = vsel %vm776_vm4, %v6579_v20, %v674_v30  ;;  %v814_v20 = vsel %vm776_vm4, %v6628_v10, %v680_v46 }
  0xdc   : > { %v761_v47 = vpop.permute.xlu0 %760 }
  0xdd   : > { %v6906_v61 = vld.sshfl [vmem:[#allocation1] sm:$0xff pattern:$0x73625140]  ;;  %v6909_v17 = vsel %vm825_vm5, %v810_v25, %v761_v47 }
  0xde   : > { %9694 = vst [vmem:[#allocation4_spill] sm:$0xff] %v6909_v17  ;;  %v6913_v3 = vrot.slane %v6909_v17, 2  ;;  %v6916_v51 = vrot.slane %v6909_v17, 6  ;;  %v6920_v44 = vrot.slane %v6909_v17, 4  ;;  %v358_v25 = vld [vmem:[%s6489_s15 + $0xa4] sm:$0x7] }
  0xdf   : > { %1031 = vst [vmem:[#allocation1] ss:$4 sm:$0xff] %v6901_v55  ;;  %v6939_v47 = vld [vmem:[%s6489_s15 + $0x9c] sm:$0xff]  ;;  %v1515_v11 = vunpack.c.l.b16 %v358_v25 }
  0xe0   : > { %9695 = vst [vmem:[#allocation5_spill] sm:$0xff] %v6913_v3 }
  0xe1   : > { %9696 = vst [vmem:[#allocation6_spill] sm:$0xff] %v6916_v51  ;;  %v6945_v9 = vpack.c.b16 %v1515_v11, %v1515_v11 }
  0xe2   : > { %1033 = vst [vmem:[#allocation1 + $0x1] ss:$4 sm:$0xff] %v6904_v50  ;;  %v763_v32 = vpop.permute.xlu1 %762 }
  0xe3   : > { %9697 = vst [vmem:[#allocation7_spill] sm:$0xff] %v6920_v44  ;;  %5919 = vmatmul.msk.bf16.gmra.mxu0 %vm1087_vm6, %v1014_v48  ;;  %v6932_v27 = vsel %vm825_vm5, %v812_v22, %v763_v32  ;;  %v1519_v48 = vshrl.u32 %v6939_v47, 16  ;;  %v1521_v22 = vshll.u32 %v6939_v47, 16  ;;  %v1526_v32 = vshll.u32 %v6945_v9, 16 }
  0xe4   : > { %1035 = vst [vmem:[#allocation1 + $0x3] ss:$4 sm:$0xff] %v6909_v17  ;;  %v759_v1 = vpop.permute.xlu0 %758 }
  0xe5   : > { %1041 = vst [vmem:[#allocation1 + $0x22] ss:$4 sm:$0xff] %v6916_v51  ;;  %v6942_v7 = vsel %vm825_vm5, %v808_v54, %v759_v1  ;;  %v1523_v30 = vrot.slane %v1521_v22, 1  ;;  %v688_v51 = vpop.permute.xlu2 %687 }
  0xe6   : > { %1037 = vst [vmem:[#allocation1 + $0x20] ss:$4 sm:$0xff] %v6913_v3  ;;  %v6952_v3 = vrot.slane %v1526_v32, 1 }
  0xe7   : > { %1039 = vst [vmem:[#allocation1 + $0x21] ss:$4 sm:$0xff] %v6920_v44  ;;  %v1524_v25 = vor.u32 %v1523_v30, %v1519_v48 }
  0xe8   : > { %1042 = vst [vmem:[#allocation1 + $0x23] ss:$4 sm:$0xff] %v6932_v27 }
  0xe9   : > { %1034 = vst [vmem:[#allocation1 + $0x2] ss:$4 sm:$0xff] %v6942_v7  ;;  %v1529_v10 = vsel %vm462_vm1, %v1524_v25, %v6952_v3 }
  0xea   : > { %v765_v44 = vpop.permute.xlu1 %764  ;;  %9698 = vst [vmem:[#allocation8_spill] sm:$0xff] %v6952_v3  ;;  %1533 = vrot.lane.b32.xlu1 %v1529_v10, %s6401_s17 }
  0xeb   : > { %v6955_v54 = vsel %vm825_vm5, %v814_v20, %v765_v44 }
  0xec   : > { %v6958_v11 = vrot.slane %v6955_v54, 2  ;;  %v6961_v1 = vrot.slane %v6955_v54, 6  ;;  %v684_v17 = vpop.permute.xlu0 %683  ;;  %v6968_v22 = vrot.slane %v6955_v54, 4 }
  0xed   : > { %v818_v48 = vsel %vm776_vm4, %v6641_v24, %v684_v17 }
  0xee   : > { %9699 = vst [vmem:[#allocation9_spill] sm:$0xff] %v6961_v1  ;;  %v6975_v44 = vsel %vm825_vm5, %v818_v48, %v769_v4  ;;  %v690_v4 = vpop.permute.xlu2 %689 }
  0xef   : > { %9700 = vst [vmem:[#allocation10_spill] sm:$0xff] %v6975_v44  ;;  %v6979_v20 = vrot.slane %v6975_v44, 2  ;;  %v6983_v30 = vrot.slane %v6975_v44, 4  ;;  %v6986_v24 = vld.sshfl [vmem:[#allocation1 + $0x20] sm:$0xff pattern:$0x73625140] }
  0xf0   : > { %v6965_v46 = vld.sshfl [vmem:[#allocation1] sm:$0xff pattern:$0x73625140]  ;;  %1053 = vst [vmem:[#allocation1 + $0x21] ss:$4 sm:$0xff] %v6975_v44  ;;  %v6999_v48 = vrot.slane %v6975_v44, 6 }
  0xf1   : > { %1045 = vst [vmem:[#allocation1] ss:$4 sm:$0xff] %v6955_v54 }
  0xf2   : > { %1051 = vst [vmem:[#allocation1 + $0x3] ss:$4 sm:$0xff] %v6961_v1  ;;  %v767_v17 = vpop.permute.xlu1 %766 }
  0xf3   : > { %9701 = vst [vmem:[#allocation11_spill] sm:$0xff] %v6979_v20  ;;  %5920 = vmatmul.msk.bf16.gmra.mxu0 %vm1087_vm6, %v6872_v63  ;;  %v822_v63 = vsel %vm776_vm4, %v6661_v49, %v688_v51 }
  0xf4   : > { %1047 = vst [vmem:[#allocation1 + $0x1] ss:$4 sm:$0xff] %v6958_v11  ;;  %v682_v32 = vpop.permute.xlu0 %681 }
  0xf5   : > { %1049 = vst [vmem:[#allocation1 + $0x2] ss:$4 sm:$0xff] %v6968_v22  ;;  %v816_v25 = vsel %vm776_vm4, %v6634_v19, %v682_v32  ;;  %v824_v19 = vsel %vm776_vm4, %v6667_v56, %v690_v4 }
  0xf6   : > { %1055 = vst [vmem:[#allocation1 + $0x22] ss:$4 sm:$0xff] %v6979_v20  ;;  %v6996_v10 = vsel %vm825_vm5, %v816_v25, %v767_v17  ;;  %v775_v32 = vpop.permute.xlu2 %774 }
  0xf7   : > { %1057 = vst [vmem:[#allocation1 + $0x23] ss:$4 sm:$0xff] %v6983_v30  ;;  %v7026_v49 = vsel %vm825_vm5, %v824_v19, %v775_v32 }
  0xf8   : > { %9702 = vst [vmem:[#allocation12_spill] sm:$0xff] %v6996_v10 }
  0xf9   : > { %9703 = vst [vmem:[#allocation13_spill] sm:$0xff] %v6999_v48 }
  0xfa   : > { %1052 = vst [vmem:[#allocation1 + $0x20] ss:$4 sm:$0xff] %v6996_v10  ;;  %v686_v20 = vpop.permute.xlu1 %685 }
  0xfb   : > { %v820_v56 = vsel %vm776_vm4, %v6646_v33, %v686_v20 }
  0xfc   : > { %v7002_v3 = vld.sshfl [vmem:[#allocation1] sm:$0xff pattern:$0x73625140]  ;;  %v773_v1 = vpop.permute.xlu0 %772 }
  0xfd   : > { %1061 = vst [vmem:[#allocation1] ss:$4 sm:$0xff] %v6999_v48  ;;  %v7010_v17 = vsel %vm825_vm5, %v822_v63, %v773_v1 }
  0xfe   : > { %v7015_v44 = vrot.slane %v7010_v17, 2  ;;  %v7018_v10 = vrot.slane %v7010_v17, 4  ;;  %v7021_v48 = vrot.slane %v7010_v17, 6  ;;  %1063 = vst [vmem:[#allocation1 + $0x2] ss:$4 sm:$0xff] %v7010_v17  ;;  %v900_v20 = vpop.permute.xlu2 %899 }
 0x100   : > { %9704 = vst [vmem:[#allocation14_spill] sm:$0xff] %v7021_v48 }
 0x101   : > { %v7012_v25 = vld.sshfl [vmem:[#allocation1 + $0x20] sm:$0xff pattern:$0x73625140]  ;;  %1065 = vst [vmem:[#allocation1 + $0x3] ss:$4 sm:$0xff] %v7015_v44 }
 0x102   : > { %1069 = vst [vmem:[#allocation1 + $0x21] ss:$4 sm:$0xff] %v7021_v48  ;;  %v771_v51 = vpop.permute.xlu1 %770 }
 0x103   : > { %1067 = vst [vmem:[#allocation1 + $0x20] ss:$4 sm:$0xff] %v7018_v10  ;;  %5921 = vmatmul.msk.bf16.gmra.mxu0 %vm1087_vm6, %v6906_v61  ;;  %v7035_v1 = vsel %vm825_vm5, %v820_v56, %v771_v51 }
 0x104   : > { %1070 = vst [vmem:[#allocation1 + $0x22] ss:$4 sm:$0xff] %v7026_v49  ;;  %v898_v4 = vpop.permute.xlu0 %897 }
 0x105   : > { %1062 = vst [vmem:[#allocation1 + $0x1] ss:$4 sm:$0xff] %v7035_v1  ;;  %v909_v19 = vsel %vm776_vm4, %v6689_v21, %v898_v4  ;;  %v911_v21 = vsel %vm776_vm4, %v6701_v36, %v900_v20  ;;  %v9705_v20 = vrot.slane %v6729_v6, 4 }
 0x10a   : > { %v646_v63 = vpop.permute.xlu1 %645 }
 0x10c   : > { %v905_v32 = vpop.permute.xlu0 %904  ;;  %v7048_v51 = vld.sshfl [vmem:[#allocation1] sm:$0xff pattern:$0x73625140] }
 0x10d   : > { %v7042_v33 = vsel %vm825_vm5, %v909_v19, %v905_v32 }
 0x10e   : > { %v9613_v48 = vrot.slane %v7042_v33, 2  ;;  %v9615_v61 = vrot.slane %v7042_v33, 4  ;;  %v9614_v56 = vrot.slane %v7042_v33, 6  ;;  %1071 = vst [vmem:[#allocation1 + $0x23] ss:$4 sm:$0xff] %v7042_v33 }
 0x110   : > { %1075 = vst [vmem:[#allocation1] ss:$4 sm:$0xff] %v9613_v48  ;;  %v780_v48 = vsel %vm776_vm4, %v6713_v8, %v646_v63 }
 0x111   : > { %1077 = vst [vmem:[#allocation1 + $0x1] ss:$4 sm:$0xff] %v9615_v61 }
 0x112   : > { %1079 = vst [vmem:[#allocation1 + $0x2] ss:$4 sm:$0xff] %v9614_v56  ;;  %v907_v4 = vpop.permute.xlu1 %906 }
 0x113   : > { %5922 = vmatmul.msk.bf16.gmra.mxu0 %vm1087_vm6, %v6924_v31  ;;  %v7061_v19 = vsel %vm825_vm5, %v911_v21, %v907_v4  ;;  %v9706_v31 = vrot.slane %v6729_v6, 2  ;;  %v644_v4 = vpop.permute.xlu2 %643 }
 0x114   : > { %1080 = vst [vmem:[#allocation1 + $0x3] ss:$4 sm:$0xff] %v7061_v19  ;;  %v731_v32 = vpop.permute.xlu0 %730  ;;  %v778_v8 = vsel %vm776_vm4, %v6749_v26, %v644_v4  ;;  %v1537_v26 = vrot.slane %v6939_v47, 1 }
 0x115   : > { %v7066_v36 = vld.sshfl [vmem:[#allocation1 + $0x20] sm:$0xff pattern:$0x73625140]  ;;  %v829_v56 = vsel %vm825_vm5, %v780_v48, %v731_v32 }
 0x116   : > { %1230 = vst [vmem:[#allocation1 + $0x23] ss:$4 sm:$0xff] %v9705_v20 }
 0x117   : > { %1226 = vst [vmem:[#allocation1 + $0x21] ss:$4 sm:$0xff] %v6729_v6 }
 0x118   : > { %1228 = vst [vmem:[#allocation1 + $0x22] ss:$4 sm:$0xff] %v9706_v31 }
 0x119   : > { %1224 = vst [vmem:[#allocation1 + $0x20] ss:$4 sm:$0xff] %v829_v56 }
 0x11b   : > { %v7081_v48 = vld.sshfl [vmem:[#allocation1] sm:$0xff pattern:$0x73625140] }
 0x11c   : > { %v729_v63 = vpop.permute.xlu0 %728 }
 0x11d   : > { %v827_v56 = vsel %vm825_vm5, %v778_v8, %v729_v63  ;;  %v5932_v8 = vld [vmem:[%s9582_s1] sm:$0xf]  ;;  %v9707_v63 = vrot.slane %v6729_v6, 6 }
 0x11e   : > { %v1210_v32 = vrot.slane %v827_v56, 2  ;;  %v1211_v20 = vrot.slane %v827_v56, 4  ;;  %v1212_v31 = vrot.slane %v827_v56, 6  ;;  %1213 = vst [vmem:[#allocation1] ss:$4 sm:$0xff] %v827_v56 }
 0x120   : > { %v1232_v21 = vld.sshfl [vmem:[#allocation1 + $0x20] sm:$0xff pattern:$0x73625140]  ;;  %1216 = vst [vmem:[#allocation1 + $0x1] ss:$4 sm:$0xff] %v1210_v32 }
 0x121   : > { %1237 = vst [vmem:[#allocation1 + $0x20] ss:$4 sm:$0xff] %v6764_v37  ;;  %v6246_v32 = vld [vmem:[%s9582_s1] sm:$0x10] }
 0x122   : > { %1238 = vst [vmem:[#allocation1 + $0x21] ss:$4 sm:$0xff] %v6767_v39 }
 0x123   : > { %1239 = vst [vmem:[#allocation1 + $0x22] ss:$4 sm:$0xff] %v6774_v40  ;;  %5923 = vmatmul.msk.bf16.gmra.mxu0 %vm1087_vm6, %v6965_v46  ;;  %v1538_v46 = vrot.slane %v6945_v9, 1 }
 0x124   : > { %1240 = vst [vmem:[#allocation1 + $0x23] ss:$4 sm:$0xff] %v6787_v57 }
 0x125   : > { %1219 = vst [vmem:[#allocation1 + $0x2] ss:$4 sm:$0xff] %v1211_v20  ;;  %v1539_v56 = vsel %vm691_vm0, %v1537_v26, %v1538_v46  ;;  %1542 = vrot.lane.b32.xlu1 %v1538_v46, %s6400_s16  ;;  %v5933_v20 = vor.u32 %v6246_v32, %v5932_v8  ;;  %v9710_v8 = vld [vmem:[#allocation13_spill] sm:$0xff] }
 0x126   : > { %1222 = vst [vmem:[#allocation1 + $0x3] ss:$4 sm:$0xff] %v1212_v31  ;;  %1540 = vrot.lane.b32.xlu2 %v1539_v56, %s6400_s16  ;;  %v9712_v56 = vld [vmem:[#allocation4_spill] sm:$0xff]  ;;  %v9713_v32 = vld [vmem:[#allocation5_spill] sm:$0xff] }
 0x127   : > { %v1334_v6 = vand.u32 %v5933_v20, %v6685_v14  ;;  %v9714_v20 = vld [vmem:[#allocation7_spill] sm:$0xff] }
 0x129   : > { %1343 = vmatpush.bf16.msra.mxu1 %v1334_v6  ;;  %6298 = vmatpush.bf16.msra.mxu2 %v1334_v6  ;;  %v9715_v6 = vld [vmem:[#allocation6_spill] sm:$0xff] }
 0x12b   : > { %v7085_v61 = vld.sshfl [vmem:[#allocation1 + $0x20] sm:$0xff pattern:$0x73625140] }
 0x12c   : > { %1247 = vst [vmem:[#allocation1 + $0x20] ss:$4 sm:$0xff] %v6808_v5 }
 0x12d   : > { %1248 = vst [vmem:[#allocation1 + $0x21] ss:$4 sm:$0xff] %v6811_v41  ;;  %v1231_v4 = vld.sshfl [vmem:[#allocation1] sm:$0xff pattern:$0x73625140] }
 0x12e   : > { %1249 = vst [vmem:[#allocation1 + $0x22] ss:$4 sm:$0xff] %v6814_v12  ;;  %5934 = vmatmul.msk.bf16.vlgmr.msra.gmra.mxu1 %vm1087_vm6, %v1231_v4  ;;  %v7142_v4 = vpop.f32.mrf.mxu0 }
 0x12f   : > { %1250 = vst [vmem:[#allocation1 + $0x23] ss:$4 sm:$0xff] %v6817_v16 }
 0x130   : > { %1233 = vst [vmem:[#allocation1] ss:$4 sm:$0xff] %v9707_v63 }
 0x131   : > { %1234 = vst [vmem:[#allocation1 + $0x1] ss:$4 sm:$0xff] %v6705_v38 }
 0x132   : > { %1235 = vst [vmem:[#allocation1 + $0x2] ss:$4 sm:$0xff] %v6754_v29 }
 0x133   : > { %5924 = vmatmul.msk.bf16.gmra.mxu0 %vm1087_vm6, %v6986_v24  ;;  %1236 = vst [vmem:[#allocation1 + $0x3] ss:$4 sm:$0xff] %v6761_v35 }
 0x134   : > { %9709 = vst [vmem:[#allocation16_spill] sm:$0xff] %v7142_v4  ;;  %v9716_v4 = vld [vmem:[#allocation9_spill] sm:$0xff] }
 0x136   : > { %v7110_v31 = vld.sshfl [vmem:[#allocation1 + $0x20] sm:$0xff pattern:$0x73625140]  ;;  %v7156_v63 = vpop.f32.mrf.mxu0 }
 0x137   : > { %1257 = vst [vmem:[#allocation1 + $0x20] ss:$4 sm:$0xff] %v6842_v43 }
 0x138   : > { %1258 = vst [vmem:[#allocation1 + $0x21] ss:$4 sm:$0xff] %v6895_v13 }
 0x139   : > { %1259 = vst [vmem:[#allocation1 + $0x22] ss:$4 sm:$0xff] %v6858_v52 }
 0x13a   : > { %1260 = vst [vmem:[#allocation1 + $0x23] ss:$4 sm:$0xff] %v6861_v53  ;;  %v1241_v38 = vld.sshfl [vmem:[#allocation1] sm:$0xff pattern:$0x73625140] }
 0x13b   : > { %1243 = vst [vmem:[#allocation1] ss:$4 sm:$0xff] %v6790_v58 }
 0x13c   : > { %1244 = vst [vmem:[#allocation1 + $0x1] ss:$4 sm:$0xff] %v6793_v59 }
 0x13d   : > { %1245 = vst [vmem:[#allocation1 + $0x2] ss:$4 sm:$0xff] %v6796_v60 }
 0x13e   : > { %1246 = vst [vmem:[#allocation1 + $0x3] ss:$4 sm:$0xff] %v6824_v28  ;;  %5935 = vmatmul.msk.bf16.gmra.mxu1 %vm1087_vm6, %v1232_v21 }
 0x13f   : > { %9711 = vst [vmem:[#allocation13_spill] sm:$0xff] %v7156_v63 }
 0x141   : > { %v7121_v24 = vld.sshfl [vmem:[#allocation1 + $0x20] sm:$0xff pattern:$0x73625140] }
 0x142   : > { %1267 = vst [vmem:[#allocation1 + $0x20] ss:$4 sm:$0xff] %v6881_v34 }
 0x143   : > { %1268 = vst [vmem:[#allocation1 + $0x21] ss:$4 sm:$0xff] %v6901_v55  ;;  %5925 = vmatmul.msk.bf16.gmra.mxu0 %vm1087_vm6, %v7002_v3 }
 0x144   : > { %1269 = vst [vmem:[#allocation1 + $0x22] ss:$4 sm:$0xff] %v6904_v50 }
 0x145   : > { %1270 = vst [vmem:[#allocation1 + $0x23] ss:$4 sm:$0xff] %v6942_v7  ;;  %v1251_v26 = vld.sshfl [vmem:[#allocation1] sm:$0xff pattern:$0x73625140] }
 0x146   : > { %1253 = vst [vmem:[#allocation1] ss:$4 sm:$0xff] %v6835_v2 }
 0x147   : > { %1254 = vst [vmem:[#allocation1 + $0x1] ss:$4 sm:$0xff] %v6839_v42 }
 0x148   : > { %1255 = vst [vmem:[#allocation1 + $0x2] ss:$4 sm:$0xff] %v6845_v45 }
 0x149   : > { %1256 = vst [vmem:[#allocation1 + $0x3] ss:$4 sm:$0xff] %v6848_v0 }
 0x14c   : > { %v7134_v46 = vld.sshfl [vmem:[#allocation1 + $0x20] sm:$0xff pattern:$0x73625140] }
 0x14d   : > { %9708 = vst [vmem:[#allocation15_spill] sm:$0xff] %v7134_v46  ;;  %v9717_v46 = vld [vmem:[#allocation12_spill] sm:$0xff] }
 0x14e   : > { %1277 = vst [vmem:[#allocation1 + $0x20] ss:$4 sm:$0xff] %v6932_v27  ;;  %5936 = vmatmul.msk.bf16.gmra.mxu1 %vm1087_vm6, %v1241_v38  ;;  %v7169_v38 = vpop.f32.mrf.mxu0 }
 0x14f   : > { %1278 = vst [vmem:[#allocation1 + $0x21] ss:$4 sm:$0xff] %v6955_v54 }
 0x150   : > { %1279 = vst [vmem:[#allocation1 + $0x22] ss:$4 sm:$0xff] %v6958_v11  ;;  %v7140_v3 = vld.sshfl [vmem:[#allocation1] sm:$0xff pattern:$0x73625140] }
 0x151   : > { %1280 = vst [vmem:[#allocation1 + $0x23] ss:$4 sm:$0xff] %v6968_v22 }
 0x152   : > { %1263 = vst [vmem:[#allocation1] ss:$4 sm:$0xff] %v6864_v62 }
 0x153   : > { %1264 = vst [vmem:[#allocation1 + $0x1] ss:$4 sm:$0xff] %v6868_v23  ;;  %5926 = vmatmul.msk.bf16.gmra.mxu0 %vm1087_vm6, %v7012_v25 }
 0x154   : > { %1265 = vst [vmem:[#allocation1 + $0x2] ss:$4 sm:$0xff] %v6889_v15 }
 0x155   : > { %1266 = vst [vmem:[#allocation1 + $0x3] ss:$4 sm:$0xff] %v6878_v18 }
 0x158   : > { %v1282_v21 = vld.sshfl [vmem:[#allocation1 + $0x20] sm:$0xff pattern:$0x73625140] }
 0x159   : > { %1287 = vst [vmem:[#allocation1 + $0x20] ss:$4 sm:$0xff] %v6983_v30  ;;  %5945 = vmatmul.msk.bf16.vlgmr.msra.gmra.mxu2 %vm1087_vm6, %v1282_v21 }
 0x15a   : > { %1288 = vst [vmem:[#allocation1 + $0x21] ss:$4 sm:$0xff] %v9710_v8 }
 0x15b   : > { %1289 = vst [vmem:[#allocation1 + $0x22] ss:$4 sm:$0xff] %v7035_v1 }
 0x15c   : > { %1290 = vst [vmem:[#allocation1 + $0x23] ss:$4 sm:$0xff] %v7010_v17  ;;  %v7158_v25 = vld.sshfl [vmem:[#allocation1] sm:$0xff pattern:$0x73625140] }
 0x15d   : > { %1273 = vst [vmem:[#allocation1] ss:$4 sm:$0xff] %v9712_v56 }
 0x15e   : > { %1274 = vst [vmem:[#allocation1 + $0x1] ss:$4 sm:$0xff] %v9713_v32  ;;  %5937 = vmatmul.msk.bf16.gmra.mxu1 %vm1087_vm6, %v7085_v61  ;;  %v9720_v61 = vld [vmem:[#allocation14_spill] sm:$0xff] }
 0x15f   : > { %1275 = vst [vmem:[#allocation1 + $0x2] ss:$4 sm:$0xff] %v9714_v20 }
 0x160   : > { %1276 = vst [vmem:[#allocation1 + $0x3] ss:$4 sm:$0xff] %v9715_v6 }
 0x163   : > { %v1292_v21 = vld.sshfl [vmem:[#allocation1 + $0x20] sm:$0xff pattern:$0x73625140]  ;;  %5927 = vmatmul.msk.bf16.gmra.mxu0 %vm1087_vm6, %v7048_v51  ;;  %v9719_v51 = vld [vmem:[#allocation11_spill] sm:$0xff] }
 0x164   : > { %1564 = vst [vmem:[#allocation1 + $0x20] ss:$4 sm:$0xff] %v6774_v40  ;;  %v9718_v40 = vld [vmem:[#allocation10_spill] sm:$0xff] }
 0x165   : > { %1566 = vst [vmem:[#allocation1 + $0x21] ss:$4 sm:$0xff] %v6787_v57 }
 0x166   : > { %1568 = vst [vmem:[#allocation1 + $0x22] ss:$4 sm:$0xff] %v6790_v58  ;;  %v7184_v58 = vpop.f32.mrf.mxu0 }
 0x167   : > { %1570 = vst [vmem:[#allocation1 + $0x23] ss:$4 sm:$0xff] %v6793_v59  ;;  %v7172_v63 = vld.sshfl [vmem:[#allocation1] sm:$0xff pattern:$0x73625140] }
 0x168   : > { %1283 = vst [vmem:[#allocation1] ss:$4 sm:$0xff] %v9716_v4 }
 0x169   : > { %1284 = vst [vmem:[#allocation1 + $0x1] ss:$4 sm:$0xff] %v9717_v46 }
 0x16a   : > { %1285 = vst [vmem:[#allocation1 + $0x2] ss:$4 sm:$0xff] %v9718_v40 }
 0x16b   : > { %1286 = vst [vmem:[#allocation1 + $0x3] ss:$4 sm:$0xff] %v9719_v51 }
 0x16e   : > { %v7180_v57 = vld.sshfl [vmem:[#allocation1 + $0x20] sm:$0xff pattern:$0x73625140]  ;;  %5938 = vmatmul.msk.bf16.gmra.mxu1 %vm1087_vm6, %v1251_v26 }
 0x16f   : > { %1577 = vst [vmem:[#allocation1 + $0x20] ss:$4 sm:$0xff] %v6814_v12 }
 0x170   : > { %1578 = vst [vmem:[#allocation1 + $0x21] ss:$4 sm:$0xff] %v6817_v16  ;;  %v7198_v16 = vpop.f32.mrf.mxu0 }
 0x171   : > { %1579 = vst [vmem:[#allocation1 + $0x22] ss:$4 sm:$0xff] %v6835_v2 }
 0x172   : > { %1580 = vst [vmem:[#allocation1 + $0x23] ss:$4 sm:$0xff] %v6839_v42  ;;  %v1291_v59 = vld.sshfl [vmem:[#allocation1] sm:$0xff pattern:$0x73625140] }
 0x173   : > { %1293 = vst [vmem:[#allocation1] ss:$4 sm:$0xff] %v7015_v44  ;;  %5946 = vmatmul.msk.bf16.gmra.mxu2 %vm1087_vm6, %v1291_v59  ;;  %5928 = vmatmul.msk.bf16.gmra.mxu0 %vm1087_vm6, %v7066_v36 }
 0x174   : > { %1294 = vst [vmem:[#allocation1 + $0x1] ss:$4 sm:$0xff] %v7018_v10 }
 0x175   : > { %1295 = vst [vmem:[#allocation1 + $0x2] ss:$4 sm:$0xff] %v9720_v61 }
 0x176   : > { %1296 = vst [vmem:[#allocation1 + $0x3] ss:$4 sm:$0xff] %v7026_v49 }
 0x179   : > { %v7195_v12 = vld.sshfl [vmem:[#allocation1 + $0x20] sm:$0xff pattern:$0x73625140] }
 0x17a   : > { %1587 = vst [vmem:[#allocation1 + $0x20] ss:$4 sm:$0xff] %v6858_v52  ;;  %v7210_v52 = vpop.f32.mrf.mxu0 }
 0x17b   : > { %1588 = vst [vmem:[#allocation1 + $0x21] ss:$4 sm:$0xff] %v6861_v53 }
 0x17c   : > { %1589 = vst [vmem:[#allocation1 + $0x22] ss:$4 sm:$0xff] %v6864_v62 }
 0x17d   : > { %1590 = vst [vmem:[#allocation1 + $0x23] ss:$4 sm:$0xff] %v6868_v23  ;;  %v1297_v2 = vld.sshfl [vmem:[#allocation1] sm:$0xff pattern:$0x73625140] }
 0x17e   : > { %1556 = vst [vmem:[#allocation1] ss:$4 sm:$0xff] %v6754_v29  ;;  %5939 = vmatmul.msk.bf16.gmra.mxu1 %vm1087_vm6, %v7110_v31 }
 0x17f   : > { %1558 = vst [vmem:[#allocation1 + $0x1] ss:$4 sm:$0xff] %v6761_v35 }
 0x180   : > { %1560 = vst [vmem:[#allocation1 + $0x2] ss:$4 sm:$0xff] %v6764_v37  ;;  %v6248_v37 = vld [vmem:[%s9582_s1 + $0x10] sm:$0x10]  ;;  %v1541_v62 = vpop.permute.xlu2 %1540 }
 0x181   : > { %1562 = vst [vmem:[#allocation1 + $0x3] ss:$4 sm:$0xff] %v6767_v39 }
 0x183   : > { %5947 = vmatmul.msk.bf16.gmra.mxu2 %vm1087_vm6, %v1292_v21  ;;  %5929 = vmatmul.msk.bf16.gmra.mxu0 %vm1087_vm6, %v7081_v48 }
 0x184   : > { %v7208_v42 = vld.sshfl [vmem:[#allocation1 + $0x20] sm:$0xff pattern:$0x73625140] }
 0x185   : > { %1597 = vst [vmem:[#allocation1 + $0x20] ss:$4 sm:$0xff] %v6904_v50  ;;  %v9722_v50 = vrot.slane %v7042_v33, 4 }
 0x186   : > { %1598 = vst [vmem:[#allocation1 + $0x21] ss:$4 sm:$0xff] %v6942_v7  ;;  %v5955_v7 = vld [vmem:[%s9582_s1 + $0x10] sm:$0xf] }
 0x187   : > { %1599 = vst [vmem:[#allocation1 + $0x22] ss:$4 sm:$0xff] %v9712_v56  ;;  %v5956_v39 = vor.u32 %v6248_v37, %v5955_v7  ;;  %v9726_v56 = vld [vmem:[#allocation16_spill] sm:$0xff] }
 0x188   : > { %1600 = vst [vmem:[#allocation1 + $0x23] ss:$4 sm:$0xff] %v9713_v32  ;;  %v1571_v29 = vld.sshfl [vmem:[#allocation1] sm:$0xff pattern:$0x73625140] }
 0x189   : > { %1573 = vst [vmem:[#allocation1] ss:$4 sm:$0xff] %v6796_v60 }
 0x18a   : > { %1574 = vst [vmem:[#allocation1 + $0x1] ss:$4 sm:$0xff] %v6824_v28 }
 0x18b   : > { %1575 = vst [vmem:[#allocation1 + $0x2] ss:$4 sm:$0xff] %v6808_v5  ;;  %v1677_v5 = vand.u32 %v5956_v39, %v6685_v14  ;;  %v9721_v14 = vld [vmem:[#allocation8_spill] sm:$0xff] }
 0x18c   : > { %1576 = vst [vmem:[#allocation1 + $0x3] ss:$4 sm:$0xff] %v6811_v41  ;;  %v1530_v41 = vshrl.u32 %v6945_v9, 16 }
 0x18d   : > { %1686 = vmatpush.bf16.msrb.mxu2 %v1677_v5 }
 0x18e   : > { %5940 = vmatmul.msk.bf16.gmra.mxu1 %vm1087_vm6, %v7140_v3  ;;  %v1532_v53 = vor.u32 %v1530_v41, %v9721_v14  ;;  %v2051_v14 = vlaneseq }
 0x18f   : > { %v7225_v35 = vld.sshfl [vmem:[#allocation1 + $0x20] sm:$0xff pattern:$0x73625140] }
 0x190   : > { %1607 = vst [vmem:[#allocation1 + $0x20] ss:$4 sm:$0xff] %v6958_v11  ;;  %1535 = vrot.lane.b32.xlu0 %v1532_v53, %s6401_s17  ;;  %s5858_s17 = sshll.u32 %s6382_s24, 3 }
 0x191   : > { %1608 = vst [vmem:[#allocation1 + $0x21] ss:$4 sm:$0xff] %v6968_v22  ;;  %v9725_v22 = vld [vmem:[#allocation15_spill] sm:$0xff]  ;;  %s5972_s18 = sadd.s32 4294967294, %s5858_s17 }
 0x192   : > { %1609 = vst [vmem:[#allocation1 + $0x22] ss:$4 sm:$0xff] %v9716_v4 }
 0x193   : > { %1610 = vst [vmem:[#allocation1 + $0x23] ss:$4 sm:$0xff] %v9717_v46  ;;  %v1581_v60 = vld.sshfl [vmem:[#allocation1] sm:$0xff pattern:$0x73625140]  ;;  %5948 = vmatmul.msk.bf16.gmra.mxu2 %vm1087_vm6, %v1297_v2  ;;  %v9727_v2 = vld [vmem:[#allocation13_spill] sm:$0xff] }
 0x194   : > { %1583 = vst [vmem:[#allocation1] ss:$4 sm:$0xff] %v6845_v45  ;;  %v1534_v45 = vpop.permute.xlu1 %1533 }
 0x195   : > { %1584 = vst [vmem:[#allocation1 + $0x1] ss:$4 sm:$0xff] %v6848_v0  ;;  %v1545_v0 = vsel %vm776_vm4, %v6939_v47, %v1534_v45 }
 0x196   : > { %1585 = vst [vmem:[#allocation1 + $0x2] ss:$4 sm:$0xff] %v6842_v43 }
 0x197   : > { %1586 = vst [vmem:[#allocation1 + $0x3] ss:$4 sm:$0xff] %v6895_v13  ;;  %v1549_v13 = vsel %vm825_vm5, %v1545_v0, %v1541_v62  ;;  %v7353_v0 = vstv %s5972_s18 }
 0x198   : > { %v1553_v47 = vrot.slane %v1549_v13, 2  ;;  %v1555_v11 = vrot.slane %v1549_v13, 6  ;;  %vm2055_vm7 = vcmp.ge.s32.totalorder %v7353_v0, 0  ;;  %vm2067_vm8 = vcmp.lt.s32.totalorder %v7353_v0, 16 }
 0x199   : > { %vm7366_vm10 = vmand %vm2055_vm7, %vm2067_vm8 }
 0x19a   : > { %v7244_v28 = vld.sshfl [vmem:[#allocation1 + $0x20] sm:$0xff pattern:$0x73625140] }
 0x19b   : > { %1617 = vst [vmem:[#allocation1 + $0x20] ss:$4 sm:$0xff] %v7035_v1 }
 0x19c   : > { %1618 = vst [vmem:[#allocation1 + $0x21] ss:$4 sm:$0xff] %v7010_v17  ;;  %v1543_v31 = vpop.permute.xlu1 %1542 }
 0x19d   : > { %1619 = vst [vmem:[#allocation1 + $0x22] ss:$4 sm:$0xff] %v7015_v44 }
 0x19e   : > { %1620 = vst [vmem:[#allocation1 + $0x23] ss:$4 sm:$0xff] %v7018_v10  ;;  %v1591_v43 = vld.sshfl [vmem:[#allocation1] sm:$0xff pattern:$0x73625140]  ;;  %5941 = vmatmul.msk.bf16.gmra.mxu1 %vm1087_vm6, %v7121_v24 }
 0x19f   : > { %1593 = vst [vmem:[#allocation1] ss:$4 sm:$0xff] %v6889_v15  ;;  %v9723_v15 = vrot.slane %v7042_v33, 6 }
 0x1a0   : > { %1594 = vst [vmem:[#allocation1 + $0x1] ss:$4 sm:$0xff] %v6878_v18 }
 0x1a1   : > { %1595 = vst [vmem:[#allocation1 + $0x2] ss:$4 sm:$0xff] %v6881_v34 }
 0x1a2   : > { %1596 = vst [vmem:[#allocation1 + $0x3] ss:$4 sm:$0xff] %v6901_v55 }
 0x1a3   : > { %5957 = vmatmul.msk.bf16.vlgmr.msrb.gmra.mxu2 %vm1087_vm6, %v1571_v29 }
 0x1a5   : > { %v7261_v23 = vld.sshfl [vmem:[#allocation1 + $0x20] sm:$0xff pattern:$0x73625140] }
 0x1a6   : > { %1627 = vst [vmem:[#allocation1 + $0x20] ss:$4 sm:$0xff] %v9722_v50 }
 0x1a7   : > { %1628 = vst [vmem:[#allocation1 + $0x21] ss:$4 sm:$0xff] %v9723_v15  ;;  %v7359_v15 = vshrl.u32 %v2051_v14, 7 }
 0x1a8   : > { %1629 = vst [vmem:[#allocation1 + $0x22] ss:$4 sm:$0xff] %v7061_v19 }
 0x1a9   : > { %1630 = vst [vmem:[#allocation1 + $0x23] ss:$4 sm:$0xff] %v1549_v13  ;;  %v1601_v18 = vld.sshfl [vmem:[#allocation1] sm:$0xff pattern:$0x73625140]  ;;  %vm2091_vm9 = vcmp.ge.s32.totalorder %v7359_v15, 2 }
 0x1aa   : > { %1603 = vst [vmem:[#allocation1] ss:$4 sm:$0xff] %v9714_v20  ;;  %vm2094_vm11 = vmand %vm7366_vm10, %vm2091_vm9 }
 0x1ab   : > { %1604 = vst [vmem:[#allocation1 + $0x1] ss:$4 sm:$0xff] %v9715_v6  ;;  %v1345_v17 = vpop.f32.mrf.mxu1 }
 0x1ac   : > { %1605 = vst [vmem:[#allocation1 + $0x2] ss:$4 sm:$0xff] %v6932_v27  ;;  %v9724_v27 = vrot.slane %v7042_v33, 2  ;;  %v1346_v32 = vadd.f32 %v1345_v17, %v9726_v56 }
 0x1ad   : > { %1606 = vst [vmem:[#allocation1 + $0x3] ss:$4 sm:$0xff] %v6955_v54  ;;  %v1554_v54 = vrot.slane %v1549_v13, 4 }
 0x1ae   : > { %5942 = vmatmul.msk.bf16.gmra.mxu1 %vm1087_vm6, %v7158_v25  ;;  %v7326_v25 = vpop.f32.mrf.mxu0  ;;  %v1450_v6 = vrot.slane %v1346_v32, 4  ;;  %9728 = vst [vmem:[#allocation4_spill] sm:$0xff] %v7359_v15 }
 0x1b3   : > { %5958 = vmatmul.msk.bf16.gmra.mxu2 %vm1087_vm6, %v7180_v57 }
 0x1b4   : > { %v1611_v34 = vld.sshfl [vmem:[#allocation1] sm:$0xff pattern:$0x73625140] }
 0x1b5   : > { %1613 = vst [vmem:[#allocation1] ss:$4 sm:$0xff] %v9718_v40 }
 0x1b6   : > { %1614 = vst [vmem:[#allocation1 + $0x1] ss:$4 sm:$0xff] %v9719_v51  ;;  %v7345_v7 = vpop.f32.mrf.mxu0 }
 0x1b7   : > { %1615 = vst [vmem:[#allocation1 + $0x2] ss:$4 sm:$0xff] %v6983_v30 }
 0x1b8   : > { %1616 = vst [vmem:[#allocation1 + $0x3] ss:$4 sm:$0xff] %v9710_v8 }
 0x1be   : > { %5943 = vmatmul.msk.bf16.gmra.mxu1 %vm1087_vm6, %v9725_v22 }
 0x1bf   : > { %v7283_v55 = vld.sshfl [vmem:[#allocation1] sm:$0xff pattern:$0x73625140] }
 0x1c0   : > { %1623 = vst [vmem:[#allocation1] ss:$4 sm:$0xff] %v9720_v61 }
 0x1c1   : > { %1624 = vst [vmem:[#allocation1 + $0x1] ss:$4 sm:$0xff] %v7026_v49 }
 0x1c2   : > { %1625 = vst [vmem:[#allocation1 + $0x2] ss:$4 sm:$0xff] %v7042_v33  ;;  %v1347_v33 = vpop.f32.mrf.mxu1 }
 0x1c3   : > { %5959 = vmatmul.msk.bf16.gmra.mxu2 %vm1087_vm6, %v1581_v60  ;;  %1626 = vst [vmem:[#allocation1 + $0x3] ss:$4 sm:$0xff] %v9724_v27 }
 0x1ca   : > { %v7293_v44 = vld.sshfl [vmem:[#allocation1] sm:$0xff pattern:$0x73625140]  ;;  %v1350_v36 = vpop.f32.mrf.mxu1 }
 0x1cb   : > { %1634 = vst [vmem:[#allocation1] ss:$4 sm:$0xff] %v1553_v47  ;;  %v1351_v62 = vadd.f32 %v1350_v36, %v7169_v38 }
 0x1cc   : > { %1636 = vst [vmem:[#allocation1 + $0x1] ss:$4 sm:$0xff] %v1554_v54 }
 0x1cd   : > { %1638 = vst [vmem:[#allocation1 + $0x2] ss:$4 sm:$0xff] %v1555_v11  ;;  %v1452_v47 = vrot.slane %v1351_v62, 4 }
 0x1ce   : > { %5944 = vmatmul.msk.bf16.gmra.mxu1 %vm1087_vm6, %v7172_v63 }
 0x1d2   : > { %v1352_v3 = vpop.f32.mrf.mxu1 }
 0x1d3   : > { %5960 = vmatmul.msk.bf16.gmra.mxu2 %vm1087_vm6, %v7195_v12 }
 0x1da   : > { %v7322_v8 = vpop.f32.mrf.mxu1 }
 0x1dc   : > { %v7300_v30 = vpop.f32.mrf.mxu2 }
 0x1e2   : > { %v7338_v57 = vpop.f32.mrf.mxu1 }
 0x1e3   : > { %5961 = vmatmul.msk.bf16.gmra.mxu2 %vm1087_vm6, %v1591_v43 }
 0x1e4   : > { %v7302_v10 = vpop.f32.mrf.mxu2 }
 0x1ea   : > { %v7351_v45 = vpop.f32.mrf.mxu1 }
 0x1f3   : > { %5962 = vmatmul.msk.bf16.gmra.mxu2 %vm1087_vm6, %v7208_v42  ;;  %v1348_v42 = vadd.f32 %v1347_v33, %v9727_v2  ;;  %v1353_v33 = vadd.f32 %v1352_v3, %v7184_v58 }
 0x1f5   : > { %v1451_v60 = vrot.slane %v1348_v42, 4 }
 0x1f6   : > { %v7306_v49 = vpop.f32.mrf.mxu2 }
 0x1fe   : > { %v7308_v1 = vpop.f32.mrf.mxu2 }
 0x202   : > { %v1536_v24 = vpop.permute.xlu0 %1535 }
 0x203   : > { %5963 = vmatmul.msk.bf16.gmra.mxu2 %vm1087_vm6, %v1601_v18  ;;  %v1547_v26 = vsel %vm776_vm4, %v6945_v9, %v1536_v24  ;;  %v7333_v9 = vld [vmem:[%s9583_s2] ss:$0 sm:$0xff]  ;;  %v7374_v24 = vadd.s32 16, %v7359_v15 }
 0x204   : > { %v1551_v46 = vsel %vm825_vm5, %v1547_v26, %v1543_v31  ;;  %v7336_v51 = vrot.slane %v7333_v9, 4  ;;  %v7380_v26 = vpop.f32.mrf.mxu1 }
 0x205   : > { %1639 = vst [vmem:[#allocation1 + $0x3] ss:$4 sm:$0xff] %v1551_v46  ;;  %v7382_v46 = vld.sshfl [vmem:[#allocation1 + $0x20] sm:$0xff pattern:$0x73625140]  ;;  %vm2132_vm13 = vcmp.lt.s32.totalorder %v7374_v24, 18 }
 0x206   : > { %v7311_v19 = vpop.f32.mrf.mxu2  ;;  %9731 = vst [vmem:[#allocation5_spill] sm:$0xff] %v7374_v24  ;;  %vm2135_vm14 = vmand %vm7366_vm10, %vm2132_vm13 }
 0x20c   : > { %v7341_v12 = vld.sshfl [vmem:[#allocation1] sm:$0xff pattern:$0x73625140] }
 0x20e   : > { %v7313_v48 = vpop.f32.mrf.mxu2 }
 0x213   : > { %5964 = vmatmul.msk.bf16.gmra.mxu2 %vm1087_vm6, %v7225_v35 }
 0x216   : > { %v7320_v4 = vpop.f32.mrf.mxu2 }
 0x21e   : > { %v7324_v63 = vpop.f32.mrf.mxu2 }
 0x223   : > { %5965 = vmatmul.msk.bf16.gmra.mxu2 %vm1087_vm6, %v1611_v34  ;;  %v7363_v34 = vpop.f32.mrf.mxu0 }
 0x226   : > { %v1688_v20 = vpop.f32.mrf.mxu2 }
 0x227   : > { %v1793_v21 = vrot.slane %v1688_v20, 4  ;;  %v1853_v40 = vadd.f32 %v1688_v20, %v1346_v32  ;;  %v1453_v20 = vrot.slane %v1353_v33, 4 }
 0x229   : > { %v1854_v59 = vadd.f32 %v1793_v21, %v1450_v6  ;;  %v1918_v61 = vadd.f32 %v7333_v9, %v1853_v40 }
 0x22b   : > { %v1919_v29 = vadd.f32 %v7336_v51, %v1854_v59  ;;  %v1978_v35 = vmax.f32 %v1918_v61, 0.0  ;;  %v7385_v40 = vpop.f32.mrf.mxu0  ;;  %v2040_v59 = vadd.s32 1, %v7353_v0 }
 0x22d   : > { %v1979_v37 = vmax.f32 %v1919_v29, 0.0  ;;  %2301 = vst [vmem:[#allocation1] ss:$2 sm:$0xff] %v1978_v35  ;;  %v1356_v29 = vadd.f32 %v7322_v8, %v7198_v16  ;;  %vm2056_vm15 = vcmp.ge.s32.totalorder %v2040_v59, 0  ;;  %vm2068_vm2 = vcmp.lt.s32.totalorder %v2040_v59, 16 }
 0x22e   : > { %v1690_v39 = vpop.f32.mrf.mxu2  ;;  %vm7404_vm4 = vmand %vm2056_vm15, %vm2068_vm2 }
 0x22f   : > { %v1794_v5 = vrot.slane %v1690_v39, 4  ;;  %v1855_v41 = vadd.f32 %v1690_v39, %v1348_v42  ;;  %2303 = vst [vmem:[#allocation1 + $0x1] ss:$2 sm:$0xff] %v1979_v37  ;;  %vm2097_vm5 = vmand %vm7404_vm4, %vm2091_vm9 }
 0x230   : > { %vm2138_vm7 = vmand %vm7404_vm4, %vm2132_vm13 }
 0x231   : > { %v1856_v53 = vadd.f32 %v1794_v5, %v1451_v60  ;;  %v1920_v43 = vadd.f32 %v7333_v9, %v1855_v41 }
 0x233   : > { %v1921_v13 = vadd.f32 %v7336_v51, %v1856_v53  ;;  %v1980_v50 = vmax.f32 %v1920_v43, 0.0  ;;  %5966 = vmatmul.msk.bf16.gmra.mxu2 %vm1087_vm6, %v7244_v28  ;;  %v7401_v53 = vpop.f32.mrf.mxu1  ;;  %v1454_v43 = vrot.slane %v1356_v29, 4 }
 0x235   : > { %v1981_v18 = vmax.f32 %v1921_v13, 0.0  ;;  %2305 = vst [vmem:[#allocation1 + $0x10] ss:$2 sm:$0xff] %v1980_v50 }
 0x236   : > { %v1693_v27 = vpop.f32.mrf.mxu2  ;;  %v2310_v28 = vld.sshfl [vmem:[#allocation1] sm:$0xff pattern:$0x75316420] }
 0x237   : > { %2307 = vst [vmem:[#allocation1 + $0x11] ss:$2 sm:$0xff] %v1981_v18  ;;  %v1795_v38 = vrot.slane %v1693_v27, 4  ;;  %v1857_v54 = vadd.f32 %v1693_v27, %v1351_v62  ;;  %v2440_v56 = vsel %vm2094_vm11, %v2310_v28, 0.0  ;;  %v7411_v27 = vpop.f32.mrf.mxu0 }
 0x238   : > { %v2476_v58 = vpack.c.bf16 %v2440_v56, %v2440_v56 }
 0x239   : > { %v1858_v22 = vadd.f32 %v1795_v38, %v1452_v47  ;;  %v1922_v17 = vadd.f32 %v7333_v9, %v1857_v54  ;;  %v1358_v47 = vadd.f32 %v7338_v57, %v7210_v52  ;;  %v2041_v57 = vadd.s32 2, %v7353_v0 }
 0x23a   : > { %2513 = vst.msk [vmem:[#allocation2] sm:$0xf] %vm2512_vm12, %v2476_v58 }
 0x23b   : > { %v1923_v36 = vadd.f32 %v7333_v9, %v1858_v22  ;;  %v1982_v31 = vmax.f32 %v1922_v17, 0.0  ;;  %vm2057_vm8 = vcmp.ge.s32.totalorder %v2041_v57, 0 }
 0x23d   : > { %v1983_v32 = vmax.f32 %v1923_v36, 0.0  ;;  %2309 = vst [vmem:[#allocation1 + $0x20] ss:$2 sm:$0xff] %v1982_v31  ;;  %v1455_v36 = vrot.slane %v1358_v47, 4 }
 0x23e   : > { %v1695_v3 = vpop.f32.mrf.mxu2  ;;  %v2311_v61 = vld.sshfl [vmem:[#allocation1 + $0x10] sm:$0xff pattern:$0x75316420] }
 0x23f   : > { %2314 = vst [vmem:[#allocation1 + $0x30] ss:$2 sm:$0xff] %v1983_v32  ;;  %v1796_v6 = vrot.slane %v1695_v3, 4  ;;  %v1859_v21 = vadd.f32 %v1695_v3, %v1353_v33  ;;  %v2441_v60 = vsel %vm7366_vm10, %v2311_v61, 0.0  ;;  %v7420_v32 = vpop.f32.mrf.mxu1  ;;  %v1361_v3 = vadd.f32 %v7351_v45, %v7326_v25 }
 0x240   : > { %v2477_v14 = vpack.c.bf16 %v2441_v60, %v2441_v60  ;;  %vm2069_vm10 = vcmp.lt.s32.totalorder %v2041_v57, 16 }
 0x241   : > { %v1860_v2 = vadd.f32 %v1796_v6, %v1453_v20  ;;  %v1924_v42 = vadd.f32 %v7336_v51, %v1859_v21  ;;  %v7430_v21 = vpop.f32.mrf.mxu0  ;;  %vm7440_vm11 = vmand %vm2057_vm8, %vm2069_vm10 }
 0x242   : > { %2514 = vst.msk [vmem:[#allocation2 + $0x4] sm:$0xf] %vm2512_vm12, %v2477_v14  ;;  %vm2141_vm15 = vmand %vm7440_vm11, %vm2132_vm13 }
 0x243   : > { %v1925_v35 = vadd.f32 %v7333_v9, %v1860_v2  ;;  %v1984_v37 = vmax.f32 %v1924_v42, 0.0  ;;  %5967 = vmatmul.msk.bf16.gmra.mxu2 %vm1087_vm6, %v7283_v55 }
 0x244   : > { %v2312_v39 = vld.sshfl [vmem:[#allocation1 + $0x20] sm:$0xff pattern:$0x75316420] }
 0x245   : > { %v1985_v5 = vmax.f32 %v1925_v35, 0.0  ;;  %2316 = vst [vmem:[#allocation1 + $0x31] ss:$2 sm:$0xff] %v1984_v37  ;;  %v2442_v41 = vsel %vm2135_vm14, %v2312_v39, 0.0  ;;  %vm2100_vm14 = vmand %vm7440_vm11, %vm2091_vm9 }
 0x246   : > { %v1698_v16 = vpop.f32.mrf.mxu2  ;;  %v2478_v8 = vpack.c.bf16 %v2442_v41, %v2442_v41 }
 0x247   : > { %2318 = vst [vmem:[#allocation1] ss:$2 sm:$0xff] %v1985_v5  ;;  %v1797_v62 = vrot.slane %v1698_v16, 4  ;;  %v1861_v13 = vadd.f32 %v1698_v16, %v1356_v29  ;;  %v1456_v29 = vrot.slane %v1361_v3, 4  ;;  %v7444_v14 = vpop.f32.mrf.mxu1  ;;  %v1363_v16 = vadd.f32 %v7380_v26, %v7345_v7 }
 0x248   : > { %2516 = vst.msk [vmem:[#allocation2 + $0x8] sm:$0x3] %vm2515_vm3, %v2478_v8 }
 0x249   : > { %v1862_v50 = vadd.f32 %v1797_v62, %v1454_v43  ;;  %v1926_v18 = vadd.f32 %v7336_v51, %v1861_v13  ;;  %v7454_v13 = vpop.f32.mrf.mxu0 }
 0x24b   : > { %v1927_v38 = vadd.f32 %v7333_v9, %v1862_v50  ;;  %v1986_v54 = vmax.f32 %v1926_v18, 0.0  ;;  %v1457_v18 = vrot.slane %v1363_v16, 4 }
 0x24c   : > { %v2317_v11 = vld.sshfl [vmem:[#allocation1 + $0x30] sm:$0xff pattern:$0x75316420] }
 0x24d   : > { %v1987_v28 = vmax.f32 %v1927_v38, 0.0  ;;  %2319 = vst [vmem:[#allocation1 + $0x1] ss:$2 sm:$0xff] %v1986_v54  ;;  %v2443_v22 = vsel %vm2097_vm5, %v2317_v11, 0.0  ;;  %v1366_v11 = vadd.f32 %v7401_v53, %v7363_v34 }
 0x24e   : > { %v1700_v17 = vpop.f32.mrf.mxu2  ;;  %v2479_v33 = vpack.c.bf16 %v2443_v22, %v2443_v22 }
 0x24f   : > { %2320 = vst [vmem:[#allocation1 + $0x10] ss:$2 sm:$0xff] %v1987_v28  ;;  %v1798_v31 = vrot.slane %v1700_v17, 4  ;;  %v1863_v56 = vadd.f32 %v1700_v17, %v1358_v47  ;;  %v1458_v34 = vrot.slane %v1366_v11, 4 }
 0x250   : > { %2517 = vst.msk [vmem:[#allocation2 + $0xc] sm:$0xf] %vm2512_vm12, %v2479_v33 }
 0x251   : > { %v1864_v58 = vadd.f32 %v1798_v31, %v1455_v36  ;;  %v1928_v52 = vadd.f32 %v7333_v9, %v1863_v56 }
 0x253   : > { %v1929_v20 = vadd.f32 %v7336_v51, %v1864_v58  ;;  %v1988_v6 = vmax.f32 %v1928_v52, 0.0  ;;  %5968 = vmatmul.msk.bf16.gmra.mxu2 %vm1087_vm6, %v7261_v23  ;;  %v7463_v58 = vpop.f32.mrf.mxu1 }
 0x254   : > { %v2321_v59 = vld.sshfl [vmem:[#allocation1] sm:$0xff pattern:$0x75316420] }
 0x255   : > { %v1989_v61 = vmax.f32 %v1929_v20, 0.0  ;;  %2323 = vst [vmem:[#allocation1 + $0x20] ss:$2 sm:$0xff] %v1988_v6  ;;  %v2444_v2 = vsel %vm7404_vm4, %v2321_v59, 0.0 }
 0x256   : > { %v2322_v25 = vld.sshfl [vmem:[#allocation1 + $0x10] sm:$0xff pattern:$0x75316420]  ;;  %v1703_v45 = vpop.f32.mrf.mxu2  ;;  %v2480_v42 = vpack.c.bf16 %v2444_v2, %v2444_v2 }
 0x257   : > { %2325 = vst [vmem:[#allocation1 + $0x21] ss:$2 sm:$0xff] %v1989_v61  ;;  %v1799_v23 = vrot.slane %v1703_v45, 4  ;;  %v1865_v35 = vadd.f32 %v1703_v45, %v1361_v3  ;;  %v2445_v37 = vsel %vm2138_vm7, %v2322_v25, 0.0 }
 0x258   : > { %v2481_v39 = vpack.c.bf16 %v2445_v37, %v2445_v37  ;;  %2518 = vst.msk [vmem:[#allocation2 + $0x10] sm:$0xf] %vm2512_vm12, %v2480_v42 }
 0x259   : > { %v1866_v60 = vadd.f32 %v1799_v23, %v1456_v29  ;;  %v1930_v5 = vadd.f32 %v7333_v9, %v1865_v35  ;;  %v7471_v29 = vpop.f32.mrf.mxu0 }
 0x25a   : > { %2519 = vst.msk [vmem:[#allocation2 + $0x14] sm:$0x3] %vm2515_vm3, %v2481_v39  ;;  %v2042_v39 = vadd.s32 3, %v7353_v0 }
 0x25b   : > { %v1931_v8 = vadd.f32 %v7336_v51, %v1866_v60  ;;  %v1990_v43 = vmax.f32 %v1930_v5, 0.0 }
 0x25c   : > { %vm2058_vm2 = vcmp.ge.s32.totalorder %v2042_v39, 0  ;;  %vm2070_vm4 = vcmp.lt.s32.totalorder %v2042_v39, 16 }
 0x25d   : > { %v1991_v62 = vmax.f32 %v1931_v8, 0.0  ;;  %2326 = vst [vmem:[#allocation1 + $0x30] ss:$2 sm:$0xff] %v1990_v43  ;;  %v1368_v8 = vadd.f32 %v7420_v32, %v7385_v40  ;;  %vm7491_vm5 = vmand %vm2058_vm2, %vm2070_vm4 }
 0x25e   : > { %v2328_v55 = vld.sshfl [vmem:[#allocation1 + $0x20] sm:$0xff pattern:$0x75316420]  ;;  %v1705_v50 = vpop.f32.mrf.mxu2  ;;  %vm2103_vm7 = vmand %vm7491_vm5, %vm2091_vm9 }
 0x25f   : > { %2327 = vst [vmem:[#allocation1 + $0x31] ss:$2 sm:$0xff] %v1991_v62  ;;  %v1800_v47 = vrot.slane %v1705_v50, 4  ;;  %v1867_v38 = vadd.f32 %v1705_v50, %v1363_v16  ;;  %v6250_v54 = vld [vmem:[#allocation2 + $0xc] sm:$0xff]  ;;  %v2446_v7 = vsel %vm2100_vm14, %v2328_v55, 0.0  ;;  %vm7531_vm8 = vmand %vm7491_vm5, %vm2132_vm13 }
 0x260   : > { %v2482_v26 = vpack.c.bf16 %v2446_v7, %v2446_v7  ;;  %v2721_v36 = vshll.u32 %v6250_v54, 16  ;;  %v2719_v3 = vshrl.u32 %v6250_v54, 16  ;;  %v2896_v61 = vrot.slane %v6250_v54, 1 }
 0x261   : > { %v1868_v28 = vadd.f32 %v1800_v47, %v1457_v18  ;;  %v1932_v22 = vadd.f32 %v7333_v9, %v1867_v38  ;;  %v2555_v17 = vld [vmem:[#allocation2 + $0x14] sm:$0x3]  ;;  %v7489_v47 = vpop.f32.mrf.mxu1  ;;  %v1459_v7 = vrot.slane %v1368_v8, 4 }
 0x262   : > { %v2658_v33 = vunpack.c.l.b16 %v2555_v17  ;;  %2520 = vst.msk [vmem:[#allocation2 + $0x18] sm:$0xf] %vm2512_vm12, %v2482_v26  ;;  %v2723_v57 = vrot.slane %v2721_v36, 1  ;;  %v1371_v36 = vadd.f32 %v7444_v14, %v7411_v27 }
 0x263   : > { %v1933_v31 = vadd.f32 %v7333_v9, %v1868_v28  ;;  %v1992_v56 = vmax.f32 %v1932_v22, 0.0  ;;  %5969 = vmatmul.msk.bf16.gmra.mxu2 %vm1087_vm6, %v7293_v44 }
 0x264   : > { %v7465_v52 = vpack.c.b16 %v2658_v33, %v2658_v33  ;;  %v2724_v44 = vor.u32 %v2723_v57, %v2719_v3  ;;  %v7500_v33 = vpop.f32.mrf.mxu0 }
 0x265   : > { %v1993_v53 = vmax.f32 %v1933_v31, 0.0  ;;  %2330 = vst [vmem:[#allocation1] ss:$2 sm:$0xff] %v1992_v56 }
 0x266   : > { %v2329_v20 = vld.sshfl [vmem:[#allocation1 + $0x30] sm:$0xff pattern:$0x75316420]  ;;  %v1708_v6 = vpop.f32.mrf.mxu2  ;;  %v2897_v59 = vrot.slane %v7465_v52, 1  ;;  %v2726_v2 = vshll.u32 %v7465_v52, 16  ;;  %v2730_v18 = vshrl.u32 %v7465_v52, 16 }
 0x267   : > { %2332 = vst [vmem:[#allocation1 + $0x10] ss:$2 sm:$0xff] %v1993_v53  ;;  %v1801_v25 = vrot.slane %v1708_v6, 4  ;;  %v1869_v45 = vadd.f32 %v1708_v6, %v1366_v11  ;;  %v2447_v42 = vsel %vm7440_vm11, %v2329_v20, 0.0 }
 0x268   : > { %2929 = vrot.lane.b32.xlu1 %v2897_v59, %s6403_s19  ;;  %v2898_v23 = vsel %vm691_vm0, %v2896_v61, %v2897_v59  ;;  %v2728_v35 = vrot.slane %v2726_v2, 1  ;;  %v2483_v37 = vpack.c.bf16 %v2447_v42, %v2447_v42  ;;  %v1460_v59 = vrot.slane %v1371_v36, 4 }
 0x269   : > { %v1870_v60 = vadd.f32 %v1801_v25, %v1458_v34  ;;  %v1934_v5 = vadd.f32 %v7336_v51, %v1869_v45  ;;  %2927 = vrot.lane.b32.xlu0 %v2898_v23, %s6403_s19  ;;  %v7512_v27 = vpop.f32.mrf.mxu1  ;;  %v2043_v23 = vadd.s32 4, %v7353_v0 }
 0x26a   : > { %v2729_v16 = vsel %vm462_vm1, %v2724_v44, %v2728_v35  ;;  %2521 = vst.msk [vmem:[#allocation2 + $0x1c] sm:$0xf] %vm2512_vm12, %v2483_v37  ;;  %v2732_v26 = vor.u32 %v2730_v18, %v2728_v35  ;;  %v1373_v35 = vadd.f32 %v7463_v58, %v7430_v21 }
 0x26b   : > { %v1935_v43 = vadd.f32 %v7333_v9, %v1870_v60  ;;  %v1994_v62 = vmax.f32 %v1934_v5, 0.0  ;;  %2857 = vrot.lane.b32.xlu2 %v2729_v16, %s6404_s20  ;;  %vm2059_vm10 = vcmp.ge.s32.totalorder %v2043_v23, 0  ;;  %vm2071_vm11 = vcmp.lt.s32.totalorder %v2043_v23, 16 }
 0x26c   : > { %v2331_v55 = vld.sshfl [vmem:[#allocation1] sm:$0xff pattern:$0x75316420]  ;;  %v7523_v5 = vpop.f32.mrf.mxu0  ;;  %vm7544_vm14 = vmand %vm2059_vm10, %vm2071_vm11 }
 0x26d   : > { %v1995_v50 = vmax.f32 %v1935_v43, 0.0  ;;  %2333 = vst [vmem:[#allocation1 + $0x11] ss:$2 sm:$0xff] %v1994_v62  ;;  %v2448_v41 = vsel %vm2141_vm15, %v2331_v55, 0.0  ;;  %vm2106_vm15 = vmand %vm7544_vm14, %vm2091_vm9 }
 0x26e   : > { %v1710_v38 = vpop.f32.mrf.mxu2  ;;  %v2484_v54 = vpack.c.bf16 %v2448_v41, %v2448_v41 }
 0x26f   : > { %2334 = vst [vmem:[#allocation1 + $0x20] ss:$2 sm:$0xff] %v1995_v50  ;;  %v1802_v40 = vrot.slane %v1710_v38, 4  ;;  %v1871_v32 = vadd.f32 %v1710_v38, %v1368_v8 }
 0x270   : > { %2522 = vst.msk [vmem:[#allocation2 + $0x20] sm:$0x3] %vm2515_vm3, %v2484_v54  ;;  %v1461_v54 = vrot.slane %v1373_v35, 4 }
 0x271   : > { %v1872_v28 = vadd.f32 %v1802_v40, %v1459_v7  ;;  %v1936_v22 = vadd.f32 %v7336_v51, %v1871_v32  ;;  %2859 = vrot.lane.b32.xlu0 %v2732_v26, %s6404_s20  ;;  %v7498_v17 = vld [vmem:[#allocation2 + $0x18] sm:$0xff] }
 0x272   : > { %v2736_v53 = vshll.u32 %v7498_v17, 16  ;;  %v2734_v60 = vshrl.u32 %v7498_v17, 16 }
 0x273   : > { %v1937_v31 = vadd.f32 %v7333_v9, %v1872_v28  ;;  %v1996_v56 = vmax.f32 %v1936_v22, 0.0  ;;  %5970 = vmatmul.msk.bf16.gmra.mxu2 %vm1087_vm6, %v7382_v46 }
 0x274   : > { %v2337_v57 = vld.sshfl [vmem:[#allocation1 + $0x10] sm:$0xff pattern:$0x75316420]  ;;  %v2738_v44 = vrot.slane %v2736_v53, 1  ;;  %v2899_v53 = vrot.slane %v7498_v17, 1 }
 0x275   : > { %v1997_v34 = vmax.f32 %v1937_v31, 0.0  ;;  %2335 = vst [vmem:[#allocation1 + $0x21] ss:$2 sm:$0xff] %v1996_v56  ;;  %v2449_v3 = vsel %vm2103_vm7, %v2337_v57, 0.0  ;;  %v1376_v31 = vadd.f32 %v7489_v47, %v7454_v13  ;;  %v1380_v56 = vpop.f32.mrf.mxu1 }
 0x276   : > { %v1713_v20 = vpop.f32.mrf.mxu2  ;;  %v2485_v6 = vpack.c.bf16 %v2449_v3, %v2449_v3  ;;  %v2739_v58 = vor.u32 %v2738_v44, %v2734_v60 }
 0x277   : > { %2336 = vst [vmem:[#allocation1 + $0x30] ss:$2 sm:$0xff] %v1997_v34  ;;  %v1803_v61 = vrot.slane %v1713_v20, 4  ;;  %v1873_v2 = vadd.f32 %v1713_v20, %v1371_v36  ;;  %v2558_v25 = vld [vmem:[#allocation2 + $0x20] sm:$0x3]  ;;  %v7561_v20 = vpop.f32.mrf.mxu0 }
 0x278   : > { %v2661_v14 = vunpack.c.l.b16 %v2558_v25  ;;  %2523 = vst.msk [vmem:[#allocation2 + $0x24] sm:$0xf] %vm2512_vm12, %v2485_v6  ;;  %v1462_v6 = vrot.slane %v1376_v31, 4 }
 0x279   : > { %v1874_v45 = vadd.f32 %v1803_v61, %v1460_v59  ;;  %v1938_v46 = vadd.f32 %v7333_v9, %v1873_v2 }
 0x27a   : > { %v7516_v42 = vpack.c.b16 %v2661_v14, %v2661_v14 }
 0x27b   : > { %v1939_v37 = vadd.f32 %v7336_v51, %v1874_v45  ;;  %v1998_v39 = vmax.f32 %v1938_v46, 0.0 }
 0x27c   : > { %v2338_v16 = vld.sshfl [vmem:[#allocation1 + $0x20] sm:$0xff pattern:$0x75316420]  ;;  %v2900_v8 = vrot.slane %v7516_v42, 1  ;;  %v2741_v43 = vshll.u32 %v7516_v42, 16  ;;  %v2745_v47 = vshrl.u32 %v7516_v42, 16 }
 0x27d   : > { %v1999_v21 = vmax.f32 %v1939_v37, 0.0  ;;  %2340 = vst [vmem:[#allocation1] ss:$2 sm:$0xff] %v1998_v39  ;;  %v2450_v55 = vsel %vm7491_vm5, %v2338_v16, 0.0  ;;  %v1378_v39 = vadd.f32 %v7512_v27, %v7471_v29 }
 0x27e   : > { %v2339_v50 = vld.sshfl [vmem:[#allocation1 + $0x30] sm:$0xff pattern:$0x75316420]  ;;  %v1715_v18 = vpop.f32.mrf.mxu2  ;;  %2933 = vrot.lane.b32.xlu2 %v2900_v8, %s6403_s19  ;;  %v2743_v41 = vrot.slane %v2741_v43, 1  ;;  %v2486_v38 = vpack.c.bf16 %v2450_v55, %v2450_v55  ;;  %v2901_v13 = vsel %vm691_vm0, %v2899_v53, %v2900_v8  ;;  %v1382_v8 = vpop.f32.mrf.mxu1 }
 0x27f   : > { %2341 = vst [vmem:[#allocation1 + $0x1] ss:$2 sm:$0xff] %v1999_v21  ;;  %v1804_v7 = vrot.slane %v1715_v18, 4  ;;  %v1875_v40 = vadd.f32 %v1715_v18, %v1373_v35  ;;  %v2451_v32 = vsel %vm7531_vm8, %v2339_v50, 0.0 }
 0x280   : > { %v2744_v26 = vsel %vm462_vm1, %v2739_v58, %v2743_v41  ;;  %v2487_v28 = vpack.c.bf16 %v2451_v32, %v2451_v32  ;;  %2524 = vst.msk [vmem:[#allocation2 + $0x28] sm:$0xf] %vm2512_vm12, %v2486_v38  ;;  %v2747_v2 = vor.u32 %v2745_v47, %v2743_v41  ;;  %v1463_v38 = vrot.slane %v1378_v39, 4 }
 0x281   : > { %v1876_v11 = vadd.f32 %v1804_v7, %v1461_v54  ;;  %v1940_v22 = vadd.f32 %v7333_v9, %v1875_v40  ;;  %2861 = vrot.lane.b32.xlu1 %v2744_v26, %s6404_s20  ;;  %v7576_v7 = vpop.f32.mrf.mxu0 }
 0x282   : > { %2525 = vst.msk [vmem:[#allocation2 + $0x2c] sm:$0x3] %vm2515_vm3, %v2487_v28  ;;  %v2044_v28 = vadd.s32 5, %v7353_v0 }
 0x283   : > { %v1941_v57 = vadd.f32 %v7336_v51, %v1876_v11  ;;  %v2000_v34 = vmax.f32 %v1940_v22, 0.0  ;;  %5971 = vmatmul.msk.bf16.gmra.mxu2 %vm1087_vm6, %v7341_v12  ;;  %vm2147_vm6 = vmand %vm7544_vm14, %vm2132_vm13 }
 0x284   : > { %vm2060_vm2 = vcmp.ge.s32.totalorder %v2044_v28, 0  ;;  %vm2072_vm4 = vcmp.lt.s32.totalorder %v2044_v28, 16 }
 0x285   : > { %v2001_v3 = vmax.f32 %v1941_v57, 0.0  ;;  %2342 = vst [vmem:[#allocation1 + $0x10] ss:$2 sm:$0xff] %v2000_v34  ;;  %vm7593_vm5 = vmand %vm2060_vm2, %vm2072_vm4 }
 0x286   : > { %v2345_v59 = vld.sshfl [vmem:[#allocation1] sm:$0xff pattern:$0x75316420]  ;;  %v1718_v61 = vpop.f32.mrf.mxu2  ;;  %2931 = vrot.lane.b32.xlu2 %v2901_v13, %s6403_s19  ;;  %vm2109_vm7 = vmand %vm7593_vm5, %vm2091_vm9 }
 0x287   : > { %2343 = vst [vmem:[#allocation1 + $0x11] ss:$2 sm:$0xff] %v2001_v3  ;;  %v1805_v12 = vrot.slane %v1718_v61, 4  ;;  %v1877_v17 = vadd.f32 %v1718_v61, %v1376_v31  ;;  %v6252_v25 = vld [vmem:[#allocation2 + $0x24] sm:$0xff]  ;;  %v2452_v14 = vsel %vm2106_vm15, %v2345_v59, 0.0  ;;  %v1381_v31 = vadd.f32 %v1380_v56, %v7500_v33  ;;  %vm7628_vm8 = vmand %vm7593_vm5, %vm2132_vm13 }
 0x288   : > { %v2488_v45 = vpack.c.bf16 %v2452_v14, %v2452_v14  ;;  %v2751_v35 = vshll.u32 %v6252_v25, 16  ;;  %v2749_v18 = vshrl.u32 %v6252_v25, 16  ;;  %v2902_v33 = vrot.slane %v6252_v25, 1 }
 0x289   : > { %v1878_v46 = vadd.f32 %v1805_v12, %v1462_v6  ;;  %v1942_v44 = vadd.f32 %v7333_v9, %v1877_v17  ;;  %2863 = vrot.lane.b32.xlu1 %v2747_v2, %s6404_s20  ;;  %v2561_v23 = vld [vmem:[#allocation2 + $0x2c] sm:$0x3]  ;;  %v1464_v47 = vrot.slane %v1381_v31, 4  ;;  %v1385_v6 = vpop.f32.mrf.mxu1 }
 0x28a   : > { %v2664_v37 = vunpack.c.l.b16 %v2561_v23  ;;  %2526 = vst.msk [vmem:[#allocation2 + $0x30] sm:$0xf] %vm2512_vm12, %v2488_v45  ;;  %v2753_v62 = vrot.slane %v2751_v35, 1  ;;  %v7602_v23 = vpop.f32.mrf.mxu0  ;;  %v1383_v35 = vadd.f32 %v1382_v8, %v7523_v5 }
 0x28b   : > { %v1943_v60 = vadd.f32 %v7333_v9, %v1878_v46  ;;  %v2002_v16 = vmax.f32 %v1942_v44, 0.0 }
 0x28c   : > { %v7570_v43 = vpack.c.b16 %v2664_v37, %v2664_v37  ;;  %v2754_v40 = vor.u32 %v2753_v62, %v2749_v18 }
 0x28d   : > { %v2003_v21 = vmax.f32 %v1943_v60, 0.0  ;;  %2344 = vst [vmem:[#allocation1 + $0x20] ss:$2 sm:$0xff] %v2002_v16 }
 0x28e   : > { %v2346_v58 = vld.sshfl [vmem:[#allocation1 + $0x10] sm:$0xff pattern:$0x75316420]  ;;  %v1720_v55 = vpop.f32.mrf.mxu2  ;;  %v2903_v50 = vrot.slane %v7570_v43, 1  ;;  %v2756_v41 = vshll.u32 %v7570_v43, 16  ;;  %v2760_v2 = vshrl.u32 %v7570_v43, 16 }
 0x28f   : > { %2348 = vst [vmem:[#allocation1 + $0x30] ss:$2 sm:$0xff] %v2003_v21  ;;  %v1806_v54 = vrot.slane %v1720_v55, 4  ;;  %v1879_v29 = vadd.f32 %v1720_v55, %v1378_v39  ;;  %v2453_v27 = vsel %vm7544_vm14, %v2346_v58, 0.0 }
 0x290   : > { %2937 = vrot.lane.b32.xlu0 %v2903_v50, %s6403_s19  ;;  %v2758_v32 = vrot.slane %v2756_v41, 1  ;;  %v2489_v26 = vpack.c.bf16 %v2453_v27, %v2453_v27  ;;  %v2904_v17 = vsel %vm691_vm0, %v2902_v33, %v2903_v50  ;;  %v1465_v50 = vrot.slane %v1383_v35, 4 }
 0x291   : > { %v1880_v11 = vadd.f32 %v1806_v54, %v1463_v38  ;;  %v1944_v22 = vadd.f32 %v7336_v51, %v1879_v29  ;;  %v1387_v54 = vpop.f32.mrf.mxu1 }
 0x292   : > { %v2759_v57 = vsel %vm462_vm1, %v2754_v40, %v2758_v32  ;;  %2527 = vst.msk [vmem:[#allocation2 + $0x34] sm:$0xf] %vm2512_vm12, %v2489_v26  ;;  %v2762_v46 = vor.u32 %v2760_v2, %v2758_v32  ;;  %v2045_v32 = vadd.s32 6, %v7353_v0  ;;  %v1386_v26 = vadd.f32 %v1385_v6, %v7561_v20 }
 0x293   : > { %v1945_v34 = vadd.f32 %v7333_v9, %v1880_v11  ;;  %v2004_v53 = vmax.f32 %v1944_v22, 0.0  ;;  %2865 = vrot.lane.b32.xlu2 %v2759_v57, %s6404_s20 }
 0x294   : > { %v2347_v3 = vld.sshfl [vmem:[#allocation1 + $0x20] sm:$0xff pattern:$0x75316420]  ;;  %vm2061_vm10 = vcmp.ge.s32.totalorder %v2045_v32, 0  ;;  %vm2073_vm11 = vcmp.lt.s32.totalorder %v2045_v32, 16 }
 0x295   : > { %v2005_v13 = vmax.f32 %v1945_v34, 0.0  ;;  %2349 = vst [vmem:[#allocation1 + $0x31] ss:$2 sm:$0xff] %v2004_v53  ;;  %v2454_v56 = vsel %vm2147_vm6, %v2347_v3, 0.0  ;;  %vm7641_vm14 = vmand %vm2061_vm10, %vm2073_vm11 }
 0x296   : > { %v1723_v59 = vpop.f32.mrf.mxu2  ;;  %v2490_v61 = vpack.c.bf16 %v2454_v56, %v2454_v56  ;;  %vm2112_vm15 = vmand %vm7641_vm14, %vm2091_vm9 }
 0x297   : > { %2351 = vst [vmem:[#allocation1] ss:$2 sm:$0xff] %v2005_v13  ;;  %v1807_v36 = vrot.slane %v1723_v59, 4  ;;  %v1881_v12 = vadd.f32 %v1723_v59, %v1381_v31  ;;  %v7620_v31 = vpop.f32.mrf.mxu0  ;;  %vm2153_vm6 = vmand %vm7641_vm14, %vm2132_vm13 }
 0x298   : > { %2935 = vrot.lane.b32.xlu0 %v2904_v17, %s6403_s19  ;;  %2528 = vst.msk [vmem:[#allocation2 + $0x38] sm:$0x3] %vm2515_vm3, %v2490_v61  ;;  %v1466_v61 = vrot.slane %v1386_v26, 4 }
 0x299   : > { %v1882_v25 = vadd.f32 %v1807_v36, %v1464_v47  ;;  %v1946_v45 = vadd.f32 %v7336_v51, %v1881_v12  ;;  %v7600_v44 = vld [vmem:[#allocation2 + $0x30] sm:$0xff] }
 0x29a   : > { %v2766_v62 = vshll.u32 %v7600_v44, 16  ;;  %v2764_v22 = vshrl.u32 %v7600_v44, 16 }
 0x29b   : > { %v1947_v37 = vadd.f32 %v7333_v9, %v1882_v25  ;;  %v2006_v39 = vmax.f32 %v1946_v45, 0.0  ;;  %2867 = vrot.lane.b32.xlu2 %v2762_v46, %s6404_s20 }
 0x29c   : > { %v2350_v60 = vld.sshfl [vmem:[#allocation1 + $0x30] sm:$0xff pattern:$0x75316420]  ;;  %v2768_v27 = vrot.slane %v2766_v62, 1 }
 0x29d   : > { %v2007_v16 = vmax.f32 %v1947_v37, 0.0  ;;  %2352 = vst [vmem:[#allocation1 + $0x1] ss:$2 sm:$0xff] %v2006_v39  ;;  %v2455_v21 = vsel %vm2109_vm7, %v2350_v60, 0.0  ;;  %v1390_v37 = vpop.f32.mrf.mxu1 }
 0x29e   : > { %v1725_v58 = vpop.f32.mrf.mxu2  ;;  %v2491_v55 = vpack.c.bf16 %v2455_v21, %v2455_v21  ;;  %v2769_v13 = vor.u32 %v2768_v27, %v2764_v22 }
 0x29f   : > { %2353 = vst [vmem:[#allocation1 + $0x10] ss:$2 sm:$0xff] %v2007_v16  ;;  %v1808_v18 = vrot.slane %v1725_v58, 4  ;;  %v1883_v41 = vadd.f32 %v1725_v58, %v1383_v35  ;;  %v2564_v38 = vld [vmem:[#allocation2 + $0x38] sm:$0x3]  ;;  %v1388_v35 = vadd.f32 %v1387_v54, %v7576_v7  ;;  %v2905_v16 = vrot.slane %v7600_v44, 1  ;;  %v7655_v7 = vpop.f32.mrf.mxu0 }
 0x2a0   : > { %v2667_v5 = vunpack.c.l.b16 %v2564_v38  ;;  %2529 = vst.msk [vmem:[#allocation2 + $0x3c] sm:$0xf] %vm2512_vm12, %v2491_v55 }
 0x2a1   : > { %v1884_v8 = vadd.f32 %v1808_v18, %v1465_v50  ;;  %v1948_v29 = vadd.f32 %v7333_v9, %v1883_v41  ;;  %v1467_v55 = vrot.slane %v1388_v35, 4 }
 0x2a2   : > { %v7614_v40 = vpack.c.b16 %v2667_v5, %v2667_v5 }
 0x2a3   : > { %v1949_v28 = vadd.f32 %v7336_v51, %v1884_v8  ;;  %v2008_v11 = vmax.f32 %v1948_v29, 0.0  ;;  %v1391_v29 = vadd.f32 %v1390_v37, %v7602_v23 }
 0x2a4   : > { %v2354_v57 = vld.sshfl [vmem:[#allocation1] sm:$0xff pattern:$0x75316420]  ;;  %v2906_v34 = vrot.slane %v7614_v40, 1  ;;  %v2771_v53 = vshll.u32 %v7614_v40, 16  ;;  %v2775_v58 = vshrl.u32 %v7614_v40, 16 }
 0x2a5   : > { %v2009_v20 = vmax.f32 %v1949_v28, 0.0  ;;  %2356 = vst [vmem:[#allocation1 + $0x20] ss:$2 sm:$0xff] %v2008_v11  ;;  %v2456_v33 = vsel %vm7593_vm5, %v2354_v57, 0.0 }
 0x2a6   : > { %v2355_v56 = vld.sshfl [vmem:[#allocation1 + $0x10] sm:$0xff pattern:$0x75316420]  ;;  %v1728_v47 = vpop.f32.mrf.mxu2  ;;  %2941 = vrot.lane.b32.xlu1 %v2906_v34, %s6403_s19  ;;  %v2773_v6 = vrot.slane %v2771_v53, 1  ;;  %v2492_v59 = vpack.c.bf16 %v2456_v33, %v2456_v33  ;;  %v2907_v21 = vsel %vm691_vm0, %v2905_v16, %v2906_v34  ;;  %v1392_v34 = vpop.f32.mrf.mxu1 }
 0x2a7   : > { %2357 = vst [vmem:[#allocation1 + $0x21] ss:$2 sm:$0xff] %v2009_v20  ;;  %v1809_v36 = vrot.slane %v1728_v47, 4  ;;  %v1885_v12 = vadd.f32 %v1728_v47, %v1386_v26  ;;  %v2457_v17 = vsel %vm7628_vm8, %v2355_v56, 0.0  ;;  %v1468_v20 = vrot.slane %v1391_v29, 4 }
 0x2a8   : > { %v2774_v2 = vsel %vm462_vm1, %v2769_v13, %v2773_v6  ;;  %v2493_v25 = vpack.c.bf16 %v2457_v17, %v2457_v17  ;;  %2530 = vst.msk [vmem:[#allocation2 + $0x40] sm:$0xf] %vm2512_vm12, %v2492_v59  ;;  %v2777_v38 = vor.u32 %v2775_v58, %v2773_v6  ;;  %v1393_v16 = vadd.f32 %v1392_v34, %v7620_v31 }
 0x2a9   : > { %v1886_v14 = vadd.f32 %v1809_v36, %v1466_v61  ;;  %v1950_v45 = vadd.f32 %v7333_v9, %v1885_v12  ;;  %2869 = vrot.lane.b32.xlu0 %v2774_v2, %s6404_s20  ;;  %v1186_v2 = vpop.f32.mrf.mxu0 }
 0x2aa   : > { %2531 = vst.msk [vmem:[#allocation2 + $0x44] sm:$0x3] %vm2515_vm3, %v2493_v25  ;;  %v1469_v46 = vrot.slane %v1393_v16, 4 }
 0x2ab   : > { %v1951_v39 = vadd.f32 %v7336_v51, %v1886_v14  ;;  %v2010_v60 = vmax.f32 %v1950_v45, 0.0 }
 0x2ad   : > { %v2011_v62 = vmax.f32 %v1951_v39, 0.0  ;;  %2358 = vst [vmem:[#allocation1 + $0x30] ss:$2 sm:$0xff] %v2010_v60 }
 0x2ae   : > { %v2360_v50 = vld.sshfl [vmem:[#allocation1 + $0x20] sm:$0xff pattern:$0x75316420]  ;;  %v1730_v18 = vpop.f32.mrf.mxu2  ;;  %2939 = vrot.lane.b32.xlu1 %v2907_v21, %s6403_s19 }
 0x2af   : > { %2359 = vst [vmem:[#allocation1 + $0x31] ss:$2 sm:$0xff] %v2011_v62  ;;  %v1810_v44 = vrot.slane %v1730_v18, 4  ;;  %v1887_v41 = vadd.f32 %v1730_v18, %v1388_v35  ;;  %v6254_v54 = vld [vmem:[#allocation2 + $0x3c] sm:$0xff]  ;;  %v2458_v5 = vsel %vm2112_vm15, %v2360_v50, 0.0  ;;  %v2046_v35 = vadd.s32 7, %v7353_v0  ;;  %v1395_v18 = vpop.f32.mrf.mxu1 }
 0x2b0   : > { %v2494_v8 = vpack.c.bf16 %v2458_v5, %v2458_v5  ;;  %v2781_v11 = vshll.u32 %v6254_v54, 16  ;;  %v2779_v23 = vshrl.u32 %v6254_v54, 16  ;;  %v2908_v47 = vrot.slane %v6254_v54, 1 }
 0x2b1   : > { %v1888_v27 = vadd.f32 %v1810_v44, %v1467_v55  ;;  %v1952_v32 = vadd.f32 %v7333_v9, %v1887_v41  ;;  %2871 = vrot.lane.b32.xlu0 %v2777_v38, %s6404_s20  ;;  %v2567_v26 = vld [vmem:[#allocation2 + $0x44] sm:$0x3]  ;;  %vm2062_vm2 = vcmp.ge.s32.totalorder %v2046_v35, 0  ;;  %vm2074_vm4 = vcmp.lt.s32.totalorder %v2046_v35, 16 }
 0x2b2   : > { %v2670_v28 = vunpack.c.l.b16 %v2567_v26  ;;  %2532 = vst.msk [vmem:[#allocation2 + $0x48] sm:$0xf] %vm2512_vm12, %v2494_v8  ;;  %v2783_v3 = vrot.slane %v2781_v11, 1  ;;  %vm7685_vm5 = vmand %vm2062_vm2, %vm2074_vm4  ;;  %v1396_v26 = vadd.f32 %v1395_v18, %v7655_v7 }
 0x2b3   : > { %v1953_v22 = vadd.f32 %v7333_v9, %v1888_v27  ;;  %v2012_v57 = vmax.f32 %v1952_v32, 0.0  ;;  %v1189_v32 = vpop.f32.mrf.mxu0  ;;  %vm2115_vm7 = vmand %vm7685_vm5, %vm2091_vm9 }
 0x2b4   : > { %v7663_v53 = vpack.c.b16 %v2670_v28, %v2670_v28  ;;  %v2784_v12 = vor.u32 %v2783_v3, %v2779_v23  ;;  %v7701_v28 = vld [vmem:[%s9583_s2] ss:$0 sm:$0xff]  ;;  %vm7720_vm8 = vmand %vm7685_vm5, %vm2132_vm13 }
 0x2b5   : > { %v2013_v13 = vmax.f32 %v1953_v22, 0.0  ;;  %2362 = vst [vmem:[#allocation1] ss:$2 sm:$0xff] %v2012_v57 }
 0x2b6   : > { %v2361_v33 = vld.sshfl [vmem:[#allocation1 + $0x30] sm:$0xff pattern:$0x75316420]  ;;  %v1733_v56 = vpop.f32.mrf.mxu2  ;;  %v2909_v6 = vrot.slane %v7663_v53, 1  ;;  %v2786_v59 = vshll.u32 %v7663_v53, 16  ;;  %v2790_v31 = vshrl.u32 %v7663_v53, 16 }
 0x2b7   : > { %2364 = vst [vmem:[#allocation1 + $0x10] ss:$2 sm:$0xff] %v2013_v13  ;;  %v1811_v61 = vrot.slane %v1733_v56, 4  ;;  %v1889_v36 = vadd.f32 %v1733_v56, %v1391_v29  ;;  %v2459_v17 = vsel %vm7641_vm14, %v2361_v33, 0.0  ;;  %v1470_v33 = vrot.slane %v1396_v26, 4 }
 0x2b8   : > { %v2910_v25 = vsel %vm691_vm0, %v2908_v47, %v2909_v6  ;;  %v2788_v14 = vrot.slane %v2786_v59, 1  ;;  %v2495_v45 = vpack.c.bf16 %v2459_v17, %v2459_v17  ;;  %v1397_v59 = vpop.f32.mrf.mxu1 }
 0x2b9   : > { %v1890_v37 = vadd.f32 %v1811_v61, %v1468_v20  ;;  %v1954_v39 = vadd.f32 %v7336_v51, %v1889_v36  ;;  %2943 = vrot.lane.b32.xlu2 %v2910_v25, %s6403_s19 }
 0x2ba   : > { %v2789_v60 = vsel %vm462_vm1, %v2784_v12, %v2788_v14  ;;  %2533 = vst.msk [vmem:[#allocation2 + $0x4c] sm:$0xf] %vm2512_vm12, %v2495_v45  ;;  %v2792_v29 = vor.u32 %v2790_v31, %v2788_v14  ;;  %v2047_v14 = vadd.s32 8, %v7353_v0  ;;  %v1398_v45 = vadd.f32 %v1397_v59, %v1186_v2 }
 0x2bb   : > { %v1955_v62 = vadd.f32 %v7333_v9, %v1890_v37  ;;  %v2014_v21 = vmax.f32 %v1954_v39, 0.0  ;;  %2873 = vrot.lane.b32.xlu1 %v2789_v60, %s6404_s20  ;;  %v1191_v60 = vpop.f32.mrf.mxu0 }
 0x2bc   : > { %v2363_v58 = vld.sshfl [vmem:[#allocation1] sm:$0xff pattern:$0x75316420]  ;;  %vm2063_vm10 = vcmp.ge.s32.totalorder %v2047_v14, 0  ;;  %vm2075_vm11 = vcmp.lt.s32.totalorder %v2047_v14, 16  ;;  %v1471_v31 = vrot.slane %v1398_v45, 4  ;;  %v1403_v14 = vadd.f32 %v7302_v10, %v1191_v60 }
 0x2bd   : > { %v2015_v55 = vmax.f32 %v1955_v62, 0.0  ;;  %2365 = vst [vmem:[#allocation1 + $0x11] ss:$2 sm:$0xff] %v2014_v21  ;;  %v2460_v50 = vsel %vm2153_vm6, %v2363_v58, 0.0  ;;  %vm7737_vm14 = vmand %vm2063_vm10, %vm2075_vm11 }
 0x2be   : > { %v1735_v44 = vpop.f32.mrf.mxu2  ;;  %v2496_v41 = vpack.c.bf16 %v2460_v50, %v2460_v50  ;;  %vm2118_vm15 = vmand %vm7737_vm14, %vm2091_vm9 }
 0x2bf   : > { %2366 = vst [vmem:[#allocation1 + $0x20] ss:$2 sm:$0xff] %v2015_v55  ;;  %v1812_v38 = vrot.slane %v1735_v44, 4  ;;  %v1891_v54 = vadd.f32 %v1735_v44, %v1393_v16  ;;  %v1473_v55 = vrot.slane %v1403_v14, 4  ;;  %vm2159_vm6 = vmand %vm7737_vm14, %vm2132_vm13 }
 0x2c0   : > { %2534 = vst.msk [vmem:[#allocation2 + $0x50] sm:$0x3] %vm2515_vm3, %v2496_v41 }
 0x2c1   : > { %v1892_v5 = vadd.f32 %v1812_v38, %v1469_v46  ;;  %v1956_v8 = vadd.f32 %v7336_v51, %v1891_v54  ;;  %v7691_v27 = vld [vmem:[#allocation2 + $0x48] sm:$0xff] }
 0x2c2   : > { %v2796_v3 = vshll.u32 %v7691_v27, 16  ;;  %v2794_v39 = vshrl.u32 %v7691_v27, 16  ;;  %v2911_v62 = vrot.slane %v7691_v27, 1 }
 0x2c3   : > { %v1957_v11 = vadd.f32 %v7701_v28, %v1892_v5  ;;  %v2016_v22 = vmax.f32 %v1956_v8, 0.0  ;;  %2875 = vrot.lane.b32.xlu1 %v2792_v29, %s6404_s20 }
 0x2c4   : > { %v2369_v57 = vld.sshfl [vmem:[#allocation1 + $0x10] sm:$0xff pattern:$0x75316420]  ;;  %v2798_v17 = vrot.slane %v2796_v3, 1 }
 0x2c5   : > { %v2017_v34 = vmax.f32 %v1957_v11, 0.0  ;;  %2367 = vst [vmem:[#allocation1 + $0x21] ss:$2 sm:$0xff] %v2016_v22  ;;  %v2461_v20 = vsel %vm2115_vm7, %v2369_v57, 0.0 }
 0x2c6   : > { %v1738_v13 = vpop.f32.mrf.mxu2  ;;  %v2497_v23 = vpack.c.bf16 %v2461_v20, %v2461_v20  ;;  %v2799_v50 = vor.u32 %v2798_v17, %v2794_v39 }
 0x2c7   : > { %2368 = vst [vmem:[#allocation1 + $0x30] ss:$2 sm:$0xff] %v2017_v34  ;;  %v1813_v7 = vrot.slane %v1738_v13, 4  ;;  %v1893_v56 = vadd.f32 %v1738_v13, %v1396_v26  ;;  %v2570_v47 = vld [vmem:[#allocation2 + $0x50] sm:$0x3]  ;;  %v1401_v34 = vadd.f32 %v7300_v30, %v1189_v32 }
 0x2c8   : > { %v2673_v61 = vunpack.c.l.b16 %v2570_v47  ;;  %2535 = vst.msk [vmem:[#allocation2 + $0x54] sm:$0xf] %vm2512_vm12, %v2497_v23  ;;  %v1194_v23 = vpop.f32.mrf.mxu0 }
 0x2c9   : > { %v1894_v36 = vadd.f32 %v1813_v7, %v1470_v33  ;;  %v1958_v12 = vadd.f32 %v7701_v28, %v1893_v56  ;;  %v1472_v56 = vrot.slane %v1401_v34, 4 }
 0x2ca   : > { %v7708_v25 = vpack.c.b16 %v2673_v61, %v2673_v61 }
 0x2cb   : > { %v1959_v35 = vadd.f32 %v7336_v51, %v1894_v36  ;;  %v2018_v37 = vmax.f32 %v1958_v12, 0.0 }
 0x2cc   : > { %v2370_v16 = vld.sshfl [vmem:[#allocation1 + $0x20] sm:$0xff pattern:$0x75316420]  ;;  %v2912_v21 = vrot.slane %v7708_v25, 1  ;;  %v2801_v58 = vshll.u32 %v7708_v25, 16 }
 0x2cd   : > { %v2019_v2 = vmax.f32 %v1959_v35, 0.0  ;;  %2372 = vst [vmem:[#allocation1] ss:$2 sm:$0xff] %v2018_v37  ;;  %v2462_v18 = vsel %vm7685_vm5, %v2370_v16, 0.0 }
 0x2ce   : > { %v2371_v44 = vld.sshfl [vmem:[#allocation1 + $0x30] sm:$0xff pattern:$0x75316420]  ;;  %v1740_v41 = vpop.f32.mrf.mxu2  ;;  %v2913_v46 = vsel %vm691_vm0, %v2911_v62, %v2912_v21  ;;  %v2803_v38 = vrot.slane %v2801_v58, 1  ;;  %v2498_v54 = vpack.c.bf16 %v2462_v18, %v2462_v18  ;;  %v2805_v62 = vshrl.u32 %v7708_v25, 16 }
 0x2cf   : > { %2373 = vst [vmem:[#allocation1 + $0x1] ss:$2 sm:$0xff] %v2019_v2  ;;  %v1814_v5 = vrot.slane %v1740_v41, 4  ;;  %v1895_v8 = vadd.f32 %v1740_v41, %v1398_v45  ;;  %2947 = vrot.lane.b32.xlu0 %v2913_v46, %s6403_s19  ;;  %v2463_v9 = vsel %vm7720_vm8, %v2371_v44, 0.0 }
 0x2d0   : > { %v2804_v29 = vsel %vm462_vm1, %v2799_v50, %v2803_v38  ;;  %v2499_v26 = vpack.c.bf16 %v2463_v9, %v2463_v9  ;;  %2536 = vst.msk [vmem:[#allocation2 + $0x58] sm:$0xf] %vm2512_vm12, %v2498_v54  ;;  %v2807_v50 = vor.u32 %v2805_v62, %v2803_v38  ;;  %v1196_v46 = vpop.f32.mrf.mxu0 }
 0x2d1   : > { %v1896_v11 = vadd.f32 %v1814_v5, %v1471_v31  ;;  %v1960_v22 = vadd.f32 %v7701_v28, %v1895_v8  ;;  %2877 = vrot.lane.b32.xlu2 %v2804_v29, %s6404_s20  ;;  %v2048_v8 = vadd.s32 9, %v7353_v0 }
 0x2d2   : > { %2537 = vst.msk [vmem:[#allocation2 + $0x5c] sm:$0x3] %vm2515_vm3, %v2499_v26 }
 0x2d3   : > { %v1961_v3 = vadd.f32 %v7336_v51, %v1896_v11  ;;  %v2020_v20 = vmax.f32 %v1960_v22, 0.0  ;;  %vm2064_vm2 = vcmp.ge.s32.totalorder %v2048_v8, 0  ;;  %vm2076_vm4 = vcmp.lt.s32.totalorder %v2048_v8, 16 }
 0x2d4   : > { %vm7784_vm5 = vmand %vm2064_vm2, %vm2076_vm4  ;;  %vm2963_vm2 = vcmask 261120   ;;  %vm3004_vm4 = vcmask 523264  }
 0x2d5   : > { %v2021_v13 = vmax.f32 %v1961_v3, 0.0  ;;  %2374 = vst [vmem:[#allocation1 + $0x10] ss:$2 sm:$0xff] %v2020_v20  ;;  %vm2121_vm7 = vmand %vm7784_vm5, %vm2091_vm9 }
 0x2d6   : > { %v2377_v33 = vld.sshfl [vmem:[#allocation1] sm:$0xff pattern:$0x75316420]  ;;  %v1743_v7 = vpop.f32.mrf.mxu2  ;;  %vm2162_vm8 = vmand %vm7784_vm5, %vm2132_vm13 }
 0x2d7   : > { %2375 = vst [vmem:[#allocation1 + $0x11] ss:$2 sm:$0xff] %v2021_v13  ;;  %v1815_v47 = vrot.slane %v1743_v7, 4  ;;  %v1897_v59 = vadd.f32 %v1743_v7, %v1401_v34  ;;  %v7748_v61 = vld [vmem:[#allocation2 + $0x54] sm:$0xff]  ;;  %v2464_v30 = vsel %vm2118_vm15, %v2377_v33, 0.0  ;;  %v1406_v34 = vadd.f32 %v7306_v49, %v1194_v23 }
 0x2d8   : > { %v2500_v32 = vpack.c.bf16 %v2464_v30, %v2464_v30  ;;  %v2811_v35 = vshll.u32 %v7748_v61, 16  ;;  %v2914_v44 = vrot.slane %v7748_v61, 1  ;;  %v2809_v54 = vshrl.u32 %v7748_v61, 16 }
 0x2d9   : > { %v1898_v36 = vadd.f32 %v1815_v47, %v1472_v56  ;;  %v1962_v12 = vadd.f32 %v7701_v28, %v1897_v59  ;;  %2945 = vrot.lane.b32.xlu2 %v2909_v6, %s6403_s19  ;;  %v2573_v17 = vld [vmem:[#allocation2 + $0x5c] sm:$0x3]  ;;  %v1474_v49 = vrot.slane %v1406_v34, 4 }
 0x2da   : > { %v2676_v45 = vunpack.c.l.b16 %v2573_v17  ;;  %2538 = vst.msk [vmem:[#allocation2 + $0x60] sm:$0xf] %vm2512_vm12, %v2500_v32  ;;  %v2813_v18 = vrot.slane %v2811_v35, 1 }
 0x2db   : > { %v1963_v37 = vadd.f32 %v7701_v28, %v1898_v36  ;;  %v2022_v39 = vmax.f32 %v1962_v12, 0.0 }
 0x2dc   : > { %v7758_v16 = vpack.c.b16 %v2676_v45, %v2676_v45  ;;  %v2814_v11 = vor.u32 %v2813_v18, %v2809_v54  ;;  %v1199_v45 = vpop.f32.mrf.mxu0 }
 0x2dd   : > { %v2023_v58 = vmax.f32 %v1963_v37, 0.0  ;;  %2376 = vst [vmem:[#allocation1 + $0x20] ss:$2 sm:$0xff] %v2022_v39 }
 0x2de   : > { %v2378_v2 = vld.sshfl [vmem:[#allocation1 + $0x10] sm:$0xff pattern:$0x75316420]  ;;  %v1745_v6 = vpop.f32.mrf.mxu2  ;;  %v2915_v41 = vrot.slane %v7758_v16, 1  ;;  %v2816_v31 = vshll.u32 %v7758_v16, 16  ;;  %v2820_v57 = vshrl.u32 %v7758_v16, 16 }
 0x2df   : > { %2380 = vst [vmem:[#allocation1 + $0x30] ss:$2 sm:$0xff] %v2023_v58  ;;  %v1816_v10 = vrot.slane %v1745_v6, 4  ;;  %v1899_v60 = vadd.f32 %v1745_v6, %v1403_v14  ;;  %v2465_v5 = vsel %vm7737_vm14, %v2378_v2, 0.0  ;;  %v1408_v14 = vadd.f32 %v7308_v1, %v1196_v46 }
 0x2e0   : > { %v2916_v29 = vsel %vm691_vm0, %v2914_v44, %v2915_v41  ;;  %v2501_v26 = vpack.c.bf16 %v2465_v5, %v2465_v5  ;;  %v2818_v22 = vrot.slane %v2816_v31, 1  ;;  %v1411_v31 = vadd.f32 %v7311_v19, %v1199_v45 }
 0x2e1   : > { %v1900_v9 = vadd.f32 %v1816_v10, %v1473_v55  ;;  %v1964_v38 = vadd.f32 %v7336_v51, %v1899_v60  ;;  %2879 = vrot.lane.b32.xlu2 %v2807_v50, %s6404_s20  ;;  %2951 = vrot.lane.b32.xlu1 %v2916_v29, %s6403_s19  ;;  %v1475_v55 = vrot.slane %v1408_v14, 4 }
 0x2e2   : > { %2539 = vst.msk [vmem:[#allocation2 + $0x64] sm:$0xf] %vm2512_vm12, %v2501_v26  ;;  %v2819_v33 = vsel %vm462_vm1, %v2814_v11, %v2818_v22  ;;  %v2822_v36 = vor.u32 %v2820_v57, %v2818_v22 }
 0x2e3   : > { %v1965_v3 = vadd.f32 %v7701_v28, %v1900_v9  ;;  %v2024_v20 = vmax.f32 %v1964_v38, 0.0  ;;  %2881 = vrot.lane.b32.xlu0 %v2819_v33, %s6404_s20  ;;  %v2049_v38 = vadd.s32 10, %v7353_v0 }
 0x2e4   : > { %v2379_v13 = vld.sshfl [vmem:[#allocation1 + $0x20] sm:$0xff pattern:$0x75316420]  ;;  %v1201_v29 = vpop.f32.mrf.mxu0 }
 0x2e5   : > { %v2025_v7 = vmax.f32 %v1965_v3, 0.0  ;;  %2381 = vst [vmem:[#allocation1 + $0x31] ss:$2 sm:$0xff] %v2024_v20  ;;  %v2466_v56 = vsel %vm2159_vm6, %v2379_v13, 0.0  ;;  %vm2065_vm10 = vcmp.ge.s32.totalorder %v2049_v38, 0  ;;  %vm2077_vm11 = vcmp.lt.s32.totalorder %v2049_v38, 16 }
 0x2e6   : > { %v1748_v47 = vpop.f32.mrf.mxu2  ;;  %v2502_v59 = vpack.c.bf16 %v2466_v56, %v2466_v56  ;;  %vm7828_vm14 = vmand %vm2065_vm10, %vm2077_vm11 }
 0x2e7   : > { %2383 = vst [vmem:[#allocation1] ss:$2 sm:$0xff] %v2025_v7  ;;  %v1817_v23 = vrot.slane %v1748_v47, 4  ;;  %v1901_v30 = vadd.f32 %v1748_v47, %v1406_v34  ;;  %v1476_v7 = vrot.slane %v1411_v31, 4  ;;  %vm2124_vm15 = vmand %vm7828_vm14, %vm2091_vm9 }
 0x2e8   : > { %2540 = vst.msk [vmem:[#allocation2 + $0x68] sm:$0x3] %vm2515_vm3, %v2502_v59  ;;  %vm2165_vm6 = vmand %vm7828_vm14, %vm2132_vm13 }
 0x2e9   : > { %v1902_v12 = vadd.f32 %v1817_v23, %v1474_v49  ;;  %v1966_v17 = vadd.f32 %v7336_v51, %v1901_v30  ;;  %2883 = vrot.lane.b32.xlu1 %v2822_v36, %s6404_s20  ;;  %v7797_v39 = vld [vmem:[#allocation2 + $0x60] sm:$0xff]  ;;  %v1413_v49 = vadd.f32 %v7313_v48, %v1201_v29 }
 0x2ea   : > { %v2826_v60 = vshll.u32 %v7797_v39, 16  ;;  %v2824_v19 = vshrl.u32 %v7797_v39, 16  ;;  %v2917_v13 = vrot.slane %v7797_v39, 1 }
 0x2eb   : > { %v1967_v35 = vadd.f32 %v7701_v28, %v1902_v12  ;;  %v2026_v37 = vmax.f32 %v1966_v17, 0.0  ;;  %2949 = vrot.lane.b32.xlu0 %v2912_v21, %s6403_s19 }
 0x2ec   : > { %v2382_v62 = vld.sshfl [vmem:[#allocation1 + $0x30] sm:$0xff pattern:$0x75316420]  ;;  %v2828_v9 = vrot.slane %v2826_v60, 1 }
 0x2ed   : > { %v2027_v58 = vmax.f32 %v1967_v35, 0.0  ;;  %2384 = vst [vmem:[#allocation1 + $0x1] ss:$2 sm:$0xff] %v2026_v37  ;;  %v2467_v1 = vsel %vm2121_vm7, %v2382_v62, 0.0  ;;  %v1477_v35 = vrot.slane %v1413_v49, 4  ;;  %v1204_v37 = vpop.f32.mrf.mxu0 }
 0x2ee   : > { %v1750_v2 = vpop.f32.mrf.mxu2  ;;  %v2503_v6 = vpack.c.bf16 %v2467_v1, %v2467_v1  ;;  %v2829_v56 = vor.u32 %v2828_v9, %v2824_v19 }
 0x2ef   : > { %2385 = vst [vmem:[#allocation1 + $0x10] ss:$2 sm:$0xff] %v2027_v58  ;;  %v1818_v50 = vrot.slane %v1750_v2, 4  ;;  %v1903_v18 = vadd.f32 %v1750_v2, %v1408_v14  ;;  %v2576_v10 = vld [vmem:[#allocation2 + $0x68] sm:$0x3] }
 0x2f0   : > { %v2679_v44 = vunpack.c.l.b16 %v2576_v10  ;;  %2541 = vst.msk [vmem:[#allocation2 + $0x6c] sm:$0xf] %vm2512_vm12, %v2503_v6 }
 0x2f1   : > { %v1904_v46 = vadd.f32 %v1818_v50, %v1475_v55  ;;  %v1968_v54 = vadd.f32 %v7701_v28, %v1903_v18 }
 0x2f2   : > { %v7806_v5 = vpack.c.b16 %v2679_v44, %v2679_v44 }
 0x2f3   : > { %v1969_v21 = vadd.f32 %v7336_v51, %v1904_v46  ;;  %v2028_v8 = vmax.f32 %v1968_v54, 0.0  ;;  %2953 = vrot.lane.b32.xlu0 %v2915_v41, %s6403_s19  ;;  %v1416_v46 = vadd.f32 %v7320_v4, %v1204_v37  ;;  %v6272_v4 = vld [vmem:[%s9584_s3 + $0x58] sm:$0xff]  ;;  %v6270_v37 = vld [vmem:[%s9584_s3 + $0x48] sm:$0xff] }
 0x2f4   : > { %v2386_v26 = vld.sshfl [vmem:[#allocation1] sm:$0xff pattern:$0x75316420]  ;;  %v2918_v11 = vrot.slane %v7806_v5, 1  ;;  %v2831_v22 = vshll.u32 %v7806_v5, 16  ;;  %v2835_v6 = vshrl.u32 %v7806_v5, 16  ;;  %3409 = vmatpush.bf16.msra.mxu3 %v6272_v4 }
 0x2f5   : > { %v2029_v34 = vmax.f32 %v1969_v21, 0.0  ;;  %2388 = vst [vmem:[#allocation1 + $0x20] ss:$2 sm:$0xff] %v2028_v8  ;;  %v2468_v33 = vsel %vm7784_vm5, %v2386_v26, 0.0  ;;  %v1478_v29 = vrot.slane %v1416_v46, 4 }
 0x2f6   : > { %v2387_v3 = vld.sshfl [vmem:[#allocation1 + $0x10] sm:$0xff pattern:$0x75316420]  ;;  %v1753_v20 = vpop.f32.mrf.mxu2  ;;  %v2919_v57 = vsel %vm691_vm0, %v2917_v13, %v2918_v11  ;;  %v2833_v59 = vrot.slane %v2831_v22, 1  ;;  %v2504_v30 = vpack.c.bf16 %v2468_v33, %v2468_v33 }
 0x2f7   : > { %2389 = vst [vmem:[#allocation1 + $0x21] ss:$2 sm:$0xff] %v2029_v34  ;;  %v1819_v47 = vrot.slane %v1753_v20, 4  ;;  %v1905_v41 = vadd.f32 %v1753_v20, %v1411_v31  ;;  %2955 = vrot.lane.b32.xlu1 %v2919_v57, %s6403_s19  ;;  %v2469_v23 = vsel %vm2162_vm8, %v2387_v3, 0.0  ;;  %v1206_v20 = vpop.f32.mrf.mxu0 }
 0x2f8   : > { %v2834_v12 = vsel %vm462_vm1, %v2829_v56, %v2833_v59  ;;  %v2505_v14 = vpack.c.bf16 %v2469_v23, %v2469_v23  ;;  %2542 = vst.msk [vmem:[#allocation2 + $0x70] sm:$0xf] %vm2512_vm12, %v2504_v30  ;;  %v2837_v44 = vor.u32 %v2835_v6, %v2833_v59  ;;  %v6271_v59 = vld [vmem:[%s9584_s3 + $0x50] sm:$0xff]  ;;  %v1418_v23 = vadd.f32 %v7324_v63, %v1206_v20 }
 0x2f9   : > { %v1906_v36 = vadd.f32 %v1819_v47, %v1476_v7  ;;  %v1970_v32 = vadd.f32 %v7701_v28, %v1905_v41  ;;  %2885 = vrot.lane.b32.xlu2 %v2834_v12, %s6404_s20  ;;  %3410 = vmatpush.bf16.msra.mxu3 %v6271_v59 }
 0x2fa   : > { %2543 = vst.msk [vmem:[#allocation2 + $0x74] sm:$0x3] %vm2515_vm3, %v2505_v14  ;;  %v1479_v17 = vrot.slane %v1418_v23, 4 }
 0x2fb   : > { %v1971_v48 = vadd.f32 %v7336_v51, %v1906_v36  ;;  %v2030_v45 = vmax.f32 %v1970_v32, 0.0  ;;  %2957 = vrot.lane.b32.xlu0 %v2918_v11, %s6403_s19 }
 0x2fd   : > { %v2031_v58 = vmax.f32 %v1971_v48, 0.0  ;;  %2390 = vst [vmem:[#allocation1 + $0x30] ss:$2 sm:$0xff] %v2030_v45  ;;  %3411 = vmatpush.bf16.msra.mxu3 %v6270_v37 }
 0x2fe   : > { %v2392_v62 = vld.sshfl [vmem:[#allocation1 + $0x20] sm:$0xff pattern:$0x75316420]  ;;  %v1755_v1 = vpop.f32.mrf.mxu2 }
 0x2ff   : > { %v1820_v55 = vrot.slane %v1755_v1, 4  ;;  %v1907_v2 = vadd.f32 %v1755_v1, %v1413_v49  ;;  %v2470_v50 = vsel %vm2124_vm15, %v2392_v62, 0.0  ;;  %2391 = vst [vmem:[#allocation1 + $0x31] ss:$2 sm:$0xff] %v2031_v58  ;;  %v7844_v54 = vld [vmem:[#allocation2 + $0x6c] sm:$0xff] }
 0x300   : > { %v2506_v18 = vpack.c.bf16 %v2470_v50, %v2470_v50  ;;  %v2841_v11 = vshll.u32 %v7844_v54, 16  ;;  %v2920_v56 = vrot.slane %v7844_v54, 1  ;;  %v2839_v14 = vshrl.u32 %v7844_v54, 16 }
 0x301   : > { %v1908_v10 = vadd.f32 %v1820_v55, %v1477_v35  ;;  %v1972_v60 = vadd.f32 %v7701_v28, %v1907_v2  ;;  %2887 = vrot.lane.b32.xlu2 %v2837_v44, %s6404_s20  ;;  %v2579_v8 = vld [vmem:[#allocation2 + $0x74] sm:$0x3]  ;;  %v6269_v44 = vld [vmem:[%s9584_s3 + $0x40] sm:$0xff] }
 0x302   : > { %2544 = vst.msk [vmem:[#allocation2 + $0x78] sm:$0xf] %vm2512_vm12, %v2506_v18  ;;  %v2682_v38 = vunpack.c.l.b16 %v2579_v8  ;;  %v2843_v41 = vrot.slane %v2841_v11, 1  ;;  %3412 = vmatpush.bf16.msra.mxu3 %v6269_v44 }
 0x303   : > { %v1973_v31 = vadd.f32 %v7701_v28, %v1908_v10  ;;  %v2032_v21 = vmax.f32 %v1972_v60, 0.0  ;;  %v2552_v10 = vld [vmem:[#allocation2 + $0x8] sm:$0x3] }
 0x304   : > { %v7853_v3 = vpack.c.b16 %v2682_v38, %v2682_v38  ;;  %v2844_v63 = vor.u32 %v2843_v41, %v2839_v14  ;;  %v2655_v8 = vunpack.c.l.b16 %v2552_v10  ;;  %v7947_v10 = vld [vmem:[#allocation2] sm:$0xff] }
 0x305   : > { %v2033_v9 = vmax.f32 %v1973_v31, 0.0  ;;  %2394 = vst [vmem:[#allocation1] ss:$2 sm:$0xff] %v2032_v21  ;;  %v2858_v21 = vpop.permute.xlu2 %2857 }
 0x306   : > { %v1758_v26 = vpop.f32.mrf.mxu2  ;;  %v2393_v22 = vld.sshfl [vmem:[#allocation1 + $0x30] sm:$0xff pattern:$0x75316420]  ;;  %v2921_v47 = vrot.slane %v7853_v3, 1  ;;  %v2846_v57 = vshll.u32 %v7853_v3, 16  ;;  %v2850_v6 = vshrl.u32 %v7853_v3, 16  ;;  %v7900_v20 = vpack.c.b16 %v2655_v8, %v2655_v8 }
 0x307   : > { %2396 = vst [vmem:[#allocation1 + $0x10] ss:$2 sm:$0xff] %v2033_v9  ;;  %v1821_v34 = vrot.slane %v1758_v26, 4  ;;  %v1909_v19 = vadd.f32 %v1758_v26, %v1416_v46  ;;  %v2471_v13 = vsel %vm7828_vm14, %v2393_v22, 0.0  ;;  %v2928_v9 = vpop.permute.xlu0 %2927  ;;  %v6268_v26 = vld [vmem:[%s9584_s3 + $0x38] sm:$0xff] }
 0x308   : > { %v2507_v49 = vpack.c.bf16 %v2471_v13, %v2471_v13  ;;  %v2922_v32 = vsel %vm691_vm0, %v2920_v56, %v2921_v47  ;;  %v2848_v45 = vrot.slane %v2846_v57, 1  ;;  %3413 = vmatpush.bf16.msra.mxu3 %v6268_v26  ;;  %v2930_v57 = vpop.permute.xlu1 %2929  ;;  %v6352_v26 = vld [vmem:[#allocation2 + $0x18] sm:$0xff] }
 0x309   : > { %v1910_v33 = vadd.f32 %v1821_v34, %v1478_v29  ;;  %v1974_v7 = vadd.f32 %v7336_v51, %v1909_v19  ;;  %2959 = vrot.lane.b32.xlu2 %v2922_v32, %s6403_s19  ;;  %v2050_v29 = vadd.s32 11, %v7353_v0 }
 0x30a   : > { %2545 = vst.msk [vmem:[#allocation2 + $0x7c] sm:$0xf] %vm2512_vm12, %v2507_v49  ;;  %v2849_v2 = vsel %vm462_vm1, %v2844_v63, %v2848_v45  ;;  %v2852_v60 = vor.u32 %v2850_v6, %v2848_v45  ;;  %v2711_v49 = vshll.u32 %v7900_v20, 16 }
 0x30b   : > { %v1975_v30 = vadd.f32 %v7701_v28, %v1910_v33  ;;  %v2034_v36 = vmax.f32 %v1974_v7, 0.0  ;;  %2889 = vrot.lane.b32.xlu1 %v2849_v2, %s6404_s20  ;;  %vm2066_vm5 = vcmp.ge.s32.totalorder %v2050_v29, 0  ;;  %vm2078_vm7 = vcmp.lt.s32.totalorder %v2050_v29, 16 }
 0x30c   : > { %v2395_v12 = vld.sshfl [vmem:[#allocation1] sm:$0xff pattern:$0x75316420]  ;;  %vm7902_vm8 = vmand %vm2066_vm5, %vm2078_vm7  ;;  %v2713_v2 = vrot.slane %v2711_v49, 1 }
 0x30d   : > { %v2035_v48 = vmax.f32 %v1975_v30, 0.0  ;;  %2397 = vst [vmem:[#allocation1 + $0x11] ss:$2 sm:$0xff] %v2034_v36  ;;  %v2472_v62 = vsel %vm2165_vm6, %v2395_v12, 0.0  ;;  %vm2127_vm10 = vmand %vm7902_vm8, %vm2091_vm9  ;;  %v7922_v63 = vpop.permute.xlu2 %2933 }
 0x30e   : > { %v1760_v35 = vpop.f32.mrf.mxu2  ;;  %v2508_v55 = vpack.c.bf16 %v2472_v62, %v2472_v62  ;;  %vm2168_vm9 = vmand %vm7902_vm8, %vm2132_vm13  ;;  %vm3382_vm13 = vcmask 785408  }
 0x30f   : > { %2398 = vst [vmem:[#allocation1 + $0x20] ss:$2 sm:$0xff] %v2035_v48  ;;  %v1822_v58 = vrot.slane %v1760_v35, 4  ;;  %v1911_v1 = vadd.f32 %v1760_v35, %v1418_v23  ;;  %v2860_v8 = vpop.permute.xlu0 %2859 }
 0x310   : > { %2546 = vst.msk [vmem:[#allocation2 + $0x80] sm:$0x3] %vm2515_vm3, %v2508_v55  ;;  %v2862_v44 = vpop.permute.xlu1 %2861 }
 0x311   : > { %v1912_v50 = vadd.f32 %v1822_v58, %v1479_v17  ;;  %v1976_v18 = vadd.f32 %v7336_v51, %v1911_v1  ;;  %2891 = vrot.lane.b32.xlu2 %v2852_v60, %s6404_s20  ;;  %v7889_v38 = vld [vmem:[#allocation2 + $0x78] sm:$0xff]  ;;  %v6267_v58 = vld [vmem:[%s9584_s3 + $0x30] sm:$0xff] }
 0x312   : > { %v3056_v4 = vshll.u32 %v7889_v38, 16  ;;  %v3072_v36 = vrot.slane %v7889_v38, 1  ;;  %v3054_v32 = vshrl.u32 %v7889_v38, 16  ;;  %3414 = vmatpush.bf16.msra.mxu3 %v6267_v58 }
 0x313   : > { %v1977_v46 = vadd.f32 %v7701_v28, %v1912_v50  ;;  %v2036_v31 = vmax.f32 %v1976_v18, 0.0  ;;  %v6351_v28 = vld [vmem:[#allocation2 + $0xc] sm:$0xff]  ;;  %v2715_v18 = vshrl.u32 %v7900_v20, 16 }
 0x314   : > { %v2969_v11 = vsel %vm2963_vm2, %v6351_v28, %v2858_v21  ;;  %v2401_v34 = vld.sshfl [vmem:[#allocation1 + $0x10] sm:$0xff pattern:$0x75316420]  ;;  %v3058_v56 = vrot.slane %v3056_v4, 1  ;;  %v2973_v28 = vsel %vm2963_vm2, %v6352_v26, %v2862_v44 }
 0x315   : > { %v2037_v51 = vmax.f32 %v1977_v46, 0.0  ;;  %2399 = vst [vmem:[#allocation1 + $0x21] ss:$2 sm:$0xff] %v2036_v31  ;;  %v7898_v22 = vsel %vm3004_vm4, %v2969_v11, %v2928_v9  ;;  %v2473_v41 = vsel %vm2127_vm10, %v2401_v34, 0.0  ;;  %v2717_v9 = vor.u32 %v2715_v18, %v2713_v2  ;;  %v2932_v4 = vpop.permute.xlu2 %2931 }
 0x316   : > { %v9621_v33 = vrot.slane %v7898_v22, 2  ;;  %v2509_v23 = vpack.c.bf16 %v2473_v41, %v2473_v41  ;;  %v9622_v14 = vrot.slane %v7898_v22, 1  ;;  %v9620_v45 = vrot.slane %v7898_v22, 3 }
 0x317   : > { %2400 = vst [vmem:[#allocation1 + $0x30] ss:$2 sm:$0xff] %v2037_v51  ;;  %v2582_v19 = vld [vmem:[#allocation2 + $0x80] sm:$0x3]  ;;  %v3059_v37 = vor.u32 %v3058_v56, %v3054_v32  ;;  %v9619_v17 = vrot.slane %v7898_v22, 4  ;;  %v9618_v1 = vrot.slane %v7898_v22, 5  ;;  %v2971_v34 = vsel %vm2963_vm2, %v7465_v52, %v2860_v8  ;;  %v7981_v49 = vpop.permute.xlu0 %2937 }
 0x318   : > { %v3050_v0 = vunpack.c.l.b16 %v2582_v19  ;;  %2547 = vst.msk [vmem:[#allocation2 + $0x84] sm:$0xf] %vm2512_vm12, %v2509_v23  ;;  %v9617_v6 = vrot.slane %v7898_v22, 6  ;;  %v9616_v50 = vrot.slane %v7898_v22, 7  ;;  %v2706_v11 = vshll.u32 %v7947_v10, 16 }
 0x319   : > { %v7969_v19 = vsel %vm3004_vm4, %v2973_v28, %v2932_v4  ;;  %v7976_v56 = vsel %vm3004_vm4, %v2971_v34, %v2930_v57  ;;  %v2893_v52 = vrot.slane %v7947_v10, 1  ;;  %vm5088_vm10 = vcmask 125952  }
 0x31a   : > { %v7911_v7 = vpack.c.b16 %v3050_v0, %v3050_v0  ;;  %v2894_v0 = vrot.slane %v7900_v20, 1  ;;  %v2708_v13 = vrot.slane %v2706_v11, 1  ;;  %v7988_v23 = vrot.slane %v7969_v19, 2  ;;  %v6353_v11 = vld [vmem:[#allocation2 + $0x24] sm:$0xff] }
 0x31c   : > { %v2402_v59 = vld.sshfl [vmem:[#allocation1 + $0x20] sm:$0xff pattern:$0x75316420]  ;;  %v3073_v30 = vrot.slane %v7911_v7, 1  ;;  %v3061_v12 = vshll.u32 %v7911_v7, 16  ;;  %v3065_v46 = vshrl.u32 %v7911_v7, 16  ;;  %v2895_v32 = vsel %vm691_vm0, %v2893_v52, %v2894_v0 }
 0x31d   : > { %3173 = vst [vmem:[#allocation1 + $0x2] ss:$9 sm:$0xff] %v9621_v33  ;;  %v2474_v60 = vsel %vm7902_vm8, %v2402_v59, 0.0  ;;  %v7979_v59 = vrot.slane %v7969_v19, 1 }
 0x31e   : > { %v2403_v48 = vld.sshfl [vmem:[#allocation1 + $0x30] sm:$0xff pattern:$0x75316420]  ;;  %3077 = vrot.lane.b32.xlu2 %v3073_v30, %s6403_s19  ;;  %v3074_v35 = vsel %vm691_vm0, %v3072_v36, %v3073_v30  ;;  %v3063_v62 = vrot.slane %v3061_v12, 1  ;;  %v2510_v21 = vpack.c.bf16 %v2474_v60, %v2474_v60  ;;  %v7992_v36 = vrot.slane %v7969_v19, 3 }
 0x31f   : > { %3167 = vst [vmem:[#allocation1] ss:$9 sm:$0xff] %v7898_v22  ;;  %3075 = vrot.lane.b32.xlu1 %v3074_v35, %s6403_s19  ;;  %v2475_v31 = vsel %vm2168_vm9, %v2403_v48, 0.0  ;;  %v7997_v35 = vrot.slane %v7969_v19, 4  ;;  %v2936_v26 = vpop.permute.xlu0 %2935 }
 0x320   : > { %3170 = vst [vmem:[#allocation1 + $0x1] ss:$9 sm:$0xff] %v9622_v14  ;;  %v3064_v55 = vsel %vm462_vm1, %v3059_v37, %v3063_v62  ;;  %v2511_v51 = vpack.c.bf16 %v2475_v31, %v2475_v31  ;;  %v3067_v29 = vor.u32 %v3065_v46, %v3063_v62  ;;  %v8002_v37 = vrot.slane %v7969_v19, 5 }
 0x321   : > { %3176 = vst [vmem:[#allocation1 + $0x3] ss:$9 sm:$0xff] %v9620_v45  ;;  %3068 = vrot.lane.b32.xlu0 %v3064_v55, %s6404_s20  ;;  %v8009_v55 = vrot.slane %v7969_v19, 6 }
 0x322   : > { %3179 = vst [vmem:[#allocation1 + $0x4] ss:$9 sm:$0xff] %v9619_v17 }
 0x323   : > { %3182 = vst [vmem:[#allocation1 + $0x5] ss:$9 sm:$0xff] %v9618_v1 }
 0x324   : > { %3185 = vst [vmem:[#allocation1 + $0x6] ss:$9 sm:$0xff] %v9617_v6 }
 0x325   : > { %3188 = vst [vmem:[#allocation1 + $0x7] ss:$9 sm:$0xff] %v9616_v50 }
 0x326   : > { %2548 = vst.msk [vmem:[#allocation2 + $0x88] sm:$0xf] %vm2512_vm12, %v2510_v21  ;;  %2855 = vrot.lane.b32.xlu2 %v2717_v9, %s6404_s20  ;;  %v2864_v21 = vpop.permute.xlu1 %2863  ;;  %v2866_v9 = vpop.permute.xlu2 %2865 }
 0x327   : > { %2549 = vst.msk [vmem:[#allocation2 + $0x8c] sm:$0x3] %vm2515_vm3, %v2511_v51  ;;  %3070 = vrot.lane.b32.xlu1 %v3067_v29, %s6404_s20  ;;  %v2977_v4 = vsel %vm2963_vm2, %v6353_v11, %v2866_v9  ;;  %v2975_v34 = vsel %vm2963_vm2, %v7516_v42, %v2864_v21 }
 0x329   : > { %2961 = vrot.lane.b32.xlu0 %v2921_v47, %s6403_s19  ;;  %v2704_v47 = vshrl.u32 %v7947_v10, 16 }
 0x32b   : > { %v2709_v12 = vor.u32 %v2708_v13, %v2704_v47  ;;  %v8025_v13 = vrot.slane %v7969_v19, 7  ;;  %v8033_v47 = vsel %vm3004_vm4, %v2975_v34, %v7922_v63  ;;  %v6355_v34 = vld [vmem:[#allocation2 + $0x3c] sm:$0xff] }
 0x32c   : > { %v3189_v41 = vld [vmem:[#allocation1] sm:$0xff] }
 0x32d   : > { %3190 = vst [vmem:[#allocation1] ss:$9 sm:$0xff] %v7976_v56  ;;  %6041 = vmatmul.msk.bf16.vlgmr.msra.gmra.mxu3 %vm3382_vm13, %v3189_v41  ;;  %v6260_v57 = vld [vmem:[#allocation2 + $0x84] sm:$0xff]  ;;  %v2714_v62 = vsel %vm462_vm1, %v2709_v12, %v2713_v2  ;;  %v8028_v41 = vsel %vm3004_vm4, %v2977_v4, %v2936_v26 }
 0x32e   : > { %3191 = vst [vmem:[#allocation1 + $0x1] ss:$9 sm:$0xff] %v7969_v19  ;;  %v2585_v30 = vld [vmem:[#allocation2 + $0x8c] sm:$0x3]  ;;  %v3895_v18 = vshll.u32 %v6260_v57, 16  ;;  %v3911_v60 = vrot.slane %v6260_v57, 1  ;;  %v2942_v42 = vpop.permute.xlu1 %2941 }
 0x32f   : > { %3193 = vst [vmem:[#allocation1 + $0x2] ss:$9 sm:$0xff] %v7979_v59  ;;  %v3889_v48 = vunpack.c.l.b16 %v2585_v30  ;;  %2923 = vrot.lane.b32.xlu1 %v2895_v32, %s6403_s19  ;;  %v3893_v46 = vshrl.u32 %v6260_v57, 16  ;;  %v8037_v57 = vrot.slane %v8028_v41, 1  ;;  %v6278_v30 = vld [vmem:[%s9584_s3 + $0x88] sm:$0xff]  ;;  %v8050_v32 = vrot.slane %v8028_v41, 3 }
 0x330   : > { %3195 = vst [vmem:[#allocation1 + $0x3] ss:$9 sm:$0xff] %v7988_v23  ;;  %v3897_v31 = vrot.slane %v3895_v18, 1  ;;  %4112 = vmatpush.bf16.msrb.mxu0 %v6278_v30  ;;  %v8054_v12 = vrot.slane %v8028_v41, 4  ;;  %v2870_v18 = vpop.permute.xlu0 %2869 }
 0x331   : > { %3197 = vst [vmem:[#allocation1 + $0x4] ss:$9 sm:$0xff] %v7992_v36  ;;  %v8006_v58 = vpack.c.b16 %v3889_v48, %v3889_v48  ;;  %2853 = vrot.lane.b32.xlu0 %v2714_v62, %s6404_s20  ;;  %v8058_v62 = vrot.slane %v8028_v41, 5 }
 0x332   : > { %3199 = vst [vmem:[#allocation1 + $0x5] ss:$9 sm:$0xff] %v7997_v35  ;;  %v3898_v51 = vor.u32 %v3897_v31, %v3893_v46  ;;  %v2868_v46 = vpop.permute.xlu2 %2867  ;;  %v8066_v31 = vrot.slane %v8028_v41, 6 }
 0x333   : > { %9760 = vst [vmem:[#allocation7_spill] sm:$0xff] %v8006_v58  ;;  %v3912_v44 = vrot.slane %v8006_v58, 1  ;;  %v3900_v2 = vshll.u32 %v8006_v58, 16  ;;  %v3904_v63 = vshrl.u32 %v8006_v58, 16  ;;  %v6265_v58 = vld [vmem:[%s9584_s3 + $0x20] sm:$0xff] }
 0x334   : > { %3201 = vst [vmem:[#allocation1 + $0x6] ss:$9 sm:$0xff] %v8002_v37 }
 0x335   : > { %3203 = vst [vmem:[#allocation1 + $0x7] ss:$9 sm:$0xff] %v8009_v55  ;;  %v3913_v8 = vsel %vm691_vm0, %v3911_v60, %v3912_v44  ;;  %v3902_v29 = vrot.slane %v3900_v2, 1  ;;  %v6354_v2 = vld [vmem:[#allocation2 + $0x30] sm:$0xff] }
 0x336   : > { %3914 = vrot.lane.b32.xlu2 %v3913_v8, %s6403_s19  ;;  %v2940_v60 = vpop.permute.xlu1 %2939  ;;  %v2981_v21 = vsel %vm2963_vm2, %v6354_v2, %v2870_v18  ;;  %v8070_v8 = vrot.slane %v8028_v41, 7 }
 0x337   : > { %v3903_v28 = vsel %vm462_vm1, %v3898_v51, %v3902_v29  ;;  %v3906_v48 = vor.u32 %v3904_v63, %v3902_v29  ;;  %v2979_v51 = vsel %vm2963_vm2, %v7570_v43, %v2868_v46 }
 0x338   : > { %3907 = vrot.lane.b32.xlu1 %v3903_v28, %s6404_s20  ;;  %v8080_v29 = vsel %vm3004_vm4, %v2979_v51, %v7981_v49  ;;  %v2872_v4 = vpop.permute.xlu0 %2871 }
 0x339   : > { %2925 = vrot.lane.b32.xlu0 %v2894_v0, %s6403_s19  ;;  %v8045_v0 = vrot.slane %v8028_v41, 2 }
 0x33a   : > { %v2944_v63 = vpop.permute.xlu2 %2943 }
 0x33c   : > { %v3204_v52 = vld [vmem:[#allocation1] sm:$0xff] }
 0x33d   : > { %3206 = vst [vmem:[#allocation1] ss:$9 sm:$0xff] %v8025_v13  ;;  %6042 = vmatmul.msk.bf16.gmra.mxu3 %vm3382_vm13, %v3204_v52 }
 0x33e   : > { %3207 = vst [vmem:[#allocation1 + $0x1] ss:$9 sm:$0xff] %v8033_v47  ;;  %v2874_v11 = vpop.permute.xlu1 %2873 }
 0x33f   : > { %3208 = vst [vmem:[#allocation1 + $0x2] ss:$9 sm:$0xff] %v8028_v41  ;;  %v2985_v52 = vsel %vm2963_vm2, %v6355_v34, %v2874_v11 }
 0x340   : > { %3210 = vst [vmem:[#allocation1 + $0x3] ss:$9 sm:$0xff] %v8037_v57  ;;  %3916 = vrot.lane.b32.xlu1 %v3912_v44, %s6403_s19  ;;  %v8073_v44 = vsel %vm3004_vm4, %v2981_v21, %v2940_v60  ;;  %v2983_v60 = vsel %vm2963_vm2, %v7614_v40, %v2872_v4  ;;  %v8116_v2 = vsel %vm3004_vm4, %v2985_v52, %v2944_v63  ;;  %v6277_v40 = vld [vmem:[%s9584_s3 + $0x80] sm:$0xff]  ;;  %s6129_s19 = sadd.s32 4294967295, %s5858_s17 }
 0x341   : > { %3212 = vst [vmem:[#allocation1 + $0x4] ss:$9 sm:$0xff] %v8045_v0  ;;  %3909 = vrot.lane.b32.xlu0 %v3906_v48, %s6404_s20  ;;  %v8084_v26 = vrot.slane %v8073_v44, 1  ;;  %v8089_v28 = vrot.slane %v8073_v44, 2  ;;  %v8093_v43 = vrot.slane %v8073_v44, 3  ;;  %v8097_v49 = vrot.slane %v8073_v44, 4  ;;  %4113 = vmatpush.bf16.msrb.mxu0 %v6277_v40  ;;  %v2948_v63 = vpop.permute.xlu0 %2947 }
 0x342   : > { %3214 = vst [vmem:[#allocation1 + $0x5] ss:$9 sm:$0xff] %v8050_v32  ;;  %v8104_v30 = vrot.slane %v8073_v44, 5  ;;  %v8107_v48 = vrot.slane %v8073_v44, 6  ;;  %v8112_v46 = vrot.slane %v8073_v44, 7  ;;  %v8121_v21 = vsel %vm3004_vm4, %v2983_v60, %v2942_v42  ;;  %v2878_v4 = vpop.permute.xlu2 %2877 }
 0x343   : > { %3216 = vst [vmem:[#allocation1 + $0x6] ss:$9 sm:$0xff] %v8054_v12  ;;  %v8131_v51 = vrot.slane %v8116_v2, 1  ;;  %v8135_v11 = vrot.slane %v8116_v2, 2  ;;  %v8139_v42 = vrot.slane %v8116_v2, 3  ;;  %v8145_v52 = vrot.slane %v8116_v2, 4 }
 0x344   : > { %3218 = vst [vmem:[#allocation1 + $0x7] ss:$9 sm:$0xff] %v8058_v62  ;;  %v8153_v40 = vrot.slane %v8116_v2, 6  ;;  %v8159_v6 = vrot.slane %v8116_v2, 7 }
 0x346   : > { %v2876_v34 = vpop.permute.xlu1 %2875 }
 0x347   : > { %v2987_v50 = vsel %vm2963_vm2, %v7663_v53, %v2876_v34 }
 0x34a   : > { %v2946_v17 = vpop.permute.xlu2 %2945 }
 0x34b   : > { %v3219_v9 = vld [vmem:[#allocation1] sm:$0xff] }
 0x34c   : > { %3221 = vst [vmem:[#allocation1] ss:$9 sm:$0xff] %v8066_v31 }
 0x34d   : > { %3223 = vst [vmem:[#allocation1 + $0x1] ss:$9 sm:$0xff] %v8070_v8  ;;  %6043 = vmatmul.msk.bf16.gmra.mxu3 %vm3382_vm13, %v3219_v9  ;;  %v6266_v9 = vld [vmem:[%s9584_s3 + $0x28] sm:$0xff] }
 0x34e   : > { %3224 = vst [vmem:[#allocation1 + $0x2] ss:$9 sm:$0xff] %v8080_v29  ;;  %3661 = vmatpush.bf16.msrb.mxu3 %v6266_v9  ;;  %v2989_v9 = vsel %vm2963_vm2, %v7691_v27, %v2878_v4  ;;  %v8168_v27 = vsel %vm3004_vm4, %v2987_v50, %v2946_v17 }
 0x34f   : > { %3225 = vst [vmem:[#allocation1 + $0x3] ss:$9 sm:$0xff] %v8073_v44  ;;  %v8163_v1 = vsel %vm3004_vm4, %v2989_v9, %v2948_v63 }
 0x350   : > { %3227 = vst [vmem:[#allocation1 + $0x4] ss:$9 sm:$0xff] %v8084_v26  ;;  %v8172_v53 = vrot.slane %v8163_v1, 1  ;;  %v8176_v4 = vrot.slane %v8163_v1, 2  ;;  %v8184_v50 = vrot.slane %v8163_v1, 3  ;;  %v8187_v9 = vrot.slane %v8163_v1, 4 }
 0x351   : > { %3229 = vst [vmem:[#allocation1 + $0x5] ss:$9 sm:$0xff] %v8089_v28  ;;  %v8193_v14 = vrot.slane %v8163_v1, 5  ;;  %v8197_v24 = vrot.slane %v8163_v1, 6 }
 0x352   : > { %3231 = vst [vmem:[#allocation1 + $0x6] ss:$9 sm:$0xff] %v8093_v43  ;;  %v2880_v33 = vpop.permute.xlu2 %2879  ;;  %3662 = vmatpush.bf16.msrb.mxu3 %v6265_v58 }
 0x353   : > { %3233 = vst [vmem:[#allocation1 + $0x7] ss:$9 sm:$0xff] %v8097_v49  ;;  %v2952_v63 = vpop.permute.xlu1 %2951 }
 0x354   : > { %9761 = vst [vmem:[#allocation6_spill] sm:$0xff] %v8184_v50 }
 0x355   : > { %v2882_v34 = vpop.permute.xlu0 %2881  ;;  %9762 = vst [vmem:[#allocation9_spill] sm:$0xff] %v8187_v9 }
 0x356   : > { %v2993_v17 = vsel %vm2963_vm2, %v7748_v61, %v2882_v34  ;;  %9763 = vst [vmem:[#allocation12_spill] sm:$0xff] %v8193_v14  ;;  %v8201_v34 = vrot.slane %v8163_v1, 7 }
 0x357   : > { %v8190_v45 = vsel %vm3004_vm4, %v2993_v17, %v2952_v63  ;;  %9764 = vst [vmem:[#allocation10_spill] sm:$0xff] %v8197_v24  ;;  %v2991_v63 = vsel %vm2963_vm2, %v7708_v25, %v2880_v33  ;;  %v6276_v33 = vld [vmem:[%s9584_s3 + $0x78] sm:$0xff] }
 0x358   : > { %9765 = vst [vmem:[#allocation11_spill] sm:$0xff] %v8201_v34  ;;  %v8205_v17 = vrot.slane %v8190_v45, 1  ;;  %4114 = vmatpush.bf16.msrb.mxu0 %v6276_v33 }
 0x35a   : > { %v3234_v18 = vld [vmem:[#allocation1] sm:$0xff]  ;;  %9766 = vst [vmem:[#allocation14_spill] sm:$0xff] %v8205_v17 }
 0x35b   : > { %3236 = vst [vmem:[#allocation1] ss:$9 sm:$0xff] %v8104_v30  ;;  %v2884_v25 = vpop.permute.xlu1 %2883 }
 0x35c   : > { %3238 = vst [vmem:[#allocation1 + $0x1] ss:$9 sm:$0xff] %v8107_v48 }
 0x35d   : > { %3240 = vst [vmem:[#allocation1 + $0x2] ss:$9 sm:$0xff] %v8112_v46  ;;  %6044 = vmatmul.msk.bf16.gmra.mxu3 %vm3382_vm13, %v3234_v18  ;;  %v8148_v18 = vrot.slane %v8116_v2, 5  ;;  %v2950_v61 = vpop.permute.xlu0 %2949 }
 0x35e   : > { %3241 = vst [vmem:[#allocation1 + $0x3] ss:$9 sm:$0xff] %v8121_v21  ;;  %v8212_v15 = vsel %vm3004_vm4, %v2991_v63, %v2950_v61  ;;  %v8225_v61 = vrot.slane %v8190_v45, 7  ;;  %v8228_v63 = vrot.slane %v8190_v45, 2 }
 0x35f   : > { %3242 = vst [vmem:[#allocation1 + $0x4] ss:$9 sm:$0xff] %v8116_v2 }
 0x360   : > { %3244 = vst [vmem:[#allocation1 + $0x5] ss:$9 sm:$0xff] %v8131_v51 }
 0x361   : > { %3246 = vst [vmem:[#allocation1 + $0x6] ss:$9 sm:$0xff] %v8135_v11 }
 0x362   : > { %3248 = vst [vmem:[#allocation1 + $0x7] ss:$9 sm:$0xff] %v8139_v42 }
 0x363   : > { %9767 = vst [vmem:[#allocation8_spill] sm:$0xff] %v8212_v15 }
 0x364   : > { %9768 = vst [vmem:[#allocation15_spill] sm:$0xff] %v8225_v61 }
 0x365   : > { %9769 = vst [vmem:[#allocation16_spill] sm:$0xff] %v8228_v63  ;;  %v2954_v58 = vpop.permute.xlu0 %2953 }
 0x369   : > { %v3249_v60 = vld [vmem:[#allocation1] sm:$0xff] }
 0x36a   : > { %3251 = vst [vmem:[#allocation1] ss:$9 sm:$0xff] %v8145_v52 }
 0x36b   : > { %3253 = vst [vmem:[#allocation1 + $0x1] ss:$9 sm:$0xff] %v8148_v18 }
 0x36c   : > { %3255 = vst [vmem:[#allocation1 + $0x2] ss:$9 sm:$0xff] %v8153_v40 }
 0x36d   : > { %3257 = vst [vmem:[#allocation1 + $0x3] ss:$9 sm:$0xff] %v8159_v6  ;;  %6045 = vmatmul.msk.bf16.gmra.mxu3 %vm3382_vm13, %v3249_v60 }
 0x36e   : > { %3258 = vst [vmem:[#allocation1 + $0x4] ss:$9 sm:$0xff] %v8168_v27 }
 0x36f   : > { %3259 = vst [vmem:[#allocation1 + $0x5] ss:$9 sm:$0xff] %v8163_v1 }
 0x370   : > { %3261 = vst [vmem:[#allocation1 + $0x6] ss:$9 sm:$0xff] %v8172_v53 }
 0x371   : > { %3263 = vst [vmem:[#allocation1 + $0x7] ss:$9 sm:$0xff] %v8176_v4 }
 0x378   : > { %v3264_v60 = vld [vmem:[#allocation1] sm:$0xff] }
 0x379   : > { %3266 = vst [vmem:[#allocation1] ss:$9 sm:$0xff] %v8184_v50 }
 0x37a   : > { %3268 = vst [vmem:[#allocation1 + $0x1] ss:$9 sm:$0xff] %v8187_v9  ;;  %v2995_v9 = vsel %vm2963_vm2, %v7758_v16, %v2884_v25 }
 0x37b   : > { %3270 = vst [vmem:[#allocation1 + $0x2] ss:$9 sm:$0xff] %v8193_v14  ;;  %v8239_v14 = vrot.slane %v8190_v45, 5  ;;  %v8251_v50 = vsel %vm3004_vm4, %v2995_v9, %v2954_v58 }
 0x37c   : > { %3272 = vst [vmem:[#allocation1 + $0x3] ss:$9 sm:$0xff] %v8197_v24  ;;  %v2886_v24 = vpop.permute.xlu2 %2885 }
 0x37d   : > { %3274 = vst [vmem:[#allocation1 + $0x4] ss:$9 sm:$0xff] %v8201_v34  ;;  %6046 = vmatmul.msk.bf16.gmra.mxu3 %vm3382_vm13, %v3264_v60  ;;  %v8231_v60 = vrot.slane %v8190_v45, 3  ;;  %v2997_v33 = vsel %vm2963_vm2, %v7797_v39, %v2886_v24  ;;  %v6264_v24 = vld [vmem:[%s9584_s3 + $0x18] sm:$0xff] }
 0x37e   : > { %3276 = vst [vmem:[#allocation1 + $0x6] ss:$9 sm:$0xff] %v8190_v45  ;;  %3663 = vmatpush.bf16.msrb.mxu3 %v6264_v24  ;;  %v2958_v24 = vpop.permute.xlu0 %2957 }
 0x37f   : > { %3278 = vst [vmem:[#allocation1 + $0x7] ss:$9 sm:$0xff] %v8205_v17  ;;  %v8235_v17 = vrot.slane %v8190_v45, 4 }
 0x380   : > { %3275 = vst [vmem:[#allocation1 + $0x5] ss:$9 sm:$0xff] %v8212_v15  ;;  %v2956_v15 = vpop.permute.xlu1 %2955 }
 0x381   : > { %9770 = vst [vmem:[#allocation13_spill] sm:$0xff] %v8231_v60 }
 0x382   : > { %9771 = vst [vmem:[#allocation17_spill] sm:$0xff] %v8235_v17 }
 0x383   : > { %9773 = vst [vmem:[#allocation19_spill] sm:$0xff] %v8251_v50 }
 0x384   : > { %v2888_v16 = vpop.permute.xlu2 %2887 }
 0x387   : > { %v3279_v34 = vld [vmem:[#allocation1] sm:$0xff] }
 0x388   : > { %3291 = vst [vmem:[#allocation1 + $0x5] ss:$9 sm:$0xff] %v8225_v61  ;;  %v8247_v61 = vrot.slane %v8190_v45, 6 }
 0x389   : > { %3281 = vst [vmem:[#allocation1] ss:$9 sm:$0xff] %v8228_v63  ;;  %v8255_v63 = vsel %vm3004_vm4, %v2997_v33, %v2956_v15 }
 0x38a   : > { %3283 = vst [vmem:[#allocation1 + $0x1] ss:$9 sm:$0xff] %v8231_v60  ;;  %v8265_v39 = vrot.slane %v8255_v63, 1  ;;  %v8268_v9 = vrot.slane %v8255_v63, 2  ;;  %v8271_v25 = vrot.slane %v8255_v63, 3  ;;  %v8279_v58 = vrot.slane %v8255_v63, 5 }
 0x38b   : > { %9772 = vst [vmem:[#allocation18_spill] sm:$0xff] %v8247_v61  ;;  %v8283_v33 = vrot.slane %v8255_v63, 6 }
 0x38c   : > { %3285 = vst [vmem:[#allocation1 + $0x2] ss:$9 sm:$0xff] %v8235_v17 }
 0x38d   : > { %3287 = vst [vmem:[#allocation1 + $0x3] ss:$9 sm:$0xff] %v8239_v14  ;;  %6047 = vmatmul.msk.bf16.gmra.mxu3 %vm3382_vm13, %v3279_v34  ;;  %v8275_v34 = vrot.slane %v8255_v63, 4 }
 0x38e   : > { %3289 = vst [vmem:[#allocation1 + $0x4] ss:$9 sm:$0xff] %v8247_v61  ;;  %v8287_v61 = vrot.slane %v8255_v63, 7 }
 0x38f   : > { %3292 = vst [vmem:[#allocation1 + $0x6] ss:$9 sm:$0xff] %v8251_v50  ;;  %v2890_v50 = vpop.permute.xlu1 %2889 }
 0x390   : > { %3293 = vst [vmem:[#allocation1 + $0x7] ss:$9 sm:$0xff] %v8255_v63 }
 0x391   : > { %9774 = vst [vmem:[#allocation20_spill] sm:$0xff] %v8265_v39 }
 0x392   : > { %9775 = vst [vmem:[#allocation21_spill] sm:$0xff] %v8268_v9 }
 0x393   : > { %9776 = vst [vmem:[#allocation22_spill] sm:$0xff] %v8271_v25 }
 0x394   : > { %9777 = vst [vmem:[#allocation23_spill] sm:$0xff] %v8275_v34 }
 0x395   : > { %9778 = vst [vmem:[#allocation24_spill] sm:$0xff] %v8279_v58 }
 0x396   : > { %9779 = vst [vmem:[#allocation25_spill] sm:$0xff] %v8283_v33 }
 0x397   : > { %v3294_v15 = vld [vmem:[#allocation1] sm:$0xff]  ;;  %9780 = vst [vmem:[#allocation26_spill] sm:$0xff] %v8287_v61 }
 0x398   : > { %3296 = vst [vmem:[#allocation1] ss:$9 sm:$0xff] %v8265_v39  ;;  %v2960_v39 = vpop.permute.xlu2 %2959 }
 0x399   : > { %3298 = vst [vmem:[#allocation1 + $0x1] ss:$9 sm:$0xff] %v8268_v9  ;;  %v2999_v9 = vsel %vm2963_vm2, %v7806_v5, %v2888_v16 }
 0x39a   : > { %3300 = vst [vmem:[#allocation1 + $0x2] ss:$9 sm:$0xff] %v8271_v25  ;;  %v8295_v25 = vsel %vm3004_vm4, %v2999_v9, %v2958_v24 }
 0x39b   : > { %3302 = vst [vmem:[#allocation1 + $0x3] ss:$9 sm:$0xff] %v8275_v34  ;;  %v3001_v34 = vsel %vm2963_vm2, %v7844_v54, %v2890_v50 }
 0x39c   : > { %3304 = vst [vmem:[#allocation1 + $0x4] ss:$9 sm:$0xff] %v8279_v58  ;;  %v8302_v58 = vsel %vm3004_vm4, %v3001_v34, %v2960_v39  ;;  %v3069_v34 = vpop.permute.xlu0 %3068 }
 0x39d   : > { %3306 = vst [vmem:[#allocation1 + $0x5] ss:$9 sm:$0xff] %v8283_v33  ;;  %6048 = vmatmul.msk.bf16.gmra.mxu3 %vm3382_vm13, %v3294_v15  ;;  %v8305_v5 = vrot.slane %v8302_v58, 1  ;;  %v8308_v16 = vrot.slane %v8302_v58, 2  ;;  %v8311_v9 = vrot.slane %v8302_v58, 3  ;;  %v8314_v54 = vrot.slane %v8302_v58, 4 }
 0x39e   : > { %3308 = vst [vmem:[#allocation1 + $0x6] ss:$9 sm:$0xff] %v8287_v61  ;;  %v8318_v50 = vrot.slane %v8302_v58, 5  ;;  %v8322_v39 = vrot.slane %v8302_v58, 6  ;;  %v8326_v15 = vrot.slane %v8302_v58, 7  ;;  %v3080_v24 = vsel %vm2963_vm2, %v7889_v38, %v3069_v34 }
 0x39f   : > { %9781 = vst [vmem:[#allocation27_spill] sm:$0xff] %v8295_v25 }
 0x3a0   : > { %3309 = vst [vmem:[#allocation1 + $0x7] ss:$9 sm:$0xff] %v8295_v25  ;;  %v2892_v34 = vpop.permute.xlu2 %2891 }
 0x3a1   : > { %9782 = vst [vmem:[#allocation28_spill] sm:$0xff] %v8302_v58 }
 0x3a2   : > { %9783 = vst [vmem:[#allocation29_spill] sm:$0xff] %v8305_v5 }
 0x3a3   : > { %9784 = vst [vmem:[#allocation30_spill] sm:$0xff] %v8308_v16 }
 0x3a4   : > { %9785 = vst [vmem:[#allocation31_spill] sm:$0xff] %v8311_v9 }
 0x3a5   : > { %9786 = vst [vmem:[#allocation32_spill] sm:$0xff] %v8314_v54 }
 0x3a6   : > { %9787 = vst [vmem:[#allocation33_spill] sm:$0xff] %v8318_v50 }
 0x3a7   : > { %v3310_v61 = vld [vmem:[#allocation1] sm:$0xff]  ;;  %9788 = vst [vmem:[#allocation34_spill] sm:$0xff] %v8322_v39 }
 0x3a8   : > { %3311 = vst [vmem:[#allocation1] ss:$9 sm:$0xff] %v8302_v58 }
 0x3a9   : > { %3313 = vst [vmem:[#allocation1 + $0x1] ss:$9 sm:$0xff] %v8305_v5  ;;  %v6275_v5 = vld [vmem:[%s9584_s3 + $0x70] sm:$0xff] }
 0x3aa   : > { %3315 = vst [vmem:[#allocation1 + $0x2] ss:$9 sm:$0xff] %v8308_v16  ;;  %v3076_v16 = vpop.permute.xlu1 %3075  ;;  %4115 = vmatpush.bf16.msrb.mxu0 %v6275_v5 }
 0x3ab   : > { %9789 = vst [vmem:[#allocation35_spill] sm:$0xff] %v8326_v15 }
 0x3ac   : > { %3317 = vst [vmem:[#allocation1 + $0x3] ss:$9 sm:$0xff] %v8311_v9  ;;  %v8340_v9 = vsel %vm3004_vm4, %v3080_v24, %v3076_v16  ;;  %v3003_v16 = vsel %vm2963_vm2, %v7853_v3, %v2892_v34 }
 0x3ad   : > { %3319 = vst [vmem:[#allocation1 + $0x4] ss:$9 sm:$0xff] %v8314_v54  ;;  %6049 = vmatmul.msk.bf16.gmra.mxu3 %vm3382_vm13, %v3310_v61  ;;  %v9680_v38 = vrot.slane %v8340_v9, 3  ;;  %v9679_v58 = vrot.slane %v8340_v9, 4  ;;  %v2962_v61 = vpop.permute.xlu0 %2961  ;;  %v9681_v5 = vrot.slane %v8340_v9, 6  ;;  %v9686_v34 = vrot.slane %v8340_v9, 7 }
 0x3ae   : > { %3321 = vst [vmem:[#allocation1 + $0x5] ss:$9 sm:$0xff] %v8318_v50  ;;  %v9683_v50 = vrot.slane %v8340_v9, 1  ;;  %v8360_v24 = vsel %vm3004_vm4, %v3003_v16, %v2962_v61 }
 0x3af   : > { %3323 = vst [vmem:[#allocation1 + $0x6] ss:$9 sm:$0xff] %v8322_v39  ;;  %v9678_v39 = vrot.slane %v8340_v9, 2 }
 0x3b0   : > { %3325 = vst [vmem:[#allocation1 + $0x7] ss:$9 sm:$0xff] %v8326_v15  ;;  %v9682_v15 = vrot.slane %v8340_v9, 5 }
 0x3b1   : > { %9790 = vst [vmem:[#allocation36_spill] sm:$0xff] %v8340_v9 }
 0x3b2   : > { %9791 = vst [vmem:[#allocation37_spill] sm:$0xff] %v8360_v24 }
 0x3b5   : > { %v2854_v61 = vpop.permute.xlu0 %2853 }
 0x3b7   : > { %v3326_v54 = vld [vmem:[#allocation1] sm:$0xff] }
 0x3b8   : > { %3328 = vst [vmem:[#allocation1 + $0x1] ss:$9 sm:$0xff] %v8340_v9 }
 0x3b9   : > { %3330 = vst [vmem:[#allocation1 + $0x2] ss:$9 sm:$0xff] %v9683_v50 }
 0x3ba   : > { %3332 = vst [vmem:[#allocation1 + $0x3] ss:$9 sm:$0xff] %v9678_v39  ;;  %v3071_v39 = vpop.permute.xlu1 %3070 }
 0x3bb   : > { %3334 = vst [vmem:[#allocation1 + $0x4] ss:$9 sm:$0xff] %v9680_v38  ;;  %v3082_v3 = vsel %vm2963_vm2, %v7911_v7, %v3071_v39 }
 0x3bc   : > { %3336 = vst [vmem:[#allocation1 + $0x5] ss:$9 sm:$0xff] %v9679_v58  ;;  %v3078_v58 = vpop.permute.xlu2 %3077 }
 0x3bd   : > { %3338 = vst [vmem:[#allocation1 + $0x6] ss:$9 sm:$0xff] %v9682_v15  ;;  %6050 = vmatmul.msk.bf16.gmra.mxu3 %vm3382_vm13, %v3326_v54  ;;  %v8372_v16 = vsel %vm3004_vm4, %v3082_v3, %v3078_v58 }
 0x3be   : > { %3340 = vst [vmem:[#allocation1 + $0x7] ss:$9 sm:$0xff] %v9681_v5  ;;  %v2965_v5 = vsel %vm2963_vm2, %v7947_v10, %v2854_v61 }
 0x3bf   : > { %3327 = vst [vmem:[#allocation1] ss:$9 sm:$0xff] %v8360_v24 }
 0x3c0   : > { %9792 = vst [vmem:[#allocation38_spill] sm:$0xff] %v8372_v16 }
 0x3c2   : > { %v2924_v54 = vpop.permute.xlu1 %2923 }
 0x3c3   : > { %v3006_v15 = vsel %vm3004_vm4, %v2965_v5, %v2924_v54  ;;  %v9793_v5 = vrot.slane %v7898_v22, 1  ;;  %v9794_v54 = vrot.slane %v7898_v22, 2 }
 0x3c4   : > { %v3476_v39 = vrot.slane %v3006_v15, 1  ;;  %v3477_v50 = vrot.slane %v3006_v15, 2  ;;  %v3478_v24 = vrot.slane %v3006_v15, 3  ;;  %v3479_v58 = vrot.slane %v3006_v15, 4  ;;  %v2856_v61 = vpop.permute.xlu2 %2855 }
 0x3c5   : > { %v3480_v3 = vrot.slane %v3006_v15, 5 }
 0x3c6   : > { %v3341_v38 = vld [vmem:[#allocation1] sm:$0xff] }
 0x3c7   : > { %3343 = vst [vmem:[#allocation1] ss:$9 sm:$0xff] %v9686_v34  ;;  %v3481_v34 = vrot.slane %v3006_v15, 6 }
 0x3c8   : > { %3344 = vst [vmem:[#allocation1 + $0x1] ss:$9 sm:$0xff] %v8372_v16  ;;  %v3482_v16 = vrot.slane %v3006_v15, 7 }
 0x3cd   : > { %6051 = vmatmul.msk.bf16.gmra.mxu3 %vm3382_vm13, %v3341_v38  ;;  %v2926_v38 = vpop.permute.xlu0 %2925 }
 0x3cf   : > { %v3345_v7 = vld [vmem:[#allocation1] sm:$0xff] }
 0x3d0   : > { %3483 = vst [vmem:[#allocation1] ss:$9 sm:$0xff] %v3006_v15  ;;  %v9796_v15 = vrot.slane %v7898_v22, 4 }
 0x3d1   : > { %3486 = vst [vmem:[#allocation1 + $0x1] ss:$9 sm:$0xff] %v3476_v39 }
 0x3d2   : > { %3489 = vst [vmem:[#allocation1 + $0x2] ss:$9 sm:$0xff] %v3477_v50  ;;  %v9795_v50 = vrot.slane %v7898_v22, 3 }
 0x3d3   : > { %3492 = vst [vmem:[#allocation1 + $0x3] ss:$9 sm:$0xff] %v3478_v24  ;;  %v2967_v24 = vsel %vm2963_vm2, %v7900_v20, %v2856_v61 }
 0x3d4   : > { %3495 = vst [vmem:[#allocation1 + $0x4] ss:$9 sm:$0xff] %v3479_v58  ;;  %v3008_v39 = vsel %vm3004_vm4, %v2967_v24, %v2926_v38  ;;  %v6274_v38 = vld [vmem:[%s9584_s3 + $0x68] sm:$0xff]  ;;  %v6273_v24 = vld [vmem:[%s9584_s3 + $0x60] sm:$0xff] }
 0x3d5   : > { %3498 = vst [vmem:[#allocation1 + $0x5] ss:$9 sm:$0xff] %v3480_v3  ;;  %v9800_v3 = vrot.slane %v7898_v22, 7  ;;  %4116 = vmatpush.bf16.msrb.mxu0 %v6274_v38 }
 0x3d6   : > { %3501 = vst [vmem:[#allocation1 + $0x6] ss:$9 sm:$0xff] %v3481_v34  ;;  %v9797_v34 = vrot.slane %v7898_v22, 5 }
 0x3d7   : > { %3504 = vst [vmem:[#allocation1 + $0x7] ss:$9 sm:$0xff] %v3482_v16  ;;  %v9798_v16 = vrot.slane %v7898_v22, 6 }
 0x3d9   : > { %4117 = vmatpush.bf16.msrb.mxu0 %v6273_v24  ;;  %v9810_v24 = vld [vmem:[#allocation9_spill] sm:$0xff] }
 0x3dd   : > { %6052 = vmatmul.msk.bf16.gmra.mxu3 %vm3382_vm13, %v3345_v7  ;;  %v8398_v7 = vpop.f32.mrf.mxu3 }
 0x3de   : > { %v3505_v10 = vld [vmem:[#allocation1] sm:$0xff]  ;;  %9799 = vst [vmem:[#allocation39_spill] sm:$0xff] %v8398_v7 }
 0x3df   : > { %3507 = vst [vmem:[#allocation1 + $0x1] ss:$9 sm:$0xff] %v7898_v22  ;;  %v9819_v7 = vld [vmem:[#allocation18_spill] sm:$0xff] }
 0x3e0   : > { %3508 = vst [vmem:[#allocation1 + $0x2] ss:$9 sm:$0xff] %v9793_v5 }
 0x3e1   : > { %3509 = vst [vmem:[#allocation1 + $0x3] ss:$9 sm:$0xff] %v9794_v54  ;;  %v6263_v54 = vld [vmem:[%s9584_s3 + $0x10] sm:$0xff] }
 0x3e2   : > { %3510 = vst [vmem:[#allocation1 + $0x4] ss:$9 sm:$0xff] %v9795_v50  ;;  %3664 = vmatpush.bf16.msrb.mxu3 %v6263_v54 }
 0x3e3   : > { %3511 = vst [vmem:[#allocation1 + $0x5] ss:$9 sm:$0xff] %v9796_v15  ;;  %v6262_v15 = vld [vmem:[%s9584_s3 + $0x8] sm:$0xff] }
 0x3e4   : > { %3512 = vst [vmem:[#allocation1 + $0x6] ss:$9 sm:$0xff] %v9797_v34  ;;  %v6261_v34 = vld [vmem:[%s9584_s3] sm:$0xff] }
 0x3e5   : > { %3513 = vst [vmem:[#allocation1 + $0x7] ss:$9 sm:$0xff] %v9798_v16  ;;  %v8406_v20 = vpop.f32.mrf.mxu3 }
 0x3e6   : > { %3506 = vst [vmem:[#allocation1] ss:$9 sm:$0xff] %v3008_v39  ;;  %3665 = vmatpush.bf16.msrb.mxu3 %v6262_v15 }
 0x3e7   : > { %9801 = vst [vmem:[#allocation40_spill] sm:$0xff] %v8406_v20  ;;  %v9820_v20 = vld [vmem:[#allocation15_spill] sm:$0xff] }
 0x3ea   : > { %3666 = vmatpush.bf16.msrb.mxu3 %v6261_v34  ;;  %v9811_v34 = vld [vmem:[#allocation12_spill] sm:$0xff] }
 0x3ed   : > { %v3514_v58 = vld [vmem:[#allocation1] sm:$0xff]  ;;  %v8411_v61 = vpop.f32.mrf.mxu3  ;;  %6077 = vmatmul.msk.bf16.vlgmr.msrb.gmra.mxu3 %vm3382_vm13, %v3505_v10 }
 0x3ee   : > { %3515 = vst [vmem:[#allocation1] ss:$9 sm:$0xff] %v9800_v3 }
 0x3ef   : > { %3516 = vst [vmem:[#allocation1 + $0x1] ss:$9 sm:$0xff] %v7976_v56 }
 0x3f0   : > { %3517 = vst [vmem:[#allocation1 + $0x2] ss:$9 sm:$0xff] %v7969_v19 }
 0x3f1   : > { %3518 = vst [vmem:[#allocation1 + $0x3] ss:$9 sm:$0xff] %v7979_v59 }
 0x3f2   : > { %3519 = vst [vmem:[#allocation1 + $0x4] ss:$9 sm:$0xff] %v7988_v23 }
 0x3f3   : > { %3520 = vst [vmem:[#allocation1 + $0x5] ss:$9 sm:$0xff] %v7992_v36 }
 0x3f4   : > { %3521 = vst [vmem:[#allocation1 + $0x6] ss:$9 sm:$0xff] %v7997_v35 }
 0x3f5   : > { %3522 = vst [vmem:[#allocation1 + $0x7] ss:$9 sm:$0xff] %v8002_v37  ;;  %v8421_v22 = vpop.f32.mrf.mxu3 }
 0x3f6   : > { %9802 = vst [vmem:[#allocation41_spill] sm:$0xff] %v8411_v61  ;;  %v9817_v61 = vld [vmem:[#allocation16_spill] sm:$0xff] }
 0x3f7   : > { %9803 = vst [vmem:[#allocation42_spill] sm:$0xff] %v8421_v22  ;;  %v9816_v22 = vld [vmem:[#allocation14_spill] sm:$0xff] }
 0x3fc   : > { %v3523_v5 = vld [vmem:[#allocation1] sm:$0xff] }
 0x3fd   : > { %3524 = vst [vmem:[#allocation1] ss:$9 sm:$0xff] %v8009_v55  ;;  %v8431_v50 = vpop.f32.mrf.mxu3  ;;  %6078 = vmatmul.msk.bf16.gmra.mxu3 %vm3382_vm13, %v3514_v58  ;;  %v9809_v58 = vld [vmem:[#allocation6_spill] sm:$0xff] }
 0x3fe   : > { %3525 = vst [vmem:[#allocation1 + $0x1] ss:$9 sm:$0xff] %v8025_v13 }
 0x3ff   : > { %3526 = vst [vmem:[#allocation1 + $0x2] ss:$9 sm:$0xff] %v8033_v47 }
 0x400   : > { %3527 = vst [vmem:[#allocation1 + $0x3] ss:$9 sm:$0xff] %v8028_v41 }
 0x401   : > { %3528 = vst [vmem:[#allocation1 + $0x4] ss:$9 sm:$0xff] %v8037_v57 }
 0x402   : > { %3529 = vst [vmem:[#allocation1 + $0x5] ss:$9 sm:$0xff] %v8045_v0 }
 0x403   : > { %3530 = vst [vmem:[#allocation1 + $0x6] ss:$9 sm:$0xff] %v8050_v32 }
 0x404   : > { %3531 = vst [vmem:[#allocation1 + $0x7] ss:$9 sm:$0xff] %v8054_v12 }
 0x405   : > { %9804 = vst [vmem:[#allocation43_spill] sm:$0xff] %v8431_v50  ;;  %v8448_v39 = vpop.f32.mrf.mxu3 }
 0x406   : > { %9805 = vst [vmem:[#allocation44_spill] sm:$0xff] %v8448_v39  ;;  %v9814_v39 = vld [vmem:[#allocation8_spill] sm:$0xff] }
 0x40b   : > { %v3532_v56 = vld [vmem:[#allocation1] sm:$0xff] }
 0x40c   : > { %3533 = vst [vmem:[#allocation1] ss:$9 sm:$0xff] %v8058_v62 }
 0x40d   : > { %3534 = vst [vmem:[#allocation1 + $0x1] ss:$9 sm:$0xff] %v8066_v31  ;;  %v8459_v3 = vpop.f32.mrf.mxu3  ;;  %6079 = vmatmul.msk.bf16.gmra.mxu3 %vm3382_vm13, %v3523_v5 }
 0x40e   : > { %3535 = vst [vmem:[#allocation1 + $0x2] ss:$9 sm:$0xff] %v8070_v8 }
 0x40f   : > { %3536 = vst [vmem:[#allocation1 + $0x3] ss:$9 sm:$0xff] %v8080_v29 }
 0x410   : > { %3537 = vst [vmem:[#allocation1 + $0x4] ss:$9 sm:$0xff] %v8073_v44 }
 0x411   : > { %3538 = vst [vmem:[#allocation1 + $0x5] ss:$9 sm:$0xff] %v8084_v26 }
 0x412   : > { %3539 = vst [vmem:[#allocation1 + $0x6] ss:$9 sm:$0xff] %v8089_v28 }
 0x413   : > { %3540 = vst [vmem:[#allocation1 + $0x7] ss:$9 sm:$0xff] %v8093_v43 }
 0x414   : > { %9806 = vst [vmem:[#allocation45_spill] sm:$0xff] %v8459_v3  ;;  %v9813_v3 = vld [vmem:[#allocation11_spill] sm:$0xff] }
 0x415   : > { %v8467_v10 = vpop.f32.mrf.mxu3 }
 0x416   : > { %9807 = vst [vmem:[#allocation46_spill] sm:$0xff] %v8467_v10  ;;  %v9812_v10 = vld [vmem:[#allocation10_spill] sm:$0xff] }
 0x41a   : > { %v3541_v16 = vld [vmem:[#allocation1] sm:$0xff] }
 0x41b   : > { %3542 = vst [vmem:[#allocation1] ss:$9 sm:$0xff] %v8097_v49 }
 0x41c   : > { %3543 = vst [vmem:[#allocation1 + $0x1] ss:$9 sm:$0xff] %v8104_v30 }
 0x41d   : > { %3544 = vst [vmem:[#allocation1 + $0x2] ss:$9 sm:$0xff] %v8107_v48  ;;  %v8472_v38 = vpop.f32.mrf.mxu3  ;;  %6080 = vmatmul.msk.bf16.gmra.mxu3 %vm3382_vm13, %v3532_v56  ;;  %v9825_v56 = vld [vmem:[#allocation22_spill] sm:$0xff] }
 0x41e   : > { %3545 = vst [vmem:[#allocation1 + $0x3] ss:$9 sm:$0xff] %v8112_v46 }
 0x41f   : > { %3546 = vst [vmem:[#allocation1 + $0x4] ss:$9 sm:$0xff] %v8121_v21 }
 0x420   : > { %3547 = vst [vmem:[#allocation1 + $0x5] ss:$9 sm:$0xff] %v8116_v2 }
 0x421   : > { %3548 = vst [vmem:[#allocation1 + $0x6] ss:$9 sm:$0xff] %v8131_v51 }
 0x422   : > { %3549 = vst [vmem:[#allocation1 + $0x7] ss:$9 sm:$0xff] %v8135_v11 }
 0x423   : > { %9808 = vst [vmem:[#allocation47_spill] sm:$0xff] %v8472_v38 }
 0x425   : > { %v8483_v38 = vpop.f32.mrf.mxu3 }
 0x426   : > { %9815 = vst [vmem:[#allocation6_spill] sm:$0xff] %v8483_v38  ;;  %v9821_v38 = vld [vmem:[#allocation19_spill] sm:$0xff] }
 0x429   : > { %v3550_v54 = vld [vmem:[#allocation1] sm:$0xff] }
 0x42a   : > { %3551 = vst [vmem:[#allocation1] ss:$9 sm:$0xff] %v8139_v42 }
 0x42b   : > { %3552 = vst [vmem:[#allocation1 + $0x1] ss:$9 sm:$0xff] %v8145_v52 }
 0x42c   : > { %3553 = vst [vmem:[#allocation1 + $0x2] ss:$9 sm:$0xff] %v8148_v18 }
 0x42d   : > { %3554 = vst [vmem:[#allocation1 + $0x3] ss:$9 sm:$0xff] %v8153_v40  ;;  %v8490_v5 = vpop.f32.mrf.mxu3  ;;  %6081 = vmatmul.msk.bf16.gmra.mxu3 %vm3382_vm13, %v3541_v16  ;;  %v9834_v16 = vld [vmem:[#allocation31_spill] sm:$0xff] }
 0x42e   : > { %3555 = vst [vmem:[#allocation1 + $0x4] ss:$9 sm:$0xff] %v8159_v6 }
 0x42f   : > { %3556 = vst [vmem:[#allocation1 + $0x5] ss:$9 sm:$0xff] %v8168_v27 }
 0x430   : > { %3557 = vst [vmem:[#allocation1 + $0x6] ss:$9 sm:$0xff] %v8163_v1 }
 0x431   : > { %3558 = vst [vmem:[#allocation1 + $0x7] ss:$9 sm:$0xff] %v8172_v53 }
 0x432   : > { %9818 = vst [vmem:[#allocation9_spill] sm:$0xff] %v8490_v5  ;;  %v9826_v5 = vld [vmem:[#allocation23_spill] sm:$0xff] }
 0x435   : > { %v8496_v9 = vpop.f32.mrf.mxu3 }
 0x436   : > { %9822 = vst [vmem:[#allocation12_spill] sm:$0xff] %v8496_v9 }
 0x438   : > { %v3559_v15 = vld [vmem:[#allocation1] sm:$0xff] }
 0x439   : > { %3560 = vst [vmem:[#allocation1] ss:$9 sm:$0xff] %v8176_v4 }
 0x43a   : > { %3561 = vst [vmem:[#allocation1 + $0x1] ss:$9 sm:$0xff] %v9809_v58 }
 0x43b   : > { %3562 = vst [vmem:[#allocation1 + $0x2] ss:$9 sm:$0xff] %v9810_v24 }
 0x43c   : > { %3563 = vst [vmem:[#allocation1 + $0x3] ss:$9 sm:$0xff] %v9811_v34 }
 0x43d   : > { %3564 = vst [vmem:[#allocation1 + $0x4] ss:$9 sm:$0xff] %v9812_v10  ;;  %v8507_v9 = vpop.f32.mrf.mxu3  ;;  %6082 = vmatmul.msk.bf16.gmra.mxu3 %vm3382_vm13, %v3550_v54 }
 0x43e   : > { %3565 = vst [vmem:[#allocation1 + $0x5] ss:$9 sm:$0xff] %v9813_v3 }
 0x43f   : > { %3566 = vst [vmem:[#allocation1 + $0x6] ss:$9 sm:$0xff] %v9814_v39 }
 0x440   : > { %3567 = vst [vmem:[#allocation1 + $0x7] ss:$9 sm:$0xff] %v8190_v45 }
 0x441   : > { %9829 = vst [vmem:[#allocation10_spill] sm:$0xff] %v8507_v9  ;;  %v9837_v9 = vld [vmem:[#allocation34_spill] sm:$0xff] }
 0x447   : > { %v3568_v50 = vld [vmem:[#allocation1] sm:$0xff] }
 0x448   : > { %3569 = vst [vmem:[#allocation1] ss:$9 sm:$0xff] %v9816_v22 }
 0x449   : > { %3570 = vst [vmem:[#allocation1 + $0x1] ss:$9 sm:$0xff] %v9817_v61 }
 0x44a   : > { %3571 = vst [vmem:[#allocation1 + $0x2] ss:$9 sm:$0xff] %v8231_v60  ;;  %v9823_v60 = vld [vmem:[#allocation20_spill] sm:$0xff] }
 0x44b   : > { %3572 = vst [vmem:[#allocation1 + $0x3] ss:$9 sm:$0xff] %v8235_v17  ;;  %v9824_v17 = vld [vmem:[#allocation21_spill] sm:$0xff] }
 0x44c   : > { %3573 = vst [vmem:[#allocation1 + $0x4] ss:$9 sm:$0xff] %v8239_v14 }
 0x44d   : > { %3574 = vst [vmem:[#allocation1 + $0x5] ss:$9 sm:$0xff] %v9819_v7  ;;  %v9827_v7 = vld [vmem:[#allocation24_spill] sm:$0xff] }
 0x44e   : > { %3575 = vst [vmem:[#allocation1 + $0x6] ss:$9 sm:$0xff] %v9820_v20 }
 0x44f   : > { %3576 = vst [vmem:[#allocation1 + $0x7] ss:$9 sm:$0xff] %v9821_v38  ;;  %v9828_v38 = vld [vmem:[#allocation26_spill] sm:$0xff] }
 0x456   : > { %v3577_v22 = vld [vmem:[#allocation1] sm:$0xff] }
 0x457   : > { %3578 = vst [vmem:[#allocation1] ss:$9 sm:$0xff] %v8255_v63 }
 0x458   : > { %3579 = vst [vmem:[#allocation1 + $0x1] ss:$9 sm:$0xff] %v9823_v60  ;;  %v9830_v60 = vld [vmem:[#allocation28_spill] sm:$0xff] }
 0x459   : > { %3580 = vst [vmem:[#allocation1 + $0x2] ss:$9 sm:$0xff] %v9824_v17  ;;  %v9831_v17 = vld [vmem:[#allocation29_spill] sm:$0xff] }
 0x45a   : > { %3581 = vst [vmem:[#allocation1 + $0x3] ss:$9 sm:$0xff] %v9825_v56  ;;  %v9832_v56 = vld [vmem:[#allocation30_spill] sm:$0xff] }
 0x45b   : > { %3582 = vst [vmem:[#allocation1 + $0x4] ss:$9 sm:$0xff] %v9826_v5  ;;  %v8513_v5 = vpop.f32.mrf.mxu3  ;;  %6083 = vmatmul.msk.bf16.gmra.mxu3 %vm3382_vm13, %v3559_v15 }
 0x45c   : > { %3583 = vst [vmem:[#allocation1 + $0x5] ss:$9 sm:$0xff] %v9827_v7  ;;  %v9835_v7 = vld [vmem:[#allocation32_spill] sm:$0xff] }
 0x45d   : > { %3584 = vst [vmem:[#allocation1 + $0x6] ss:$9 sm:$0xff] %v8283_v33 }
 0x45e   : > { %3585 = vst [vmem:[#allocation1 + $0x7] ss:$9 sm:$0xff] %v9828_v38  ;;  %v9836_v38 = vld [vmem:[#allocation33_spill] sm:$0xff] }
 0x45f   : > { %9833 = vst [vmem:[#allocation11_spill] sm:$0xff] %v8513_v5 }
 0x465   : > { %v3586_v20 = vld [vmem:[#allocation1] sm:$0xff] }
 0x466   : > { %3587 = vst [vmem:[#allocation1] ss:$9 sm:$0xff] %v8295_v25  ;;  %v8520_v25 = vpop.f32.mrf.mxu3 }
 0x467   : > { %3588 = vst [vmem:[#allocation1 + $0x1] ss:$9 sm:$0xff] %v9830_v60  ;;  %v9838_v60 = vld [vmem:[#allocation35_spill] sm:$0xff] }
 0x468   : > { %3589 = vst [vmem:[#allocation1 + $0x2] ss:$9 sm:$0xff] %v9831_v17  ;;  %v9839_v17 = vld [vmem:[#allocation37_spill] sm:$0xff] }
 0x469   : > { %3590 = vst [vmem:[#allocation1 + $0x3] ss:$9 sm:$0xff] %v9832_v56 }
 0x46a   : > { %3591 = vst [vmem:[#allocation1 + $0x4] ss:$9 sm:$0xff] %v9834_v16 }
 0x46b   : > { %3592 = vst [vmem:[#allocation1 + $0x5] ss:$9 sm:$0xff] %v9835_v7 }
 0x46c   : > { %3593 = vst [vmem:[#allocation1 + $0x6] ss:$9 sm:$0xff] %v9836_v38 }
 0x46d   : > { %3594 = vst [vmem:[#allocation1 + $0x7] ss:$9 sm:$0xff] %v9837_v9 }
 0x46e   : > { %v8525_v5 = vpop.f32.mrf.mxu3  ;;  %6084 = vmatmul.msk.bf16.gmra.mxu3 %vm3382_vm13, %v3568_v50 }
 0x474   : > { %v3595_v33 = vld [vmem:[#allocation1] sm:$0xff] }
 0x475   : > { %3596 = vst [vmem:[#allocation1] ss:$9 sm:$0xff] %v9838_v60 }
 0x476   : > { %3597 = vst [vmem:[#allocation1 + $0x1] ss:$9 sm:$0xff] %v9839_v17  ;;  %v8536_v54 = vpop.f32.mrf.mxu3 }
 0x47d   : > { %v8527_v16 = vld [vmem:[#allocation1] sm:$0xff] }
 0x47e   : > { %3934 = vst [vmem:[#allocation1] ss:$9 sm:$0xff] %v7969_v19  ;;  %v8540_v19 = vpop.f32.mrf.mxu3  ;;  %6085 = vmatmul.msk.bf16.gmra.mxu3 %vm3382_vm13, %v3577_v22  ;;  %v3908_v22 = vpop.permute.xlu1 %3907 }
 0x47f   : > { %3936 = vst [vmem:[#allocation1 + $0x1] ss:$9 sm:$0xff] %v7979_v59 }
 0x480   : > { %3938 = vst [vmem:[#allocation1 + $0x2] ss:$9 sm:$0xff] %v7988_v23 }
 0x481   : > { %3940 = vst [vmem:[#allocation1 + $0x3] ss:$9 sm:$0xff] %v7992_v36 }
 0x482   : > { %3942 = vst [vmem:[#allocation1 + $0x4] ss:$9 sm:$0xff] %v7997_v35 }
 0x483   : > { %3944 = vst [vmem:[#allocation1 + $0x5] ss:$9 sm:$0xff] %v8002_v37 }
 0x484   : > { %3946 = vst [vmem:[#allocation1 + $0x6] ss:$9 sm:$0xff] %v8009_v55 }
 0x485   : > { %3948 = vst [vmem:[#allocation1 + $0x7] ss:$9 sm:$0xff] %v8025_v13 }
 0x486   : > { %v8551_v59 = vpop.f32.mrf.mxu3 }
 0x48c   : > { %v3949_v15 = vld [vmem:[#allocation1] sm:$0xff] }
 0x48d   : > { %6117 = vmatmul.msk.bf16.vlgmr.msrb.gmra.mxu0 %vm3382_vm13, %v3949_v15  ;;  %3950 = vst [vmem:[#allocation1] ss:$9 sm:$0xff] %v8033_v47  ;;  %v9865_v15 = vld [vmem:[#allocation40_spill] sm:$0xff] }
 0x48e   : > { %3951 = vst [vmem:[#allocation1 + $0x1] ss:$9 sm:$0xff] %v8028_v41  ;;  %v8555_v36 = vpop.f32.mrf.mxu3  ;;  %6086 = vmatmul.msk.bf16.gmra.mxu3 %vm3382_vm13, %v3586_v20 }
 0x48f   : > { %3952 = vst [vmem:[#allocation1 + $0x2] ss:$9 sm:$0xff] %v8037_v57 }
 0x490   : > { %3953 = vst [vmem:[#allocation1 + $0x3] ss:$9 sm:$0xff] %v8045_v0 }
 0x491   : > { %3954 = vst [vmem:[#allocation1 + $0x4] ss:$9 sm:$0xff] %v8050_v32 }
 0x492   : > { %3955 = vst [vmem:[#allocation1 + $0x5] ss:$9 sm:$0xff] %v8054_v12 }
 0x493   : > { %3956 = vst [vmem:[#allocation1 + $0x6] ss:$9 sm:$0xff] %v8058_v62  ;;  %v9841_v62 = vld [vmem:[#allocation13_spill] sm:$0xff] }
 0x494   : > { %3957 = vst [vmem:[#allocation1 + $0x7] ss:$9 sm:$0xff] %v8066_v31  ;;  %v9842_v31 = vld [vmem:[#allocation17_spill] sm:$0xff] }
 0x496   : > { %v8565_v35 = vpop.f32.mrf.mxu3 }
 0x49b   : > { %v3958_v23 = vld [vmem:[#allocation1] sm:$0xff] }
 0x49c   : > { %3959 = vst [vmem:[#allocation1] ss:$9 sm:$0xff] %v8070_v8  ;;  %v9843_v8 = vld [vmem:[#allocation18_spill] sm:$0xff] }
 0x49d   : > { %6118 = vmatmul.msk.bf16.gmra.mxu0 %vm3382_vm13, %v3958_v23  ;;  %3960 = vst [vmem:[#allocation1 + $0x1] ss:$9 sm:$0xff] %v8080_v29 }
 0x49e   : > { %3961 = vst [vmem:[#allocation1 + $0x2] ss:$9 sm:$0xff] %v8073_v44  ;;  %v8570_v55 = vpop.f32.mrf.mxu3  ;;  %6087 = vmatmul.msk.bf16.gmra.mxu3 %vm3382_vm13, %v3595_v33  ;;  %v9844_v44 = vld [vmem:[#allocation15_spill] sm:$0xff] }
 0x49f   : > { %3962 = vst [vmem:[#allocation1 + $0x3] ss:$9 sm:$0xff] %v8084_v26  ;;  %v9846_v26 = vld [vmem:[#allocation20_spill] sm:$0xff] }
 0x4a0   : > { %3963 = vst [vmem:[#allocation1 + $0x4] ss:$9 sm:$0xff] %v8089_v28 }
 0x4a1   : > { %3964 = vst [vmem:[#allocation1 + $0x5] ss:$9 sm:$0xff] %v8093_v43 }
 0x4a2   : > { %3965 = vst [vmem:[#allocation1 + $0x6] ss:$9 sm:$0xff] %v8097_v49  ;;  %v9847_v49 = vld [vmem:[#allocation21_spill] sm:$0xff] }
 0x4a3   : > { %3966 = vst [vmem:[#allocation1 + $0x7] ss:$9 sm:$0xff] %v8104_v30  ;;  %v9849_v30 = vld [vmem:[#allocation23_spill] sm:$0xff] }
 0x4a6   : > { %v8579_v13 = vpop.f32.mrf.mxu3 }
 0x4aa   : > { %v3967_v37 = vld [vmem:[#allocation1] sm:$0xff] }
 0x4ab   : > { %3968 = vst [vmem:[#allocation1] ss:$9 sm:$0xff] %v8107_v48  ;;  %v9850_v48 = vld [vmem:[#allocation24_spill] sm:$0xff] }
 0x4ac   : > { %3969 = vst [vmem:[#allocation1 + $0x1] ss:$9 sm:$0xff] %v8112_v46  ;;  %v9851_v46 = vld [vmem:[#allocation25_spill] sm:$0xff] }
 0x4ad   : > { %6119 = vmatmul.msk.bf16.gmra.mxu0 %vm3382_vm13, %v3967_v37  ;;  %3970 = vst [vmem:[#allocation1 + $0x2] ss:$9 sm:$0xff] %v8121_v21  ;;  %v9866_v37 = vld [vmem:[#allocation38_spill] sm:$0xff] }
 0x4ae   : > { %3971 = vst [vmem:[#allocation1 + $0x3] ss:$9 sm:$0xff] %v8116_v2  ;;  %v3473_v47 = vpop.f32.mrf.mxu3  ;;  %6088 = vmatmul.msk.bf16.gmra.mxu3 %vm3382_vm13, %v8527_v16  ;;  %v9852_v2 = vld [vmem:[#allocation26_spill] sm:$0xff] }
 0x4af   : > { %3972 = vst [vmem:[#allocation1 + $0x4] ss:$9 sm:$0xff] %v8131_v51  ;;  %v9853_v51 = vld [vmem:[#allocation27_spill] sm:$0xff] }
 0x4b0   : > { %3973 = vst [vmem:[#allocation1 + $0x5] ss:$9 sm:$0xff] %v8135_v11  ;;  %v9854_v11 = vld [vmem:[#allocation28_spill] sm:$0xff] }
 0x4b1   : > { %3974 = vst [vmem:[#allocation1 + $0x6] ss:$9 sm:$0xff] %v8139_v42 }
 0x4b2   : > { %3975 = vst [vmem:[#allocation1 + $0x7] ss:$9 sm:$0xff] %v8145_v52 }
 0x4b6   : > { %v8591_v57 = vpop.f32.mrf.mxu3 }
 0x4b9   : > { %v3976_v41 = vld [vmem:[#allocation1] sm:$0xff] }
 0x4ba   : > { %3977 = vst [vmem:[#allocation1] ss:$9 sm:$0xff] %v8148_v18  ;;  %v9855_v18 = vld [vmem:[#allocation29_spill] sm:$0xff] }
 0x4bb   : > { %3978 = vst [vmem:[#allocation1 + $0x1] ss:$9 sm:$0xff] %v8153_v40  ;;  %v9856_v40 = vld [vmem:[#allocation31_spill] sm:$0xff] }
 0x4bc   : > { %3979 = vst [vmem:[#allocation1 + $0x2] ss:$9 sm:$0xff] %v8159_v6  ;;  %v9840_v6 = vld [vmem:[#allocation14_spill] sm:$0xff] }
 0x4bd   : > { %6120 = vmatmul.msk.bf16.gmra.mxu0 %vm3382_vm13, %v3976_v41  ;;  %3980 = vst [vmem:[#allocation1 + $0x3] ss:$9 sm:$0xff] %v8168_v27 }
 0x4be   : > { %3981 = vst [vmem:[#allocation1 + $0x4] ss:$9 sm:$0xff] %v8163_v1  ;;  %v8599_v1 = vpop.f32.mrf.mxu3 }
 0x4bf   : > { %3982 = vst [vmem:[#allocation1 + $0x5] ss:$9 sm:$0xff] %v8172_v53  ;;  %v3671_v23 = vadd.f32 %v8599_v1, %v9865_v15  ;;  %v8686_v1 = vld [vmem:[%s9585_s4] ss:$0 sm:$0xff] }
 0x4c0   : > { %3983 = vst [vmem:[#allocation1 + $0x6] ss:$9 sm:$0xff] %v8176_v4 }
 0x4c1   : > { %3984 = vst [vmem:[#allocation1 + $0x7] ss:$9 sm:$0xff] %v9809_v58  ;;  %v3915_v58 = vpop.permute.xlu2 %3914 }
 0x4c6   : > { %v8606_v32 = vpop.f32.mrf.mxu3 }
 0x4c8   : > { %v3985_v0 = vld [vmem:[#allocation1] sm:$0xff] }
 0x4c9   : > { %3986 = vst [vmem:[#allocation1] ss:$9 sm:$0xff] %v9810_v24 }
 0x4ca   : > { %3987 = vst [vmem:[#allocation1 + $0x1] ss:$9 sm:$0xff] %v9811_v34 }
 0x4cb   : > { %3988 = vst [vmem:[#allocation1 + $0x2] ss:$9 sm:$0xff] %v9812_v10 }
 0x4cc   : > { %3989 = vst [vmem:[#allocation1 + $0x3] ss:$9 sm:$0xff] %v9813_v3  ;;  %v6356_v3 = vld [vmem:[#allocation2 + $0x84] sm:$0xff] }
 0x4cd   : > { %6121 = vmatmul.msk.bf16.gmra.mxu0 %vm3382_vm13, %v3985_v0  ;;  %3990 = vst [vmem:[#allocation1 + $0x4] ss:$9 sm:$0xff] %v9814_v39  ;;  %v3919_v10 = vsel %vm2963_vm2, %v6356_v3, %v3908_v22  ;;  %v3917_v22 = vpop.permute.xlu1 %3916 }
 0x4ce   : > { %3991 = vst [vmem:[#allocation1 + $0x5] ss:$9 sm:$0xff] %v8190_v45  ;;  %v8613_v29 = vpop.f32.mrf.mxu3  ;;  %v9845_v45 = vld [vmem:[#allocation19_spill] sm:$0xff]  ;;  %v8672_v24 = vsel %vm3004_vm4, %v3919_v10, %v3915_v58 }
 0x4cf   : > { %3992 = vst [vmem:[#allocation1 + $0x6] ss:$9 sm:$0xff] %v9840_v6  ;;  %v3927_v16 = vrot.slane %v8672_v24, 1  ;;  %v3928_v41 = vrot.slane %v8672_v24, 2  ;;  %v3929_v47 = vrot.slane %v8672_v24, 3  ;;  %v3930_v6 = vrot.slane %v8672_v24, 4 }
 0x4d0   : > { %3993 = vst [vmem:[#allocation1 + $0x7] ss:$9 sm:$0xff] %v9817_v61  ;;  %v3933_v58 = vrot.slane %v8672_v24, 7 }
 0x4d6   : > { %v8619_v28 = vpop.f32.mrf.mxu3 }
 0x4d7   : > { %v3994_v12 = vld [vmem:[#allocation1] sm:$0xff] }
 0x4d8   : > { %3995 = vst [vmem:[#allocation1] ss:$9 sm:$0xff] %v9841_v62 }
 0x4d9   : > { %3996 = vst [vmem:[#allocation1 + $0x1] ss:$9 sm:$0xff] %v9842_v31  ;;  %v3753_v31 = vrot.slane %v3671_v23, 2 }
 0x4da   : > { %3997 = vst [vmem:[#allocation1 + $0x2] ss:$9 sm:$0xff] %v8239_v14  ;;  %v9848_v14 = vld [vmem:[#allocation22_spill] sm:$0xff] }
 0x4db   : > { %3998 = vst [vmem:[#allocation1 + $0x3] ss:$9 sm:$0xff] %v9843_v8 }
 0x4dc   : > { %3999 = vst [vmem:[#allocation1 + $0x4] ss:$9 sm:$0xff] %v9844_v44 }
 0x4dd   : > { %6122 = vmatmul.msk.bf16.gmra.mxu0 %vm3382_vm13, %v3994_v12  ;;  %4000 = vst [vmem:[#allocation1 + $0x5] ss:$9 sm:$0xff] %v9845_v45  ;;  %v3931_v12 = vrot.slane %v8672_v24, 5  ;;  %v3932_v45 = vrot.slane %v8672_v24, 6 }
 0x4de   : > { %4001 = vst [vmem:[#allocation1 + $0x6] ss:$9 sm:$0xff] %v8255_v63  ;;  %v8627_v21 = vpop.f32.mrf.mxu3  ;;  %v9857_v63 = vld [vmem:[#allocation36_spill] sm:$0xff] }
 0x4df   : > { %4002 = vst [vmem:[#allocation1 + $0x7] ss:$9 sm:$0xff] %v9846_v26  ;;  %v9858_v33 = vrot.slane %v9857_v63, 1  ;;  %v9862_v61 = vrot.slane %v9857_v63, 5  ;;  %v9863_v50 = vrot.slane %v9857_v63, 6  ;;  %v9864_v39 = vrot.slane %v9857_v63, 7 }
 0x4e0   : > { %v3754_v26 = vrot.slane %v3671_v23, 4 }
 0x4e6   : > { %v4003_v43 = vld [vmem:[#allocation1] sm:$0xff]  ;;  %v8632_v42 = vpop.f32.mrf.mxu3 }
 0x4e7   : > { %4004 = vst [vmem:[#allocation1] ss:$9 sm:$0xff] %v9847_v49  ;;  %v3755_v49 = vrot.slane %v3671_v23, 6 }
 0x4e8   : > { %4005 = vst [vmem:[#allocation1 + $0x1] ss:$9 sm:$0xff] %v9848_v14 }
 0x4e9   : > { %4006 = vst [vmem:[#allocation1 + $0x2] ss:$9 sm:$0xff] %v9849_v30 }
 0x4ea   : > { %4007 = vst [vmem:[#allocation1 + $0x3] ss:$9 sm:$0xff] %v9850_v48  ;;  %v3910_v48 = vpop.permute.xlu0 %3909 }
 0x4eb   : > { %4008 = vst [vmem:[#allocation1 + $0x4] ss:$9 sm:$0xff] %v9851_v46 }
 0x4ec   : > { %4009 = vst [vmem:[#allocation1 + $0x5] ss:$9 sm:$0xff] %v9852_v2  ;;  %v9867_v2 = vld [vmem:[#allocation39_spill] sm:$0xff] }
 0x4ed   : > { %6123 = vmatmul.msk.bf16.gmra.mxu0 %vm3382_vm13, %v4003_v43  ;;  %4010 = vst [vmem:[#allocation1 + $0x6] ss:$9 sm:$0xff] %v9853_v51  ;;  %v3669_v51 = vadd.f32 %v8591_v57, %v9867_v2 }
 0x4ee   : > { %4011 = vst [vmem:[#allocation1 + $0x7] ss:$9 sm:$0xff] %v9854_v11  ;;  %v8641_v27 = vpop.f32.mrf.mxu3  ;;  %v8696_v11 = vrot.slane %v8686_v1, 2 }
 0x4ef   : > { %v3752_v15 = vrot.slane %v3669_v51, 6 }
 0x4f5   : > { %v4012_v52 = vld [vmem:[#allocation1] sm:$0xff] }
 0x4f6   : > { %4013 = vst [vmem:[#allocation1] ss:$9 sm:$0xff] %v9855_v18  ;;  %v8645_v4 = vpop.f32.mrf.mxu3  ;;  %v8699_v18 = vrot.slane %v8686_v1, 4 }
 0x4f7   : > { %4014 = vst [vmem:[#allocation1 + $0x1] ss:$9 sm:$0xff] %v9832_v56 }
 0x4f8   : > { %4015 = vst [vmem:[#allocation1 + $0x2] ss:$9 sm:$0xff] %v9856_v40 }
 0x4f9   : > { %4016 = vst [vmem:[#allocation1 + $0x3] ss:$9 sm:$0xff] %v9835_v7  ;;  %v9859_v7 = vrot.slane %v9857_v63, 2 }
 0x4fa   : > { %4017 = vst [vmem:[#allocation1 + $0x4] ss:$9 sm:$0xff] %v9836_v38 }
 0x4fb   : > { %4018 = vst [vmem:[#allocation1 + $0x5] ss:$9 sm:$0xff] %v9837_v9  ;;  %v9860_v9 = vrot.slane %v9857_v63, 3 }
 0x4fc   : > { %4019 = vst [vmem:[#allocation1 + $0x6] ss:$9 sm:$0xff] %v9838_v60  ;;  %v9861_v60 = vrot.slane %v9857_v63, 4 }
 0x4fd   : > { %6124 = vmatmul.msk.bf16.gmra.mxu0 %vm3382_vm13, %v4012_v52  ;;  %4020 = vst [vmem:[#allocation1 + $0x7] ss:$9 sm:$0xff] %v9839_v17  ;;  %v6294_v17 = vld [vmem:[%s9586_s5 + $0x28] sm:$0xff] }
 0x4fe   : > { %5489 = vmatpush.bf16.msrb.mxu1 %v6294_v17  ;;  %v8669_v38 = vpop.f32.mrf.mxu3 }
 0x504   : > { %v4021_v53 = vld [vmem:[#allocation1] sm:$0xff] }
 0x505   : > { %4022 = vst [vmem:[#allocation1] ss:$9 sm:$0xff] %v9857_v63 }
 0x506   : > { %4023 = vst [vmem:[#allocation1 + $0x1] ss:$9 sm:$0xff] %v9858_v33  ;;  %v8688_v44 = vpop.f32.mrf.mxu3 }
 0x507   : > { %4024 = vst [vmem:[#allocation1 + $0x2] ss:$9 sm:$0xff] %v9859_v7  ;;  %v8707_v7 = vrot.slane %v8686_v1, 6 }
 0x508   : > { %4025 = vst [vmem:[#allocation1 + $0x3] ss:$9 sm:$0xff] %v9860_v9  ;;  %v9869_v9 = vld [vmem:[#allocation41_spill] sm:$0xff] }
 0x509   : > { %4026 = vst [vmem:[#allocation1 + $0x4] ss:$9 sm:$0xff] %v9861_v60  ;;  %v3674_v60 = vadd.f32 %v8606_v32, %v9869_v9 }
 0x50a   : > { %v8659_v20 = vpop.f32.mrf.mxu0  ;;  %4027 = vst [vmem:[#allocation1 + $0x5] ss:$9 sm:$0xff] %v9862_v61 }
 0x50b   : > { %4028 = vst [vmem:[#allocation1 + $0x6] ss:$9 sm:$0xff] %v9863_v50  ;;  %v4201_v33 = vrot.slane %v8659_v20, 2  ;;  %v4202_v17 = vrot.slane %v8659_v20, 4  ;;  %v3750_v50 = vrot.slane %v3669_v51, 2  ;;  %v4335_v3 = vadd.f32 %v8659_v20, %v3669_v51 }
 0x50c   : > { %4029 = vst [vmem:[#allocation1 + $0x7] ss:$9 sm:$0xff] %v9864_v39  ;;  %v4203_v39 = vrot.slane %v8659_v20, 6 }
 0x50d   : > { %6125 = vmatmul.msk.bf16.gmra.mxu0 %vm3382_vm13, %v4021_v53  ;;  %v9868_v53 = vld [vmem:[#allocation7_spill] sm:$0xff]  ;;  %v4336_v32 = vadd.f32 %v4201_v33, %v3750_v50 }
 0x50e   : > { %v3921_v63 = vsel %vm2963_vm2, %v9868_v53, %v3910_v48  ;;  %v9870_v48 = vld [vmem:[#allocation42_spill] sm:$0xff] }
 0x512   : > { %v4121_v34 = vpop.f32.mrf.mxu0 }
 0x513   : > { %v4030_v56 = vld [vmem:[#allocation1] sm:$0xff]  ;;  %v4204_v0 = vrot.slane %v4121_v34, 2  ;;  %v4205_v62 = vrot.slane %v4121_v34, 4  ;;  %v4206_v8 = vrot.slane %v4121_v34, 6  ;;  %v4339_v43 = vadd.f32 %v4121_v34, %v3671_v23 }
 0x514   : > { %4031 = vst [vmem:[#allocation1] ss:$9 sm:$0xff] %v9866_v37  ;;  %v3925_v34 = vsel %vm3004_vm4, %v3921_v63, %v3917_v22  ;;  %v9871_v22 = vld [vmem:[#allocation43_spill] sm:$0xff] }
 0x515   : > { %4032 = vst [vmem:[#allocation1 + $0x1] ss:$9 sm:$0xff] %v8672_v24  ;;  %v4340_v14 = vadd.f32 %v4204_v0, %v3753_v31  ;;  %v4341_v46 = vadd.f32 %v4205_v62, %v3754_v26  ;;  %v4342_v52 = vadd.f32 %v4206_v8, %v3755_v49  ;;  %v4438_v40 = vadd.f32 %v8686_v1, %v4339_v43  ;;  %v8722_v0 = vpop.f32.mrf.mxu3 }
 0x516   : > { %4034 = vst [vmem:[#allocation1 + $0x2] ss:$9 sm:$0xff] %v3927_v16  ;;  %v4338_v24 = vadd.f32 %v4203_v39, %v3752_v15  ;;  %v4434_v31 = vadd.f32 %v8686_v1, %v4335_v3  ;;  %v3757_v26 = vrot.slane %v3674_v60, 4  ;;  %v3758_v43 = vrot.slane %v3674_v60, 6 }
 0x517   : > { %4036 = vst [vmem:[#allocation1 + $0x3] ss:$9 sm:$0xff] %v3928_v41  ;;  %v4439_v57 = vadd.f32 %v8696_v11, %v4340_v14  ;;  %v4440_v61 = vadd.f32 %v8699_v18, %v4341_v46  ;;  %v4441_v10 = vadd.f32 %v8707_v7, %v4342_v52  ;;  %v4528_v16 = vmax.f32 %v4438_v40, 0.0 }
 0x518   : > { %4038 = vst [vmem:[#allocation1 + $0x4] ss:$9 sm:$0xff] %v3929_v47  ;;  %v4435_v49 = vadd.f32 %v8696_v11, %v4336_v32  ;;  %v3676_v46 = vadd.f32 %v8613_v29, %v9870_v48  ;;  %v4437_v52 = vadd.f32 %v8707_v7, %v4338_v24  ;;  %v4524_v40 = vmax.f32 %v4434_v31, 0.0 }
 0x519   : > { %4040 = vst [vmem:[#allocation1 + $0x5] ss:$9 sm:$0xff] %v3930_v6  ;;  %v4529_v23 = vmax.f32 %v4439_v57, 0.0  ;;  %v3756_v6 = vrot.slane %v3674_v60, 2  ;;  %v4531_v8 = vmax.f32 %v4441_v10, 0.0  ;;  %v8741_v50 = vadd.f32 %v8619_v28, %v9871_v22 }
 0x51a   : > { %v8691_v30 = vpop.f32.mrf.mxu0  ;;  %4042 = vst [vmem:[#allocation1 + $0x6] ss:$9 sm:$0xff] %v3931_v12  ;;  %v4530_v12 = vmax.f32 %v4440_v61, 0.0  ;;  %v4525_v33 = vmax.f32 %v4435_v49, 0.0  ;;  %v4527_v39 = vmax.f32 %v4437_v52, 0.0  ;;  %v9873_v49 = vld [vmem:[#allocation45_spill] sm:$0xff] }
 0x51b   : > { %4044 = vst [vmem:[#allocation1 + $0x7] ss:$9 sm:$0xff] %v3932_v45  ;;  %v4207_v37 = vrot.slane %v8691_v30, 2  ;;  %v4208_v62 = vrot.slane %v8691_v30, 4  ;;  %v4209_v45 = vrot.slane %v8691_v30, 6  ;;  %v4343_v3 = vadd.f32 %v8691_v30, %v3674_v60 }
 0x51c   : > { %v3762_v15 = vrot.slane %v8741_v50, 2 }
 0x51d   : > { %6126 = vmatmul.msk.bf16.gmra.mxu0 %vm3382_vm13, %v4030_v56  ;;  %v3751_v56 = vrot.slane %v3669_v51, 4  ;;  %v4344_v14 = vadd.f32 %v4207_v37, %v3756_v6  ;;  %v4345_v51 = vadd.f32 %v4208_v62, %v3757_v26  ;;  %v4346_v53 = vadd.f32 %v4209_v45, %v3758_v43  ;;  %v9872_v45 = vld [vmem:[#allocation44_spill] sm:$0xff] }
 0x51e   : > { %v4442_v30 = vadd.f32 %v8686_v1, %v4343_v3  ;;  %v8766_v26 = vadd.f32 %v8627_v21, %v9872_v45  ;;  %v3761_v43 = vrot.slane %v3676_v46, 6  ;;  %v9877_v45 = vld [vmem:[#allocation46_spill] sm:$0xff] }
 0x51f   : > { %v4337_v20 = vadd.f32 %v4202_v17, %v3751_v56  ;;  %v4443_v57 = vadd.f32 %v8686_v1, %v4344_v14  ;;  %v4444_v29 = vadd.f32 %v8696_v11, %v4345_v51  ;;  %v4445_v10 = vadd.f32 %v8699_v18, %v4346_v53 }
 0x520   : > { %v8770_v14 = vadd.f32 %v8632_v42, %v9873_v49  ;;  %v4532_v48 = vmax.f32 %v4442_v30, 0.0 }
 0x521   : > { %v4436_v2 = vadd.f32 %v8699_v18, %v4337_v20  ;;  %v4533_v56 = vmax.f32 %v4443_v57, 0.0  ;;  %v4534_v28 = vmax.f32 %v4444_v29, 0.0  ;;  %v4535_v60 = vmax.f32 %v4445_v10, 0.0 }
 0x522   : > { %v8720_v41 = vpop.f32.mrf.mxu0  ;;  %v4045_v47 = vld [vmem:[#allocation1] sm:$0xff]  ;;  %v3759_v20 = vrot.slane %v3676_v46, 2  ;;  %v3768_v29 = vrot.slane %v8770_v14, 2 }
 0x523   : > { %4047 = vst [vmem:[#allocation1] ss:$9 sm:$0xff] %v3933_v58  ;;  %v4347_v63 = vadd.f32 %v8720_v41, %v3676_v46  ;;  %v4526_v17 = vmax.f32 %v4436_v2, 0.0  ;;  %v8745_v58 = vpop.f32.mrf.mxu3  ;;  %v4210_v32 = vrot.slane %v8720_v41, 2 }
 0x524   : > { %4048 = vst [vmem:[#allocation1 + $0x1] ss:$9 sm:$0xff] %v3925_v34 }
 0x525   : > { %4879 = vst [vmem:[#allocation1 + $0x20] ss:$4 sm:$0xff] %v4528_v16  ;;  %v4446_v34 = vadd.f32 %v8707_v7, %v4347_v63  ;;  %v4348_v2 = vadd.f32 %v4210_v32, %v3759_v20  ;;  %v3763_v32 = vrot.slane %v8741_v50, 4 }
 0x526   : > { %4881 = vst [vmem:[#allocation1 + $0x21] ss:$4 sm:$0xff] %v4529_v23  ;;  %v4211_v23 = vrot.slane %v8720_v41, 4 }
 0x527   : > { %4883 = vst [vmem:[#allocation1 + $0x22] ss:$4 sm:$0xff] %v4530_v12  ;;  %v4536_v37 = vmax.f32 %v4446_v34, 0.0  ;;  %v4212_v12 = vrot.slane %v8720_v41, 6 }
 0x528   : > { %4885 = vst [vmem:[#allocation1 + $0x23] ss:$4 sm:$0xff] %v4531_v8  ;;  %v3760_v8 = vrot.slane %v3676_v46, 4  ;;  %v3766_v46 = vrot.slane %v8766_v26, 4 }
 0x529   : > { %v4350_v52 = vadd.f32 %v4212_v12, %v3761_v43  ;;  %v8812_v43 = vadd.f32 %v8641_v27, %v9877_v45 }
 0x52a   : > { %v8734_v9 = vpop.f32.mrf.mxu0  ;;  %v4349_v41 = vadd.f32 %v4211_v23, %v3760_v8  ;;  %v3764_v23 = vrot.slane %v8741_v50, 6 }
 0x52b   : > { %v8737_v61 = vld [vmem:[#allocation1] sm:$0xff]  ;;  %v4213_v16 = vrot.slane %v8734_v9, 2  ;;  %v8774_v21 = vpop.f32.mrf.mxu3  ;;  %v4351_v42 = vadd.f32 %v8734_v9, %v8741_v50  ;;  %v4449_v3 = vadd.f32 %v8699_v18, %v4350_v52  ;;  %v4214_v10 = vrot.slane %v8734_v9, 4 }
 0x52c   : > { %4871 = vst [vmem:[#allocation1] ss:$4 sm:$0xff] %v4524_v40  ;;  %v4448_v22 = vadd.f32 %v8696_v11, %v4349_v41 }
 0x52d   : > { %6127 = vmatmul.msk.bf16.gmra.mxu0 %vm3382_vm13, %v4045_v47  ;;  %4873 = vst [vmem:[#allocation1 + $0x1] ss:$4 sm:$0xff] %v4525_v33  ;;  %v8756_v47 = vstv %s6129_s19  ;;  %v4352_v62 = vadd.f32 %v4213_v16, %v3762_v15  ;;  %v4447_v33 = vadd.f32 %v8686_v1, %v4348_v2  ;;  %v9876_v16 = vld [vmem:[#allocation4_spill] sm:$0xff]  ;;  %v4450_v15 = vadd.f32 %v8707_v7, %v4351_v42 }
 0x52e   : > { %4875 = vst [vmem:[#allocation1 + $0x2] ss:$4 sm:$0xff] %v4526_v17  ;;  %v4616_v31 = vadd.s32 1, %v8756_v47  ;;  %v3767_v17 = vrot.slane %v8766_v26, 6  ;;  %vm4655_vm14 = vcmp.ge.s32.totalorder %v9876_v16, 1  ;;  %v4539_v49 = vmax.f32 %v4449_v3, 0.0 }
 0x52f   : > { %4877 = vst [vmem:[#allocation1 + $0x3] ss:$4 sm:$0xff] %v4527_v39  ;;  %v8758_v6 = vld.sshfl [vmem:[#allocation1 + $0x20] sm:$0xff pattern:$0x73625140]  ;;  %v4451_v40 = vadd.f32 %v8686_v1, %v4352_v62  ;;  %v4538_v62 = vmax.f32 %v4448_v22, 0.0  ;;  %v4353_v2 = vadd.f32 %v4214_v10, %v3763_v32 }
 0x530   : > { %4890 = vst [vmem:[#allocation1 + $0x20] ss:$4 sm:$0xff] %v4533_v56  ;;  %vm4626_vm12 = vcmp.ge.s32.totalorder %v4616_v31, 0  ;;  %vm4636_vm3 = vcmp.lt.s32.totalorder %v4616_v31, 16  ;;  %vm4625_vm6 = vcmp.ge.s32.totalorder %v8756_v47, 0  ;;  %vm4635_vm4 = vcmp.lt.s32.totalorder %v8756_v47, 16 }
 0x531   : > { %4891 = vst [vmem:[#allocation1 + $0x21] ss:$4 sm:$0xff] %v4534_v28  ;;  %vm8783_vm11 = vmand %vm4626_vm12, %vm4636_vm3  ;;  %v4541_v34 = vmax.f32 %v4451_v40, 0.0  ;;  %v4215_v28 = vrot.slane %v8734_v9, 6  ;;  %v3765_v9 = vrot.slane %v8766_v26, 2  ;;  %v6291_v10 = vld [vmem:[%s9586_s5 + $0x10] sm:$0xff] }
 0x532   : > { %v8761_v24 = vpop.f32.mrf.mxu0  ;;  %4892 = vst [vmem:[#allocation1 + $0x22] ss:$4 sm:$0xff] %v4535_v60  ;;  %vm4661_vm15 = vmand %vm8783_vm11, %vm4655_vm14  ;;  %5558 = vmatpush.bf16.msra.mxu2 %v6291_v10 }
 0x533   : > { %v4217_v51 = vrot.slane %v8761_v24, 4  ;;  %4893 = vst [vmem:[#allocation1 + $0x23] ss:$4 sm:$0xff] %v4536_v37  ;;  %v4218_v53 = vrot.slane %v8761_v24, 6  ;;  %v4537_v37 = vmax.f32 %v4447_v33, 0.0  ;;  %v4216_v50 = vrot.slane %v8761_v24, 2  ;;  %v8819_v42 = vpop.f32.mrf.mxu3  ;;  %vm8837_vm7 = vmand %vm4625_vm6, %vm4635_vm4 }
 0x534   : > { %v4354_v41 = vadd.f32 %v4215_v28, %v3764_v23  ;;  %v4355_v27 = vadd.f32 %v8761_v24, %v8766_v26  ;;  %v6293_v24 = vld [vmem:[%s9586_s5 + $0x20] sm:$0xff]  ;;  %v3771_v23 = vrot.slane %v8812_v43, 2  ;;  %vm4658_vm9 = vmand %vm8837_vm7, %vm4655_vm14 }
 0x535   : > { %v4357_v39 = vadd.f32 %v4217_v51, %v3766_v46  ;;  %v4358_v30 = vadd.f32 %v4218_v53, %v3767_v17  ;;  %v4540_v51 = vmax.f32 %v4450_v15, 0.0  ;;  %v9878_v17 = vld [vmem:[#allocation5_spill] sm:$0xff]  ;;  %v3769_v15 = vrot.slane %v8770_v14, 4  ;;  %5490 = vmatpush.bf16.msrb.mxu1 %v6293_v24 }
 0x536   : > { %v8780_v63 = vld.sshfl [vmem:[#allocation1] sm:$0xff pattern:$0x73625140]  ;;  %vm4690_vm5 = vcmp.lt.s32.totalorder %v9878_v17, 17 }
 0x537   : > { %4888 = vst [vmem:[#allocation1] ss:$4 sm:$0xff] %v4532_v48  ;;  %v4456_v31 = vadd.f32 %v8686_v1, %v4357_v39  ;;  %v4457_v52 = vadd.f32 %v8696_v11, %v4358_v30  ;;  %vm8846_vm8 = vmand %vm8783_vm11, %vm4690_vm5  ;;  %v3770_v30 = vrot.slane %v8770_v14, 6 }
 0x539   : > { %v4546_v53 = vmax.f32 %v4456_v31, 0.0 }
 0x53a   : > { %v8792_v56 = vpop.f32.mrf.mxu0  ;;  %v4894_v12 = vld.sshfl [vmem:[#allocation1 + $0x20] sm:$0xff pattern:$0x73625140] }
 0x53b   : > { %v4219_v60 = vrot.slane %v8792_v56, 2  ;;  %v4359_v20 = vadd.f32 %v8792_v56, %v8770_v14  ;;  %4899 = vst [vmem:[#allocation1 + $0x20] ss:$4 sm:$0xff] %v4541_v34  ;;  %v5031_v48 = vsel %vm4661_vm15, %v4894_v12, 0.0  ;;  %v4220_v22 = vrot.slane %v8792_v56, 4 }
 0x53c   : > { %v4221_v39 = vrot.slane %v8792_v56, 6  ;;  %v4547_v34 = vmax.f32 %v4457_v52, 0.0  ;;  %v5028_v52 = vsel %vm4658_vm9, %v8780_v63, 0.0 }
 0x53d   : > { %v4360_v8 = vadd.f32 %v4219_v60, %v3768_v29  ;;  %6128 = vmatmul.msk.bf16.gmra.mxu0 %vm3382_vm13, %v8737_v61  ;;  %v4458_v46 = vadd.f32 %v8699_v18, %v4359_v20  ;;  %v5061_v61 = vpack.c.bf16 %v5031_v48, %v5031_v48  ;;  %v4356_v29 = vadd.f32 %v4216_v50, %v3765_v9 }
 0x53e   : > { %v8816_v40 = vld.sshfl [vmem:[#allocation1] sm:$0xff pattern:$0x73625140]  ;;  %v4452_v60 = vadd.f32 %v8686_v1, %v4353_v2  ;;  %v4454_v20 = vadd.f32 %v8699_v18, %v4355_v27  ;;  %v4362_v31 = vadd.f32 %v4221_v39, %v3770_v30  ;;  %v3772_v48 = vrot.slane %v8812_v43, 4 }
 0x53f   : > { %4895 = vst [vmem:[#allocation1] ss:$4 sm:$0xff] %v4537_v37  ;;  %v4459_v33 = vadd.f32 %v8707_v7, %v4360_v8  ;;  %v4548_v32 = vmax.f32 %v4458_v46, 0.0  ;;  %v4453_v37 = vadd.f32 %v8696_v11, %v4354_v41  ;;  %v4455_v14 = vadd.f32 %v8707_v7, %v4356_v29 }
 0x540   : > { %4896 = vst [vmem:[#allocation1 + $0x1] ss:$4 sm:$0xff] %v4538_v62  ;;  %v4361_v62 = vadd.f32 %v4220_v22, %v3769_v15  ;;  %v4542_v2 = vmax.f32 %v4452_v60, 0.0  ;;  %vm5091_vm13 = vcmask 122880   ;;  %v4617_v27 = vadd.s32 2, %v8756_v47 }
 0x541   : > { %4897 = vst [vmem:[#allocation1 + $0x2] ss:$4 sm:$0xff] %v4539_v49  ;;  %v4549_v12 = vmax.f32 %v4459_v33, 0.0  ;;  %v4543_v46 = vmax.f32 %v4453_v37, 0.0  ;;  %v4545_v29 = vmax.f32 %v4455_v14, 0.0  ;;  %v4461_v39 = vadd.f32 %v8686_v1, %v4362_v31 }
 0x542   : > { %v8829_v3 = vpop.f32.mrf.mxu0  ;;  %4898 = vst [vmem:[#allocation1 + $0x3] ss:$4 sm:$0xff] %v4540_v51  ;;  %v4901_v9 = vld.sshfl [vmem:[#allocation1 + $0x20] sm:$0xff pattern:$0x73625140]  ;;  %v8868_v51 = vpop.f32.mrf.mxu3  ;;  %v4460_v22 = vadd.f32 %v8686_v1, %v4361_v62  ;;  %v5058_v56 = vpack.c.bf16 %v5028_v52, %v5028_v52  ;;  %vm4627_vm12 = vcmp.ge.s32.totalorder %v4617_v27, 0 }
 0x543   : > { %v4222_v28 = vrot.slane %v8829_v3, 2  ;;  %5093 = vst.msk [vmem:[#allocation3 + $0xc] sm:$0xf] %vm5088_vm10, %v5061_v61  ;;  %v5033_v8 = vsel %vm8846_vm8, %v4901_v9, 0.0  ;;  %v4223_v45 = vrot.slane %v8829_v3, 4  ;;  %v4363_v49 = vadd.f32 %v8829_v3, %v8812_v43 }
 0x544   : > { %4906 = vst [vmem:[#allocation1 + $0x20] ss:$4 sm:$0xff] %v4546_v53  ;;  %v5063_v41 = vpack.c.bf16 %v5033_v8, %v5033_v8  ;;  %v4544_v61 = vmax.f32 %v4454_v20, 0.0  ;;  %v9883_v53 = vld [vmem:[#allocation47_spill] sm:$0xff]  ;;  %v4224_v15 = vrot.slane %v8829_v3, 6  ;;  %vm4637_vm3 = vcmp.lt.s32.totalorder %v4617_v27, 16 }
 0x545   : > { %v4364_v50 = vadd.f32 %v4222_v28, %v3771_v23  ;;  %4907 = vst [vmem:[#allocation1 + $0x21] ss:$4 sm:$0xff] %v4547_v34  ;;  %v3689_v33 = vadd.f32 %v8645_v4, %v9883_v53  ;;  %v4365_v34 = vadd.f32 %v4223_v45, %v3772_v48  ;;  %v4462_v63 = vadd.f32 %v8696_v11, %v4363_v49  ;;  %vm8896_vm15 = vmand %vm4627_vm12, %vm4637_vm3 }
 0x546   : > { %4908 = vst [vmem:[#allocation1 + $0x22] ss:$4 sm:$0xff] %v4548_v32  ;;  %v3773_v30 = vrot.slane %v8812_v43, 6  ;;  %v4550_v32 = vmax.f32 %v4460_v22, 0.0  ;;  %v4551_v37 = vmax.f32 %v4461_v39, 0.0  ;;  %vm4664_vm6 = vmand %vm8896_vm15, %vm4655_vm14  ;;  %v4618_v22 = vadd.s32 3, %v8756_v47 }
 0x547   : > { %4909 = vst [vmem:[#allocation1 + $0x23] ss:$4 sm:$0xff] %v4549_v12  ;;  %v4463_v28 = vadd.f32 %v8699_v18, %v4364_v50  ;;  %v3774_v60 = vrot.slane %v3689_v33, 2  ;;  %v4464_v20 = vadd.f32 %v8707_v7, %v4365_v34  ;;  %v4552_v12 = vmax.f32 %v4462_v63, 0.0  ;;  %vm8935_vm8 = vmand %vm8896_vm15, %vm4690_vm5 }
 0x548   : > { %5095 = vst.msk [vmem:[#allocation3 + $0x14] sm:$0x1] %vm5091_vm13, %v5063_v41  ;;  %v4366_v43 = vadd.f32 %v4224_v15, %v3773_v30  ;;  %v5029_v50 = vsel %vm8837_vm7, %v8758_v6, 0.0  ;;  %v3775_v27 = vrot.slane %v3689_v33, 4  ;;  %v3776_v53 = vrot.slane %v3689_v33, 6 }
 0x549   : > { %v4900_v24 = vld.sshfl [vmem:[#allocation1] sm:$0xff pattern:$0x73625140]  ;;  %v4553_v9 = vmax.f32 %v4463_v28, 0.0  ;;  %5089 = vst.msk [vmem:[#allocation3] sm:$0xf] %vm5088_vm10, %v5058_v56  ;;  %v5059_v39 = vpack.c.bf16 %v5029_v50, %v5029_v50 }
 0x54a   : > { %v4139_v10 = vpop.f32.mrf.mxu0  ;;  %4902 = vst [vmem:[#allocation1] ss:$4 sm:$0xff] %v4542_v2  ;;  %v5032_v4 = vsel %vm8783_vm11, %v4900_v24, 0.0  ;;  %vm8888_vm11 = vmand %vm8837_vm7, %vm4690_vm5  ;;  %vm4628_vm4 = vcmp.ge.s32.totalorder %v4618_v22, 0  ;;  %vm4638_vm7 = vcmp.lt.s32.totalorder %v4618_v22, 16 }
 0x54b   : > { %4903 = vst [vmem:[#allocation1 + $0x1] ss:$4 sm:$0xff] %v4543_v46  ;;  %v5062_v23 = vpack.c.bf16 %v5032_v4, %v5032_v4  ;;  %v4225_v3 = vrot.slane %v4139_v10, 2  ;;  %v4226_v31 = vrot.slane %v4139_v10, 4  ;;  %v4227_v8 = vrot.slane %v4139_v10, 6  ;;  %v8907_v46 = vpop.f32.mrf.mxu3  ;;  %vm8945_vm9 = vmand %vm4628_vm4, %vm4638_vm7 }
 0x54c   : > { %4904 = vst [vmem:[#allocation1 + $0x2] ss:$4 sm:$0xff] %v4544_v61  ;;  %v4367_v48 = vadd.f32 %v4139_v10, %v3689_v33  ;;  %v5030_v61 = vsel %vm8888_vm11, %v8816_v40, 0.0  ;;  %v4465_v10 = vadd.f32 %v8686_v1, %v4366_v43  ;;  %vm8959_vm12 = vmand %vm8945_vm9, %vm4655_vm14 }
 0x54d   : > { %4905 = vst [vmem:[#allocation1 + $0x3] ss:$4 sm:$0xff] %v4545_v29  ;;  %v4554_v29 = vmax.f32 %v4464_v20, 0.0  ;;  %v4368_v6 = vadd.f32 %v4225_v3, %v3774_v60  ;;  %v5060_v40 = vpack.c.bf16 %v5030_v61, %v5030_v61  ;;  %v4369_v33 = vadd.f32 %v4226_v31, %v3775_v27  ;;  %v9889_v20 = vld [vmem:[#allocation9_spill] sm:$0xff]  ;;  %vm9000_vm3 = vmand %vm8945_vm9, %vm4690_vm5 }
 0x54e   : > { %5094 = vst.msk [vmem:[#allocation3 + $0x10] sm:$0xf] %vm5088_vm10, %v5062_v23  ;;  %v4911_v62 = vld.sshfl [vmem:[#allocation1 + $0x20] sm:$0xff pattern:$0x73625140]  ;;  %v4370_v34 = vadd.f32 %v4227_v8, %v3776_v53  ;;  %v4466_v63 = vadd.f32 %v8696_v11, %v4367_v48  ;;  %v4555_v57 = vmax.f32 %v4465_v10, 0.0 }
 0x54f   : > { %v5125_v45 = vld [vmem:[#allocation3 + $0x14] sm:$0x1]  ;;  %v5035_v49 = vsel %vm8896_vm15, %v4911_v62, 0.0  ;;  %4914 = vst [vmem:[#allocation1 + $0x20] ss:$4 sm:$0xff] %v4551_v37  ;;  %v4467_v30 = vadd.f32 %v8699_v18, %v4368_v6  ;;  %v9888_v23 = vld [vmem:[#allocation6_spill] sm:$0xff]  ;;  %v4468_v43 = vadd.f32 %v8707_v7, %v4369_v33 }
 0x550   : > { %v5218_v2 = vunpack.c.l.b16 %v5125_v45  ;;  %v5065_v52 = vpack.c.bf16 %v5035_v49, %v5035_v49  ;;  %4915 = vst [vmem:[#allocation1 + $0x21] ss:$4 sm:$0xff] %v4552_v12  ;;  %v3691_v37 = vadd.f32 %v8669_v38, %v9888_v23  ;;  %v8926_v12 = vadd.f32 %v8688_v44, %v9889_v20  ;;  %v9896_v38 = vld [vmem:[#allocation12_spill] sm:$0xff] }
 0x551   : > { %4916 = vst [vmem:[#allocation1 + $0x22] ss:$4 sm:$0xff] %v4553_v9  ;;  %v4469_v3 = vadd.f32 %v8686_v1, %v4370_v34  ;;  %v4556_v62 = vmax.f32 %v4466_v63, 0.0  ;;  %v4557_v14 = vmax.f32 %v4467_v30, 0.0 }
 0x552   : > { %v8905_v41 = vpop.f32.mrf.mxu0  ;;  %v5226_v26 = vpack.c.b16 %v5218_v2, %v5218_v2  ;;  %5097 = vst.msk [vmem:[#allocation3 + $0x1c] sm:$0xf] %vm5088_vm10, %v5065_v52  ;;  %v3777_v27 = vrot.slane %v3691_v37, 2  ;;  %v3778_v53 = vrot.slane %v3691_v37, 4 }
 0x553   : > { %4917 = vst [vmem:[#allocation1 + $0x23] ss:$4 sm:$0xff] %v4554_v29  ;;  %v8940_v44 = vpop.f32.mrf.mxu3  ;;  %v4228_v2 = vrot.slane %v8905_v41, 2  ;;  %v4229_v52 = vrot.slane %v8905_v41, 4  ;;  %v4230_v61 = vrot.slane %v8905_v41, 6  ;;  %v4371_v34 = vadd.f32 %v8905_v41, %v3691_v37 }
 0x554   : > { %v4910_v24 = vld.sshfl [vmem:[#allocation1] sm:$0xff pattern:$0x73625140]  ;;  %v5349_v15 = vrot.slane %v5226_v26, 1  ;;  %v5253_v4 = vshll.u32 %v5226_v26, 16  ;;  %v3779_v26 = vrot.slane %v3691_v37, 6 }
 0x555   : > { %4912 = vst [vmem:[#allocation1] ss:$4 sm:$0xff] %v4550_v32  ;;  %v5034_v28 = vsel %vm4664_vm6, %v4910_v24, 0.0  ;;  %v6280_v56 = vld [vmem:[#allocation3 + $0xc] sm:$0xff] }
 0x556   : > { %v5064_v60 = vpack.c.bf16 %v5034_v28, %v5034_v28  ;;  %5090 = vst.msk [vmem:[#allocation3 + $0x4] sm:$0xf] %vm5088_vm10, %v5059_v39  ;;  %v5348_v32 = vrot.slane %v6280_v56, 1  ;;  %v5248_v9 = vshll.u32 %v6280_v56, 16  ;;  %v5246_v45 = vshrl.u32 %v6280_v56, 16 }
 0x557   : > { %5092 = vst.msk [vmem:[#allocation3 + $0x8] sm:$0x1] %vm5091_vm13, %v5060_v40  ;;  %v5255_v50 = vrot.slane %v5253_v4, 1  ;;  %v4558_v39 = vmax.f32 %v4468_v43, 0.0  ;;  %v4559_v40 = vmax.f32 %v4469_v3, 0.0  ;;  %v3780_v56 = vrot.slane %v8926_v12, 2 }
 0x558   : > { %5096 = vst.msk [vmem:[#allocation3 + $0x18] sm:$0xf] %vm5088_vm10, %v5064_v60  ;;  %v5350_v8 = vsel %vm691_vm0, %v5348_v32, %v5349_v15  ;;  %v5250_v49 = vrot.slane %v5248_v9, 1  ;;  %v4372_v15 = vadd.f32 %v4228_v2, %v3777_v27  ;;  %v4373_v4 = vadd.f32 %v4229_v52, %v3778_v53 }
 0x559   : > { %5371 = vrot.lane.b32.xlu0 %v5350_v8, %s6404_s20  ;;  %v4374_v30 = vadd.f32 %v4230_v61, %v3779_v26  ;;  %v3781_v3 = vrot.slane %v8926_v12, 4  ;;  %v3696_v8 = vadd.f32 %v8722_v0, %v9896_v38 }
 0x55a   : > { %v4144_v31 = vpop.f32.mrf.mxu0  ;;  %v5251_v29 = vor.u32 %v5250_v49, %v5246_v45  ;;  %v4918_v28 = vld.sshfl [vmem:[#allocation1 + $0x20] sm:$0xff pattern:$0x73625140]  ;;  %v4470_v45 = vadd.f32 %v8686_v1, %v4371_v34  ;;  %v4471_v49 = vadd.f32 %v8696_v11, %v4372_v15 }
 0x55b   : > { %v4231_v22 = vrot.slane %v4144_v31, 2  ;;  %v4232_v60 = vrot.slane %v4144_v31, 4  ;;  %v4375_v23 = vadd.f32 %v4144_v31, %v8926_v12  ;;  %v5037_v41 = vsel %vm8959_vm12, %v4918_v28, 0.0  ;;  %v8975_v43 = vpop.f32.mrf.mxu3  ;;  %4923 = vst [vmem:[#allocation1 + $0x20] ss:$4 sm:$0xff] %v4559_v40 }
 0x55c   : > { %v4913_v6 = vld.sshfl [vmem:[#allocation1] sm:$0xff pattern:$0x73625140]  ;;  %v5256_v33 = vsel %vm462_vm1, %v5251_v29, %v5255_v50  ;;  %v4233_v37 = vrot.slane %v4144_v31, 6  ;;  %v4472_v31 = vadd.f32 %v8699_v18, %v4373_v4  ;;  %v4473_v50 = vadd.f32 %v8707_v7, %v4374_v30 }
 0x55d   : > { %v5036_v10 = vsel %vm8935_vm8, %v4913_v6, 0.0  ;;  %4919 = vst [vmem:[#allocation1] ss:$4 sm:$0xff] %v4555_v57  ;;  %5331 = vrot.lane.b32.xlu2 %v5256_v33, %s6405_s12  ;;  %v4376_v32 = vadd.f32 %v4231_v22, %v3780_v56  ;;  %v5067_v57 = vpack.c.bf16 %v5037_v41, %v5037_v41  ;;  %v4474_v2 = vadd.f32 %v8686_v1, %v4375_v23  ;;  %v9897_v29 = vld [vmem:[#allocation10_spill] sm:$0xff] }
 0x55e   : > { %v5066_v63 = vpack.c.bf16 %v5036_v10, %v5036_v10  ;;  %4920 = vst [vmem:[#allocation1 + $0x1] ss:$4 sm:$0xff] %v4556_v62  ;;  %v3782_v62 = vrot.slane %v8926_v12, 6  ;;  %v3783_v0 = vrot.slane %v3696_v8, 2  ;;  %v3784_v27 = vrot.slane %v3696_v8, 4 }
 0x55f   : > { %4921 = vst [vmem:[#allocation1 + $0x2] ss:$4 sm:$0xff] %v4557_v14  ;;  %v8969_v20 = vld [vmem:[#allocation3 + $0x18] sm:$0xff]  ;;  %v4377_v14 = vadd.f32 %v4232_v60, %v3781_v3  ;;  %v8989_v61 = vadd.f32 %v8696_v11, %v4376_v32  ;;  %v3785_v53 = vrot.slane %v3696_v8, 6  ;;  %v8993_v6 = vadd.f32 %v8745_v58, %v9897_v29 }
 0x560   : > { %5098 = vst.msk [vmem:[#allocation3 + $0x20] sm:$0x1] %vm5091_vm13, %v5066_v63  ;;  %v5260_v52 = vshll.u32 %v8969_v20, 16  ;;  %v4378_v12 = vadd.f32 %v4233_v37, %v3782_v62  ;;  %v4560_v26 = vmax.f32 %v4470_v45, 0.0  ;;  %v4562_v22 = vmax.f32 %v4472_v31, 0.0 }
 0x561   : > { %4922 = vst [vmem:[#allocation1 + $0x3] ss:$4 sm:$0xff] %v4558_v39  ;;  %v4561_v39 = vmax.f32 %v4471_v49, 0.0  ;;  %v4563_v10 = vmax.f32 %v4473_v50, 0.0  ;;  %v4476_v40 = vadd.f32 %v8699_v18, %v4377_v14  ;;  %v4564_v33 = vmax.f32 %v4474_v2, 0.0 }
 0x562   : > { %v8973_v9 = vpop.f32.mrf.mxu0  ;;  %5099 = vst.msk [vmem:[#allocation3 + $0x24] sm:$0xf] %vm5088_vm10, %v5067_v57  ;;  %v5262_v63 = vrot.slane %v5260_v52, 1  ;;  %v4477_v56 = vadd.f32 %v8707_v7, %v4378_v12  ;;  %v4565_v15 = vmax.f32 %v8989_v61, 0.0  ;;  %v5351_v32 = vrot.slane %v8969_v20, 1 }
 0x563   : > { %v4234_v4 = vrot.slane %v8973_v9, 2  ;;  %v4925_v60 = vld.sshfl [vmem:[#allocation1 + $0x20] sm:$0xff pattern:$0x73625140]  ;;  %v9009_v41 = vpop.f32.mrf.mxu3  ;;  %v5258_v57 = vshrl.u32 %v8969_v20, 16  ;;  %v4235_v3 = vrot.slane %v8973_v9, 4  ;;  %v4379_v38 = vadd.f32 %v8973_v9, %v3696_v8 }
 0x564   : > { %v4236_v62 = vrot.slane %v8973_v9, 6  ;;  %v5039_v45 = vsel %vm9000_vm3, %v4925_v60, 0.0  ;;  %v4619_v14 = vadd.s32 4, %v8756_v47  ;;  %v4566_v2 = vmax.f32 %v4476_v40, 0.0  ;;  %4930 = vst [vmem:[#allocation1 + $0x20] ss:$4 sm:$0xff] %v4564_v33 }
 0x565   : > { %v5263_v31 = vor.u32 %v5262_v63, %v5258_v57  ;;  %v4567_v20 = vmax.f32 %v4477_v56, 0.0  ;;  %v4380_v52 = vadd.f32 %v4234_v4, %v3783_v0  ;;  %v5069_v12 = vpack.c.bf16 %v5039_v45, %v5039_v45  ;;  %v9900_v63 = vld [vmem:[#allocation11_spill] sm:$0xff]  ;;  %4931 = vst [vmem:[#allocation1 + $0x21] ss:$4 sm:$0xff] %v4565_v15 }
 0x566   : > { %v4381_v8 = vadd.f32 %v4235_v3, %v3784_v27  ;;  %v3786_v0 = vrot.slane %v8993_v6, 2  ;;  %vm4629_vm11 = vcmp.ge.s32.totalorder %v4619_v14, 0  ;;  %v3787_v27 = vrot.slane %v8993_v6, 4  ;;  %4932 = vst [vmem:[#allocation1 + $0x22] ss:$4 sm:$0xff] %v4566_v2 }
 0x567   : > { %v5128_v24 = vld [vmem:[#allocation3 + $0x20] sm:$0x1]  ;;  %5101 = vst.msk [vmem:[#allocation3 + $0x2c] sm:$0x1] %vm5091_vm13, %v5069_v12  ;;  %vm4639_vm15 = vcmp.lt.s32.totalorder %v4619_v14, 16  ;;  %v4479_v56 = vadd.f32 %v8686_v1, %v4380_v52 }
 0x568   : > { %v5219_v34 = vunpack.c.l.b16 %v5128_v24  ;;  %v4924_v58 = vld.sshfl [vmem:[#allocation1] sm:$0xff pattern:$0x73625140]  ;;  %v4480_v33 = vadd.f32 %v8696_v11, %v4381_v8  ;;  %vm9040_vm6 = vmand %vm4629_vm11, %vm4639_vm15  ;;  %4933 = vst [vmem:[#allocation1 + $0x23] ss:$4 sm:$0xff] %v4567_v20 }
 0x569   : > { %v5038_v23 = vsel %vm8945_vm9, %v4924_v58, 0.0  ;;  %4926 = vst [vmem:[#allocation1] ss:$4 sm:$0xff] %v4560_v26  ;;  %v4382_v26 = vadd.f32 %v4236_v62, %v3785_v53  ;;  %v9031_v53 = vadd.f32 %v8774_v21, %v9900_v63  ;;  %vm4670_vm4 = vmand %vm9040_vm6, %vm4655_vm14 }
 0x56a   : > { %v4149_v30 = vpop.f32.mrf.mxu0  ;;  %v5227_v37 = vpack.c.b16 %v5219_v34, %v5219_v34  ;;  %v5068_v49 = vpack.c.bf16 %v5038_v23, %v5038_v23  ;;  %4927 = vst [vmem:[#allocation1 + $0x1] ss:$4 sm:$0xff] %v4561_v39  ;;  %v4478_v39 = vadd.f32 %v8686_v1, %v4379_v38  ;;  %v4569_v38 = vmax.f32 %v4479_v56, 0.0  ;;  %vm4705_vm7 = vmand %vm9040_vm6, %vm4690_vm5 }
 0x56b   : > { %4928 = vst [vmem:[#allocation1 + $0x2] ss:$4 sm:$0xff] %v4562_v22  ;;  %v4237_v29 = vrot.slane %v4149_v30, 2  ;;  %v4238_v22 = vrot.slane %v4149_v30, 4  ;;  %v4239_v24 = vrot.slane %v4149_v30, 6  ;;  %v4383_v34 = vadd.f32 %v4149_v30, %v8993_v6  ;;  %v9036_v58 = vpop.f32.mrf.mxu3 }
 0x56c   : > { %v5352_v48 = vrot.slane %v5227_v37, 1  ;;  %v5265_v50 = vshll.u32 %v5227_v37, 16  ;;  %5100 = vst.msk [vmem:[#allocation3 + $0x28] sm:$0xf] %vm5088_vm10, %v5068_v49  ;;  %v4481_v21 = vadd.f32 %v8699_v18, %v4382_v26  ;;  %v4568_v30 = vmax.f32 %v4478_v39, 0.0 }
 0x56d   : > { %4929 = vst [vmem:[#allocation1 + $0x3] ss:$4 sm:$0xff] %v4563_v10  ;;  %v3788_v10 = vrot.slane %v8993_v6, 6  ;;  %v4384_v4 = vadd.f32 %v4237_v29, %v3786_v0  ;;  %v4385_v60 = vadd.f32 %v4238_v22, %v3787_v27  ;;  %v4482_v23 = vadd.f32 %v8707_v7, %v4383_v34 }
 0x56e   : > { %v5353_v61 = vsel %vm691_vm0, %v5351_v32, %v5352_v48  ;;  %v5267_v9 = vrot.slane %v5265_v50, 1  ;;  %v3789_v32 = vrot.slane %v9031_v53, 2  ;;  %v3790_v57 = vrot.slane %v9031_v53, 4  ;;  %v5131_v48 = vld [vmem:[#allocation3 + $0x2c] sm:$0x1] }
 0x56f   : > { %5373 = vrot.lane.b32.xlu2 %v5353_v61, %s6404_s20  ;;  %v4386_v15 = vadd.f32 %v4239_v24, %v3788_v10  ;;  %v3791_v3 = vrot.slane %v9031_v53, 6  ;;  %v4570_v45 = vmax.f32 %v4480_v33, 0.0  ;;  %v4483_v49 = vadd.f32 %v8686_v1, %v4384_v4  ;;  %v4935_v27 = vld.sshfl [vmem:[#allocation1 + $0x20] sm:$0xff pattern:$0x73625140] }
 0x570   : > { %v5268_v40 = vsel %vm462_vm1, %v5263_v31, %v5267_v9  ;;  %v4571_v50 = vmax.f32 %v4481_v21, 0.0  ;;  %v9058_v14 = vadd.f32 %v8696_v11, %v4385_v60  ;;  %v5220_v20 = vunpack.c.l.b16 %v5131_v48  ;;  %4938 = vst [vmem:[#allocation1 + $0x20] ss:$4 sm:$0xff] %v4569_v38 }
 0x571   : > { %5333 = vrot.lane.b32.xlu1 %v5268_v40, %s6405_s12  ;;  %v9061_v2 = vadd.f32 %v8699_v18, %v4386_v15  ;;  %v4572_v52 = vmax.f32 %v4482_v23, 0.0  ;;  %v3704_v0 = vadd.f32 %v8819_v42, %v8520_v25  ;;  %v4573_v40 = vmax.f32 %v4483_v49, 0.0  ;;  %4939 = vst [vmem:[#allocation1 + $0x21] ss:$4 sm:$0xff] %v4570_v45 }
 0x572   : > { %v9034_v28 = vpop.f32.mrf.mxu0  ;;  %v5228_v8 = vpack.c.b16 %v5220_v20, %v5220_v20  ;;  %v4620_v10 = vadd.s32 5, %v8756_v47  ;;  %v5041_v4 = vsel %vm9040_vm6, %v4935_v27, 0.0  ;;  %v4574_v21 = vmax.f32 %v9058_v14, 0.0  ;;  %4940 = vst [vmem:[#allocation1 + $0x22] ss:$4 sm:$0xff] %v4571_v50 }
 0x573   : > { %v9046_v37 = vld [vmem:[#allocation3 + $0x24] sm:$0xff]  ;;  %v4240_v61 = vrot.slane %v9034_v28, 2  ;;  %v4387_v26 = vadd.f32 %v9034_v28, %v9031_v53  ;;  %v9067_v24 = vpop.f32.mrf.mxu3  ;;  %v5071_v25 = vpack.c.bf16 %v5041_v4, %v5041_v4  ;;  %v4241_v23 = vrot.slane %v9034_v28, 4  ;;  %4941 = vst [vmem:[#allocation1 + $0x23] ss:$4 sm:$0xff] %v4572_v52 }
 0x574   : > { %v4934_v62 = vld.sshfl [vmem:[#allocation1] sm:$0xff pattern:$0x73625140]  ;;  %v5272_v31 = vshll.u32 %v9046_v37, 16  ;;  %v5270_v29 = vshrl.u32 %v9046_v37, 16  ;;  %v5354_v34 = vrot.slane %v9046_v37, 1  ;;  %v9097_v50 = vadd.f32 %v8868_v51, %v8525_v5 }
 0x575   : > { %4936 = vst [vmem:[#allocation1] ss:$4 sm:$0xff] %v4568_v30  ;;  %v5040_v9 = vsel %vm4670_vm4, %v4934_v62, 0.0  ;;  %v5355_v63 = vrot.slane %v5228_v8, 1  ;;  %v5277_v33 = vshll.u32 %v5228_v8, 16  ;;  %v4575_v30 = vmax.f32 %v9061_v2, 0.0 }
 0x576   : > { %v5274_v12 = vrot.slane %v5272_v31, 1  ;;  %v5070_v22 = vpack.c.bf16 %v5040_v9, %v5040_v9  ;;  %v4388_v60 = vadd.f32 %v4240_v61, %v3789_v32  ;;  %v4486_v62 = vadd.f32 %v8707_v7, %v4387_v26  ;;  %5103 = vst.msk [vmem:[#allocation3 + $0x34] sm:$0xf] %vm5088_vm10, %v5071_v25 }
 0x577   : > { %v5356_v42 = vsel %vm691_vm0, %v5354_v34, %v5355_v63  ;;  %v5279_v15 = vrot.slane %v5277_v33, 1  ;;  %v4242_v49 = vrot.slane %v9034_v28, 6  ;;  %vm4630_vm8 = vcmp.ge.s32.totalorder %v4620_v10, 0  ;;  %v6292_v63 = vld [vmem:[%s9586_s5 + $0x18] sm:$0xff] }
 0x578   : > { %v5275_v56 = vor.u32 %v5274_v12, %v5270_v29  ;;  %5102 = vst.msk [vmem:[#allocation3 + $0x30] sm:$0xf] %vm5088_vm10, %v5070_v22  ;;  %v4487_v38 = vadd.f32 %v8686_v1, %v4388_v60  ;;  %v3792_v20 = vrot.slane %v3704_v0, 2  ;;  %v3793_v12 = vrot.slane %v3704_v0, 4  ;;  %5491 = vmatpush.bf16.msrb.mxu1 %v6292_v63 }
 0x579   : > { %5375 = vrot.lane.b32.xlu1 %v5356_v42, %s6404_s20  ;;  %v4576_v28 = vmax.f32 %v4486_v62, 0.0  ;;  %vm4640_vm9 = vcmp.lt.s32.totalorder %v4620_v10, 16  ;;  %v3794_v8 = vrot.slane %v3704_v0, 6  ;;  %v4389_v1 = vadd.f32 %v4241_v23, %v3790_v57 }
 0x57a   : > { %v4154_v39 = vpop.f32.mrf.mxu0  ;;  %v5280_v6 = vsel %vm462_vm1, %v5275_v56, %v5279_v15  ;;  %v4390_v52 = vadd.f32 %v4242_v49, %v3791_v3  ;;  %vm9105_vm12 = vmand %vm4630_vm8, %vm4640_vm9  ;;  %v3795_v3 = vrot.slane %v9097_v50, 2  ;;  %v3796_v60 = vrot.slane %v9097_v50, 4 }
 0x57b   : > { %v4243_v48 = vrot.slane %v4154_v39, 2  ;;  %5335 = vrot.lane.b32.xlu0 %v5280_v6, %s6405_s12  ;;  %v4244_v14 = vrot.slane %v4154_v39, 4  ;;  %v4245_v2 = vrot.slane %v4154_v39, 6  ;;  %v9093_v9 = vpop.f32.mrf.mxu3  ;;  %v4391_v26 = vadd.f32 %v4154_v39, %v3704_v0  ;;  %vm9116_vm3 = vmand %vm9105_vm12, %vm4655_vm14  ;;  %v9124_v39 = vld [vmem:[%s9585_s4] ss:$0 sm:$0xff] }
 0x57c   : > { %v4937_v32 = vld.sshfl [vmem:[#allocation1] sm:$0xff pattern:$0x73625140]  ;;  %v4488_v0 = vadd.f32 %v9124_v39, %v4389_v1  ;;  %v4489_v27 = vadd.f32 %v8696_v11, %v4390_v52  ;;  %v3797_v23 = vrot.slane %v9097_v50, 6  ;;  %v9147_v62 = vadd.f32 %v8907_v46, %v8536_v54  ;;  %vm9165_vm11 = vmand %vm9105_vm12, %vm4690_vm5 }
 0x57d   : > { %v5042_v31 = vsel %vm4705_vm7, %v4937_v32, 0.0  ;;  %4943 = vst [vmem:[#allocation1] ss:$4 sm:$0xff] %v4573_v40  ;;  %v4392_v22 = vadd.f32 %v4243_v48, %v3792_v20  ;;  %v4577_v40 = vmax.f32 %v4487_v38, 0.0  ;;  %v4393_v34 = vadd.f32 %v4244_v14, %v3793_v12 }
 0x57e   : > { %v5072_v45 = vpack.c.bf16 %v5042_v31, %v5042_v31  ;;  %4944 = vst [vmem:[#allocation1 + $0x1] ss:$4 sm:$0xff] %v4574_v21  ;;  %v4394_v5 = vadd.f32 %v4245_v2, %v3794_v8  ;;  %v4490_v56 = vadd.f32 %v8699_v18, %v4391_v26  ;;  %v4578_v38 = vmax.f32 %v4488_v0, 0.0 }
 0x57f   : > { %4945 = vst [vmem:[#allocation1 + $0x2] ss:$4 sm:$0xff] %v4575_v30  ;;  %v9110_v57 = vld [vmem:[#allocation3 + $0x30] sm:$0xff]  ;;  %v4491_v33 = vadd.f32 %v8707_v7, %v4392_v22  ;;  %v4942_v30 = vld.sshfl [vmem:[#allocation1 + $0x20] sm:$0xff pattern:$0x73625140]  ;;  %v4492_v25 = vadd.f32 %v9124_v39, %v4393_v34 }
 0x580   : > { %5104 = vst.msk [vmem:[#allocation3 + $0x38] sm:$0x1] %vm5091_vm13, %v5072_v45  ;;  %v5284_v21 = vshll.u32 %v9110_v57, 16  ;;  %v9140_v42 = vadd.f32 %v8696_v11, %v4394_v5  ;;  %v5043_v15 = vsel %vm9116_vm3, %v4942_v30, 0.0  ;;  %v4579_v14 = vmax.f32 %v4489_v27, 0.0 }
 0x581   : > { %4946 = vst [vmem:[#allocation1 + $0x3] ss:$4 sm:$0xff] %v4576_v28  ;;  %v5073_v48 = vpack.c.bf16 %v5043_v15, %v5043_v15  ;;  %v4580_v20 = vmax.f32 %v4490_v56, 0.0  ;;  %v4581_v12 = vmax.f32 %v4491_v33, 0.0  ;;  %v4621_v52 = vadd.s32 6, %v8756_v47 }
 0x582   : > { %v9091_v61 = vpop.f32.mrf.mxu0  ;;  %4947 = vst [vmem:[#allocation1 + $0x20] ss:$4 sm:$0xff] %v4577_v40  ;;  %v5286_v8 = vrot.slane %v5284_v21, 1  ;;  %v4583_v54 = vmax.f32 %v9140_v42, 0.0  ;;  %v5282_v40 = vshrl.u32 %v9110_v57, 16  ;;  %v3798_v29 = vrot.slane %v9147_v62, 2 }
 0x583   : > { %v4246_v51 = vrot.slane %v9091_v61, 2  ;;  %v4395_v10 = vadd.f32 %v9091_v61, %v9097_v50  ;;  %v4247_v4 = vrot.slane %v9091_v61, 4  ;;  %v3725_v31 = vpop.f32.mrf.mxu3  ;;  %5105 = vst.msk [vmem:[#allocation3 + $0x3c] sm:$0xf] %vm5088_vm10, %v5073_v48  ;;  %v4582_v50 = vmax.f32 %v4492_v25, 0.0 }
 0x584   : > { %v4248_v26 = vrot.slane %v9091_v61, 6  ;;  %v5287_v27 = vor.u32 %v5286_v8, %v5282_v40  ;;  %vm4631_vm15 = vcmp.ge.s32.totalorder %v4621_v52, 0  ;;  %vm4641_vm6 = vcmp.lt.s32.totalorder %v4621_v52, 16 }
 0x585   : > { %v4396_v49 = vadd.f32 %v4246_v51, %v3795_v3  ;;  %v4494_v2 = vadd.f32 %v8699_v18, %v4395_v10  ;;  %v4397_v28 = vadd.f32 %v4247_v4, %v3796_v60  ;;  %v5357_v51 = vrot.slane %v9110_v57, 1  ;;  %vm9187_vm4 = vmand %vm4631_vm15, %vm4641_vm6 }
 0x586   : > { %v3711_v21 = vadd.f32 %v8940_v44, %v8540_v19  ;;  %v4398_v42 = vadd.f32 %v4248_v26, %v3797_v23  ;;  %v3799_v48 = vrot.slane %v9147_v62, 4  ;;  %v3800_v19 = vrot.slane %v9147_v62, 6  ;;  %vm4676_vm7 = vmand %vm9187_vm4, %vm4655_vm14 }
 0x587   : > { %v5134_v32 = vld [vmem:[#allocation3 + $0x38] sm:$0x1]  ;;  %v4495_v22 = vadd.f32 %v8707_v7, %v4396_v49  ;;  %v4584_v5 = vmax.f32 %v4494_v2, 0.0  ;;  %v4496_v61 = vadd.f32 %v9124_v39, %v4397_v28  ;;  %vm9217_vm8 = vmand %vm9187_vm4, %vm4690_vm5 }
 0x588   : > { %v5221_v45 = vunpack.c.l.b16 %v5134_v32  ;;  %v4948_v1 = vld.sshfl [vmem:[#allocation1] sm:$0xff pattern:$0x73625140]  ;;  %v3802_v26 = vrot.slane %v3711_v21, 4 }
 0x589   : > { %v5044_v34 = vsel %vm9105_vm12, %v4948_v1, 0.0  ;;  %4950 = vst [vmem:[#allocation1] ss:$4 sm:$0xff] %v4578_v38  ;;  %v4949_v63 = vld.sshfl [vmem:[#allocation1 + $0x20] sm:$0xff pattern:$0x73625140] }
 0x58a   : > { %v9149_v6 = vpop.f32.mrf.mxu0  ;;  %v5229_v46 = vpack.c.b16 %v5221_v45, %v5221_v45  ;;  %4951 = vst [vmem:[#allocation1 + $0x1] ss:$4 sm:$0xff] %v4579_v14  ;;  %v5074_v56 = vpack.c.bf16 %v5044_v34, %v5044_v34  ;;  %v5045_v25 = vsel %vm9165_vm11, %v4949_v63, 0.0  ;;  %v4585_v15 = vmax.f32 %v4495_v22, 0.0 }
 0x58b   : > { %v4249_v10 = vrot.slane %v9149_v6, 2  ;;  %4952 = vst [vmem:[#allocation1 + $0x2] ss:$4 sm:$0xff] %v4580_v20  ;;  %v4250_v30 = vrot.slane %v9149_v6, 4  ;;  %v4251_v32 = vrot.slane %v9149_v6, 6  ;;  %v5075_v44 = vpack.c.bf16 %v5045_v25, %v5045_v25 }
 0x58c   : > { %v5358_v53 = vrot.slane %v5229_v46, 1  ;;  %v5289_v3 = vshll.u32 %v5229_v46, 16  ;;  %4953 = vst [vmem:[#allocation1 + $0x3] ss:$4 sm:$0xff] %v4581_v12  ;;  %v4586_v23 = vmax.f32 %v4496_v61, 0.0  ;;  %v4399_v38 = vadd.f32 %v9149_v6, %v9147_v62 }
 0x58d   : > { %5106 = vst.msk [vmem:[#allocation3 + $0x40] sm:$0xf] %vm5088_vm10, %v5074_v56  ;;  %v4400_v14 = vadd.f32 %v4249_v10, %v3798_v29  ;;  %v4401_v45 = vadd.f32 %v4250_v30, %v3799_v48  ;;  %v3801_v20 = vrot.slane %v3711_v21, 2  ;;  %v4497_v12 = vadd.f32 %v9124_v39, %v4398_v42 }
 0x58e   : > { %v5359_v33 = vsel %vm691_vm0, %v5357_v51, %v5358_v53  ;;  %v5291_v4 = vrot.slane %v5289_v3, 1  ;;  %4954 = vst [vmem:[#allocation1 + $0x20] ss:$4 sm:$0xff] %v4582_v50  ;;  %v4402_v28 = vadd.f32 %v4251_v32, %v3800_v19  ;;  %v4498_v62 = vadd.f32 %v8696_v11, %v4399_v38  ;;  %v6290_v3 = vld [vmem:[%s9586_s5 + $0x8] sm:$0xff] }
 0x58f   : > { %5377 = vrot.lane.b32.xlu0 %v5359_v33, %s6404_s20  ;;  %4955 = vst [vmem:[#allocation1 + $0x21] ss:$4 sm:$0xff] %v4583_v54  ;;  %v4499_v6 = vadd.f32 %v8699_v18, %v4400_v14  ;;  %v3803_v22 = vrot.slane %v3711_v21, 6  ;;  %v4500_v40 = vadd.f32 %v8707_v7, %v4401_v45  ;;  %v4587_v51 = vmax.f32 %v4497_v12, 0.0  ;;  %5559 = vmatpush.bf16.msra.mxu2 %v6290_v3 }
 0x590   : > { %v5292_v49 = vsel %vm462_vm1, %v5287_v27, %v5291_v4  ;;  %4956 = vst [vmem:[#allocation1 + $0x22] ss:$4 sm:$0xff] %v4584_v5  ;;  %v4501_v53 = vadd.f32 %v9124_v39, %v4402_v28  ;;  %v4588_v63 = vmax.f32 %v4498_v62, 0.0  ;;  %v3714_v42 = vadd.f32 %v8975_v43, %v8551_v59 }
 0x591   : > { %5337 = vrot.lane.b32.xlu2 %v5292_v49, %s6405_s12  ;;  %5107 = vst.msk [vmem:[#allocation3 + $0x44] sm:$0x1] %vm5091_vm13, %v5075_v44  ;;  %v4589_v56 = vmax.f32 %v4499_v6, 0.0  ;;  %v4622_v32 = vadd.s32 7, %v8756_v47 }
 0x592   : > { %v4161_v60 = vpop.f32.mrf.mxu0  ;;  %4957 = vst [vmem:[#allocation1 + $0x23] ss:$4 sm:$0xff] %v4585_v15  ;;  %v4591_v15 = vmax.f32 %v4501_v53, 0.0 }
 0x593   : > { %v4252_v2 = vrot.slane %v4161_v60, 2  ;;  %v4253_v8 = vrot.slane %v4161_v60, 4  ;;  %v4254_v50 = vrot.slane %v4161_v60, 6  ;;  %v4958_v54 = vld.sshfl [vmem:[#allocation1] sm:$0xff pattern:$0x73625140]  ;;  %v4403_v46 = vadd.f32 %v4161_v60, %v3711_v21 }
 0x594   : > { %v9201_v52 = vld [vmem:[#allocation3 + $0x3c] sm:$0xff]  ;;  %4960 = vst [vmem:[#allocation1] ss:$4 sm:$0xff] %v4586_v23  ;;  %v5046_v5 = vsel %vm4676_vm7, %v4958_v54, 0.0  ;;  %v4590_v21 = vmax.f32 %v4500_v40, 0.0  ;;  %vm4632_vm9 = vcmp.ge.s32.totalorder %v4622_v32, 0 }
 0x595   : > { %v4404_v1 = vadd.f32 %v4252_v2, %v3801_v20  ;;  %v4405_v0 = vadd.f32 %v4253_v8, %v3802_v26  ;;  %v4406_v61 = vadd.f32 %v4254_v50, %v3803_v22  ;;  %v5296_v27 = vshll.u32 %v9201_v52, 16 }
 0x596   : > { %v5076_v10 = vpack.c.bf16 %v5046_v5, %v5046_v5  ;;  %v4502_v33 = vadd.f32 %v8696_v11, %v4403_v46  ;;  %v5360_v31 = vrot.slane %v9201_v52, 1  ;;  %v5294_v20 = vshrl.u32 %v9201_v52, 16 }
 0x597   : > { %v4503_v4 = vadd.f32 %v8699_v18, %v4404_v1  ;;  %v4504_v48 = vadd.f32 %v8707_v7, %v4405_v0  ;;  %v4505_v19 = vadd.f32 %v9124_v39, %v4406_v61  ;;  %v5298_v23 = vrot.slane %v5296_v27, 1 }
 0x598   : > { %v5137_v29 = vld [vmem:[#allocation3 + $0x44] sm:$0x1]  ;;  %5108 = vst.msk [vmem:[#allocation3 + $0x48] sm:$0xf] %vm5088_vm10, %v5076_v10  ;;  %v4592_v14 = vmax.f32 %v4502_v33, 0.0  ;;  %vm4642_vm12 = vcmp.lt.s32.totalorder %v4622_v32, 16  ;;  %v3716_v5 = vadd.f32 %v9009_v41, %v8555_v36  ;;  %v9253_v36 = vadd.f32 %v9036_v58, %v8565_v35 }
 0x599   : > { %v5222_v30 = vunpack.c.l.b16 %v5137_v29  ;;  %v4959_v25 = vld.sshfl [vmem:[#allocation1 + $0x20] sm:$0xff pattern:$0x73625140]  ;;  %v4593_v2 = vmax.f32 %v4503_v4, 0.0  ;;  %v5299_v62 = vor.u32 %v5298_v23, %v5294_v20  ;;  %v3804_v1 = vrot.slane %v3714_v42, 2  ;;  %vm9246_vm3 = vmand %vm4632_vm9, %vm4642_vm12 }
 0x59a   : > { %v9204_v34 = vpop.f32.mrf.mxu0  ;;  %v5047_v49 = vsel %vm9187_vm4, %v4959_v25, 0.0  ;;  %4962 = vst [vmem:[#allocation1 + $0x20] ss:$4 sm:$0xff] %v4587_v51  ;;  %v4594_v26 = vmax.f32 %v4504_v48, 0.0  ;;  %v3805_v40 = vrot.slane %v3714_v42, 4  ;;  %v3806_v0 = vrot.slane %v3714_v42, 6  ;;  %vm4679_vm11 = vmand %vm9246_vm3, %vm4655_vm14 }
 0x59b   : > { %v5230_v44 = vpack.c.b16 %v5222_v30, %v5222_v30  ;;  %v4961_v38 = vld.sshfl [vmem:[#allocation1] sm:$0xff pattern:$0x73625140]  ;;  %4963 = vst [vmem:[#allocation1 + $0x21] ss:$4 sm:$0xff] %v4588_v63  ;;  %v5077_v43 = vpack.c.bf16 %v5047_v49, %v5047_v49  ;;  %v4255_v8 = vrot.slane %v9204_v34, 2  ;;  %v4407_v53 = vadd.f32 %v9204_v34, %v3714_v42  ;;  %vm9278_vm15 = vmand %vm9246_vm3, %vm4690_vm5 }
 0x59c   : > { %v5048_v59 = vsel %vm9217_vm8, %v4961_v38, 0.0  ;;  %4964 = vst [vmem:[#allocation1 + $0x22] ss:$4 sm:$0xff] %v4589_v56  ;;  %v4256_v50 = vrot.slane %v9204_v34, 4  ;;  %v4257_v22 = vrot.slane %v9204_v34, 6  ;;  %v4595_v61 = vmax.f32 %v4505_v19, 0.0 }
 0x59d   : > { %v5361_v45 = vrot.slane %v5230_v44, 1  ;;  %v5301_v12 = vshll.u32 %v5230_v44, 16  ;;  %4965 = vst [vmem:[#allocation1 + $0x23] ss:$4 sm:$0xff] %v4590_v21  ;;  %v5078_v46 = vpack.c.bf16 %v5048_v59, %v5048_v59  ;;  %v4408_v27 = vadd.f32 %v4255_v8, %v3804_v1 }
 0x59e   : > { %5109 = vst.msk [vmem:[#allocation3 + $0x4c] sm:$0xf] %vm5088_vm10, %v5077_v43  ;;  %v4409_v10 = vadd.f32 %v4256_v50, %v3805_v40  ;;  %v4410_v41 = vadd.f32 %v4257_v22, %v3806_v0  ;;  %v3807_v63 = vrot.slane %v3716_v5, 2  ;;  %v4506_v56 = vadd.f32 %v9124_v39, %v4407_v53 }
 0x59f   : > { %v5362_v54 = vsel %vm691_vm0, %v5360_v31, %v5361_v45  ;;  %v5303_v6 = vrot.slane %v5301_v12, 1  ;;  %4967 = vst [vmem:[#allocation1] ss:$4 sm:$0xff] %v4591_v15  ;;  %v3808_v21 = vrot.slane %v3716_v5, 4  ;;  %v4507_v35 = vadd.f32 %v8696_v11, %v4408_v27 }
 0x5a0   : > { %5379 = vrot.lane.b32.xlu2 %v5362_v54, %s6404_s20  ;;  %5110 = vst.msk [vmem:[#allocation3 + $0x50] sm:$0x1] %vm5091_vm13, %v5078_v46  ;;  %v4508_v60 = vadd.f32 %v8699_v18, %v4409_v10  ;;  %v3809_v49 = vrot.slane %v3716_v5, 6  ;;  %v3810_v32 = vrot.slane %v9253_v36, 2  ;;  %v4509_v48 = vadd.f32 %v8707_v7, %v4410_v41 }
 0x5a1   : > { %v5304_v51 = vsel %vm462_vm1, %v5299_v62, %v5303_v6  ;;  %4968 = vst [vmem:[#allocation1 + $0x1] ss:$4 sm:$0xff] %v4592_v14  ;;  %v4596_v23 = vmax.f32 %v4506_v56, 0.0  ;;  %v4597_v59 = vmax.f32 %v4507_v35, 0.0 }
 0x5a2   : > { %v4166_v28 = vpop.f32.mrf.mxu0  ;;  %5339 = vrot.lane.b32.xlu1 %v5304_v51, %s6405_s12  ;;  %4969 = vst [vmem:[#allocation1 + $0x2] ss:$4 sm:$0xff] %v4593_v2  ;;  %v4598_v20 = vmax.f32 %v4508_v60, 0.0  ;;  %v4623_v51 = vadd.s32 8, %v8756_v47  ;;  %v4599_v53 = vmax.f32 %v4509_v48, 0.0  ;;  %v3721_v60 = vadd.f32 %v9067_v24, %v8570_v55 }
 0x5a3   : > { %v4258_v34 = vrot.slane %v4166_v28, 2  ;;  %4970 = vst [vmem:[#allocation1 + $0x3] ss:$4 sm:$0xff] %v4594_v26  ;;  %v4259_v58 = vrot.slane %v4166_v28, 4  ;;  %v4260_v30 = vrot.slane %v4166_v28, 6  ;;  %v4411_v25 = vadd.f32 %v4166_v28, %v3716_v5 }
 0x5a4   : > { %v4966_v29 = vld.sshfl [vmem:[#allocation1 + $0x20] sm:$0xff pattern:$0x73625140]  ;;  %vm4633_vm6 = vcmp.ge.s32.totalorder %v4623_v51, 0  ;;  %vm4643_vm4 = vcmp.lt.s32.totalorder %v4623_v51, 16 }
 0x5a5   : > { %v9260_v33 = vld [vmem:[#allocation3 + $0x48] sm:$0xff]  ;;  %4971 = vst [vmem:[#allocation1 + $0x20] ss:$4 sm:$0xff] %v4595_v61  ;;  %v5049_v15 = vsel %vm4679_vm11, %v4966_v29, 0.0  ;;  %v4412_v19 = vadd.f32 %v4258_v34, %v3807_v63  ;;  %v4413_v43 = vadd.f32 %v4259_v58, %v3808_v21  ;;  %v4414_v31 = vadd.f32 %v4260_v30, %v3809_v49  ;;  %vm9310_vm7 = vmand %vm4633_vm6, %vm4643_vm4 }
 0x5a6   : > { %v5308_v42 = vshll.u32 %v9260_v33, 16  ;;  %v5079_v2 = vpack.c.bf16 %v5049_v15, %v5049_v15  ;;  %v5306_v45 = vshrl.u32 %v9260_v33, 16  ;;  %v4510_v12 = vadd.f32 %v9124_v39, %v4411_v25  ;;  %v5122_v15 = vld [vmem:[#allocation3 + $0x8] sm:$0x1]  ;;  %vm4682_vm8 = vmand %vm9310_vm7, %vm4655_vm14 }
 0x5a7   : > { %v5140_v44 = vld [vmem:[#allocation3 + $0x50] sm:$0x1]  ;;  %v4511_v50 = vadd.f32 %v8696_v11, %v4412_v19  ;;  %v5363_v54 = vrot.slane %v9260_v33, 1  ;;  %v4512_v0 = vadd.f32 %v8699_v18, %v4413_v43  ;;  %v4513_v61 = vadd.f32 %v8707_v7, %v4414_v31  ;;  %vm9345_vm9 = vmand %vm9310_vm7, %vm4690_vm5 }
 0x5a8   : > { %v5223_v38 = vunpack.c.l.b16 %v5140_v44  ;;  %v5310_v14 = vrot.slane %v5308_v42, 1  ;;  %5111 = vst.msk [vmem:[#allocation3 + $0x54] sm:$0xf] %vm5088_vm10, %v5079_v2  ;;  %v4600_v63 = vmax.f32 %v4510_v12, 0.0  ;;  %v3811_v30 = vrot.slane %v9253_v36, 4 }
 0x5a9   : > { %v4601_v56 = vmax.f32 %v4511_v50, 0.0  ;;  %v4602_v25 = vmax.f32 %v4512_v0, 0.0  ;;  %v4603_v49 = vmax.f32 %v4513_v61, 0.0  ;;  %vm5467_vm6 = vcmask 392192  }
 0x5aa   : > { %v9262_v4 = vpop.f32.mrf.mxu0  ;;  %v5231_v28 = vpack.c.b16 %v5223_v38, %v5223_v38  ;;  %v4972_v8 = vld.sshfl [vmem:[#allocation1] sm:$0xff pattern:$0x73625140]  ;;  %v5311_v62 = vor.u32 %v5310_v14, %v5306_v45  ;;  %v3813_v14 = vrot.slane %v3721_v60, 2  ;;  %v3814_v45 = vrot.slane %v3721_v60, 4 }
 0x5ab   : > { %v5050_v46 = vsel %vm9246_vm3, %v4972_v8, 0.0  ;;  %4974 = vst [vmem:[#allocation1] ss:$4 sm:$0xff] %v4596_v23  ;;  %v4415_v27 = vadd.f32 %v9262_v4, %v9253_v36  ;;  %v4261_v41 = vrot.slane %v9262_v4, 2  ;;  %v4262_v29 = vrot.slane %v9262_v4, 4 }
 0x5ac   : > { %v5364_v1 = vrot.slane %v5231_v28, 1  ;;  %v5313_v26 = vshll.u32 %v5231_v28, 16  ;;  %v4973_v40 = vld.sshfl [vmem:[#allocation1 + $0x20] sm:$0xff pattern:$0x73625140]  ;;  %v5080_v5 = vpack.c.bf16 %v5050_v46, %v5050_v46  ;;  %v4263_v21 = vrot.slane %v9262_v4, 6 }
 0x5ad   : > { %4975 = vst [vmem:[#allocation1 + $0x1] ss:$4 sm:$0xff] %v4597_v59  ;;  %v5051_v34 = vsel %vm9278_vm15, %v4973_v40, 0.0  ;;  %v4514_v42 = vadd.f32 %v9124_v39, %v4415_v27  ;;  %v3812_v4 = vrot.slane %v9253_v36, 6  ;;  %v4416_v48 = vadd.f32 %v4261_v41, %v3810_v32  ;;  %v9315_v36 = vld [vmem:[#allocation3] sm:$0xff] }
 0x5ae   : > { %v5365_v3 = vsel %vm691_vm0, %v5363_v54, %v5364_v1  ;;  %v5315_v10 = vrot.slane %v5313_v26, 1  ;;  %5112 = vst.msk [vmem:[#allocation3 + $0x58] sm:$0xf] %vm5088_vm10, %v5080_v5  ;;  %v5081_v58 = vpack.c.bf16 %v5051_v34, %v5051_v34  ;;  %v4417_v19 = vadd.f32 %v4262_v29, %v3811_v30 }
 0x5af   : > { %5381 = vrot.lane.b32.xlu1 %v5365_v3, %s6404_s20  ;;  %4976 = vst [vmem:[#allocation1 + $0x2] ss:$4 sm:$0xff] %v4598_v20  ;;  %v4418_v24 = vadd.f32 %v4263_v21, %v3812_v4  ;;  %v5217_v32 = vunpack.c.l.b16 %v5122_v15  ;;  %v4604_v2 = vmax.f32 %v4514_v42, 0.0  ;;  %v3815_v20 = vrot.slane %v3721_v60, 6 }
 0x5b0   : > { %v5316_v35 = vsel %vm462_vm1, %v5311_v62, %v5315_v10  ;;  %4977 = vst [vmem:[#allocation1 + $0x3] ss:$4 sm:$0xff] %v4599_v53  ;;  %v4515_v12 = vadd.f32 %v9124_v39, %v4416_v48  ;;  %v3724_v28 = vadd.f32 %v9093_v9, %v8579_v13  ;;  %v4516_v8 = vadd.f32 %v8696_v11, %v4417_v19 }
 0x5b1   : > { %5341 = vrot.lane.b32.xlu0 %v5316_v35, %s6405_s12  ;;  %5113 = vst.msk [vmem:[#allocation3 + $0x5c] sm:$0x1] %vm5091_vm13, %v5081_v58  ;;  %v4517_v62 = vadd.f32 %v8699_v18, %v4418_v24  ;;  %v9331_v46 = vpack.c.b16 %v5217_v32, %v5217_v32  ;;  %v5236_v1 = vshll.u32 %v9315_v36, 16  ;;  %v6297_v24 = vld [vmem:[%s9586_s5 + $0x40] sm:$0xff]  ;;  %vm5385_vm15 = vcmask 130048  }
 0x5b2   : > { %v9284_v22 = vpop.f32.mrf.mxu0  ;;  %4978 = vst [vmem:[#allocation1 + $0x20] ss:$4 sm:$0xff] %v4600_v63  ;;  %v4605_v9 = vmax.f32 %v4515_v12, 0.0  ;;  %v3816_v27 = vrot.slane %v3724_v28, 2  ;;  %v4606_v3 = vmax.f32 %v4516_v8, 0.0  ;;  %5658 = vmatpush.bf16.msra.mxu1 %v6297_v24 }
 0x5b3   : > { %v4264_v44 = vrot.slane %v9284_v22, 2  ;;  %v4265_v23 = vrot.slane %v9284_v22, 4  ;;  %4979 = vst [vmem:[#allocation1 + $0x21] ss:$4 sm:$0xff] %v4601_v56  ;;  %v4266_v59 = vrot.slane %v9284_v22, 6  ;;  %v4419_v43 = vadd.f32 %v9284_v22, %v3721_v60 }
 0x5b4   : > { %4980 = vst [vmem:[#allocation1 + $0x22] ss:$4 sm:$0xff] %v4602_v25  ;;  %v4607_v34 = vmax.f32 %v4517_v62, 0.0  ;;  %v5241_v19 = vshll.u32 %v9331_v46, 16  ;;  %v5238_v55 = vrot.slane %v5236_v1, 1  ;;  %v6358_v62 = vld [vmem:[#allocation3 + $0xc] sm:$0xff] }
 0x5b5   : > { %v9319_v31 = vld [vmem:[#allocation3 + $0x54] sm:$0xff]  ;;  %4981 = vst [vmem:[#allocation1 + $0x23] ss:$4 sm:$0xff] %v4603_v49  ;;  %v4420_v50 = vadd.f32 %v4264_v44, %v3813_v14  ;;  %v4421_v6 = vadd.f32 %v4265_v23, %v3814_v45  ;;  %v4422_v22 = vadd.f32 %v4266_v59, %v3815_v20  ;;  %v4518_v40 = vadd.f32 %v8707_v7, %v4419_v43 }
 0x5b6   : > { %v5320_v54 = vshll.u32 %v9319_v31, 16  ;;  %v5318_v29 = vshrl.u32 %v9319_v31, 16  ;;  %v5366_v30 = vrot.slane %v9319_v31, 1  ;;  %v5243_v8 = vrot.slane %v5241_v19, 1 }
 0x5b7   : > { %v4982_v26 = vld.sshfl [vmem:[#allocation1] sm:$0xff pattern:$0x73625140]  ;;  %v4519_v10 = vadd.f32 %v9124_v39, %v4420_v50  ;;  %v4520_v63 = vadd.f32 %v8696_v11, %v4421_v6  ;;  %v4521_v35 = vadd.f32 %v8699_v18, %v4422_v22  ;;  %v4608_v58 = vmax.f32 %v4518_v40, 0.0  ;;  %v5332_v50 = vpop.permute.xlu2 %5331 }
 0x5b8   : > { %v5143_v5 = vld [vmem:[#allocation3 + $0x5c] sm:$0x1]  ;;  %4984 = vst [vmem:[#allocation1] ss:$4 sm:$0xff] %v4604_v2  ;;  %v5052_v13 = vsel %vm4682_vm8, %v4982_v26, 0.0  ;;  %v5322_v0 = vrot.slane %v5320_v54, 1  ;;  %v5389_v6 = vsel %vm5385_vm15, %v6358_v62, %v5332_v50 }
 0x5b9   : > { %v5224_v53 = vunpack.c.l.b16 %v5143_v5  ;;  %v5082_v61 = vpack.c.bf16 %v5052_v13, %v5052_v13  ;;  %v4609_v18 = vmax.f32 %v4519_v10, 0.0  ;;  %v4610_v14 = vmax.f32 %v4520_v63, 0.0 }
 0x5ba   : > { %v4174_v38 = vpop.f32.mrf.mxu0  ;;  %v5323_v15 = vor.u32 %v5322_v0, %v5318_v29  ;;  %v4624_v2 = vadd.s32 9, %v8756_v47  ;;  %v4611_v59 = vmax.f32 %v4521_v35, 0.0 }
 0x5bb   : > { %v4267_v51 = vrot.slane %v4174_v38, 2  ;;  %v4423_v41 = vadd.f32 %v4174_v38, %v3724_v28  ;;  %v5232_v56 = vpack.c.b16 %v5224_v53, %v5224_v53  ;;  %5114 = vst.msk [vmem:[#allocation3 + $0x60] sm:$0xf] %vm5088_vm10, %v5082_v61  ;;  %v5234_v28 = vshrl.u32 %v9315_v36, 16 }
 0x5bc   : > { %v4983_v25 = vld.sshfl [vmem:[#allocation1 + $0x20] sm:$0xff pattern:$0x73625140]  ;;  %vm4634_vm12 = vcmp.ge.s32.totalorder %v4624_v2, 0  ;;  %vm4644_vm3 = vcmp.lt.s32.totalorder %v4624_v2, 16 }
 0x5bd   : > { %v4424_v60 = vadd.f32 %v4267_v51, %v3816_v27  ;;  %v5367_v42 = vrot.slane %v5232_v56, 1  ;;  %v5325_v4 = vshll.u32 %v5232_v56, 16  ;;  %v5053_v49 = vsel %vm9310_vm7, %v4983_v25, 0.0  ;;  %4986 = vst [vmem:[#allocation1 + $0x20] ss:$4 sm:$0xff] %v4605_v9  ;;  %vm9367_vm11 = vmand %vm4634_vm12, %vm4644_vm3  ;;  %v6289_v2 = vld [vmem:[%s9586_s5] sm:$0xff] }
 0x5be   : > { %v4522_v48 = vadd.f32 %v8707_v7, %v4423_v41  ;;  %v5083_v44 = vpack.c.bf16 %v5053_v49, %v5053_v49  ;;  %4987 = vst [vmem:[#allocation1 + $0x21] ss:$4 sm:$0xff] %v4606_v3  ;;  %v5239_v54 = vor.u32 %v5238_v55, %v5234_v28  ;;  %vm4685_vm4 = vmand %vm9367_vm11, %vm4655_vm14  ;;  %v5346_v25 = vrot.slane %v9331_v46, 1  ;;  %5560 = vmatpush.bf16.msra.mxu2 %v6289_v2 }
 0x5bf   : > { %v5368_v23 = vsel %vm691_vm0, %v5366_v30, %v5367_v42  ;;  %v5327_v38 = vrot.slane %v5325_v4, 1  ;;  %v4985_v32 = vld.sshfl [vmem:[#allocation1] sm:$0xff pattern:$0x73625140]  ;;  %4988 = vst [vmem:[#allocation1 + $0x22] ss:$4 sm:$0xff] %v4607_v34  ;;  %v4523_v45 = vadd.f32 %v9124_v39, %v4424_v60  ;;  %vm4720_vm14 = vmand %vm9367_vm11, %vm4690_vm5 }
 0x5c0   : > { %5383 = vrot.lane.b32.xlu0 %v5368_v23, %s6404_s20  ;;  %v5054_v7 = vsel %vm9345_vm9, %v4985_v32, 0.0  ;;  %5115 = vst.msk [vmem:[#allocation3 + $0x64] sm:$0xf] %vm5088_vm10, %v5083_v44  ;;  %v4612_v12 = vmax.f32 %v4522_v48, 0.0  ;;  %v5244_v1 = vsel %vm462_vm1, %v5239_v54, %v5243_v8  ;;  %v6359_v44 = vld [vmem:[#allocation3 + $0x18] sm:$0xff] }
 0x5c1   : > { %v5328_v43 = vsel %vm462_vm1, %v5323_v15, %v5327_v38  ;;  %v5084_v20 = vpack.c.bf16 %v5054_v7, %v5054_v7  ;;  %4989 = vst [vmem:[#allocation1 + $0x23] ss:$4 sm:$0xff] %v4608_v58  ;;  %v4613_v39 = vmax.f32 %v4523_v45, 0.0  ;;  %v5345_v15 = vrot.slane %v9315_v36, 1 }
 0x5c2   : > { %v4176_v21 = vpop.f32.mrf.mxu0  ;;  %5343 = vrot.lane.b32.xlu2 %v5328_v43, %s6405_s12  ;;  %4991 = vst [vmem:[#allocation1] ss:$4 sm:$0xff] %v4609_v18 }
 0x5c3   : > { %5116 = vst.msk [vmem:[#allocation3 + $0x68] sm:$0x1] %vm5091_vm13, %v5084_v20  ;;  %v5347_v11 = vsel %vm691_vm0, %v5345_v15, %v5346_v25 }
 0x5c4   : > { %4992 = vst [vmem:[#allocation1 + $0x1] ss:$4 sm:$0xff] %v4610_v14 }
 0x5c5   : > { %4993 = vst [vmem:[#allocation1 + $0x2] ss:$4 sm:$0xff] %v4611_v59  ;;  %v6296_v59 = vld [vmem:[%s9586_s5 + $0x38] sm:$0xff] }
 0x5c6   : > { %4994 = vst [vmem:[#allocation1 + $0x3] ss:$4 sm:$0xff] %v4612_v12  ;;  %5659 = vmatpush.bf16.msra.mxu1 %v6296_v59 }
 0x5c7   : > { %v9377_v22 = vld [vmem:[#allocation3 + $0x60] sm:$0xff] }
 0x5c8   : > { %5329 = vrot.lane.b32.xlu0 %v5244_v1, %s6405_s12  ;;  %v4990_v5 = vld.sshfl [vmem:[#allocation1 + $0x20] sm:$0xff pattern:$0x73625140]  ;;  %v5429_v16 = vshll.u32 %v9377_v22, 16  ;;  %v5440_v3 = vrot.slane %v9377_v22, 1  ;;  %v5427_v34 = vshrl.u32 %v9377_v22, 16 }
 0x5c9   : > { %4995 = vst [vmem:[#allocation1 + $0x20] ss:$4 sm:$0xff] %v4613_v39  ;;  %v5055_v51 = vsel %vm4685_vm4, %v4990_v5, 0.0  ;;  %v5374_v19 = vpop.permute.xlu2 %5373 }
 0x5ca   : > { %v5146_v13 = vld [vmem:[#allocation3 + $0x68] sm:$0x1]  ;;  %v5085_v9 = vpack.c.bf16 %v5055_v51, %v5055_v51  ;;  %v5431_v61 = vrot.slane %v5429_v16, 1 }
 0x5cb   : > { %v5372_v26 = vpop.permute.xlu0 %5371  ;;  %v5424_v53 = vunpack.c.l.b16 %v5146_v13 }
 0x5cc   : > { %v9381_v40 = vsel %vm2963_vm2, %v5389_v6, %v5372_v26  ;;  %5117 = vst.msk [vmem:[#allocation3 + $0x6c] sm:$0xf] %vm5088_vm10, %v5085_v9  ;;  %v5432_v35 = vor.u32 %v5431_v61, %v5427_v34 }
 0x5cd   : > { %6178 = vmatmul.msk.bf16.vlgmr.msrb.gmra.mxu1 %vm5467_vm6, %v9381_v40  ;;  %v5425_v0 = vpack.c.b16 %v5424_v53, %v5424_v53  ;;  %v4996_v27 = vld.sshfl [vmem:[#allocation1] sm:$0xff pattern:$0x73625140] }
 0x5ce   : > { %v5056_v10 = vsel %vm9367_vm11, %v4996_v27, 0.0 }
 0x5cf   : > { %v5441_v41 = vrot.slane %v5425_v0, 1  ;;  %v5434_v63 = vshll.u32 %v5425_v0, 16  ;;  %v5086_v56 = vpack.c.bf16 %v5056_v10, %v5056_v10 }
 0x5d0   : > { %v4997_v29 = vld.sshfl [vmem:[#allocation1 + $0x20] sm:$0xff pattern:$0x73625140] }
 0x5d1   : > { %v5442_v21 = vsel %vm691_vm0, %v5440_v3, %v5441_v41  ;;  %v5436_v58 = vrot.slane %v5434_v63, 1  ;;  %v5057_v30 = vsel %vm4720_vm14, %v4997_v29, 0.0  ;;  %5118 = vst.msk [vmem:[#allocation3 + $0x70] sm:$0xf] %vm5088_vm10, %v5086_v56 }
 0x5d2   : > { %5443 = vrot.lane.b32.xlu2 %v5442_v21, %s6404_s20  ;;  %v5087_v17 = vpack.c.bf16 %v5057_v30, %v5057_v30 }
 0x5d3   : > { %v5437_v60 = vsel %vm462_vm1, %v5432_v35, %v5436_v58 }
 0x5d4   : > { %5438 = vrot.lane.b32.xlu1 %v5437_v60, %s6405_s12  ;;  %5119 = vst.msk [vmem:[#allocation3 + $0x74] sm:$0x1] %vm5091_vm13, %v5087_v17 }
 0x5d8   : > { %v9402_v42 = vld [vmem:[#allocation3 + $0x6c] sm:$0xff] }
 0x5d9   : > { %v5613_v4 = vshll.u32 %v9402_v42, 16  ;;  %v5624_v32 = vrot.slane %v9402_v42, 1  ;;  %v5611_v55 = vshrl.u32 %v9402_v42, 16 }
 0x5db   : > { %v5149_v49 = vld [vmem:[#allocation3 + $0x74] sm:$0x1]  ;;  %v5615_v38 = vrot.slane %v5613_v4, 1 }
 0x5dc   : > { %5369 = vrot.lane.b32.xlu1 %v5347_v11, %s6404_s20  ;;  %v5608_v18 = vunpack.c.l.b16 %v5149_v49 }
 0x5dd   : > { %v5616_v45 = vor.u32 %v5615_v38, %v5611_v55  ;;  %v9500_v38 = vld [vmem:[%s9587_s6] ss:$0 sm:$0xff] }
 0x5de   : > { %v5609_v23 = vpack.c.b16 %v5608_v18, %v5608_v18 }
 0x5e0   : > { %v5625_v14 = vrot.slane %v5609_v23, 1  ;;  %v5618_v7 = vshll.u32 %v5609_v23, 16 }
 0x5e2   : > { %v5626_v43 = vsel %vm691_vm0, %v5624_v32, %v5625_v14  ;;  %v5620_v20 = vrot.slane %v5618_v7, 1  ;;  %vm5737_vm0 = vcmask 97280  }
 0x5e3   : > { %v5334_v48 = vpop.permute.xlu1 %5333  ;;  %5627 = vrot.lane.b32.xlu0 %v5626_v43, %s6404_s20 }
 0x5e4   : > { %v5391_v24 = vsel %vm5385_vm15, %v6359_v44, %v5334_v48  ;;  %v5621_v12 = vsel %vm462_vm1, %v5616_v45, %v5620_v20 }
 0x5e5   : > { %v5407_v46 = vsel %vm2963_vm2, %v5391_v24, %v5374_v19  ;;  %5622 = vrot.lane.b32.xlu2 %v5621_v12, %s6405_s12  ;;  %s5856_s12 = sshll.u32 %s9934_s25, 5 }
 0x5e6   : > { %6179 = vmatmul.msk.bf16.gmra.mxu1 %vm5467_vm6, %v5407_v46  ;;  %s312_s13 = sadd.s32 %s5856_s12, %s5855_s11 }
 0x5e7   : > { %s5857_s14 = sshll.u32 %s312_s13, 3 }
 0x5e8   : > { %s9505_s22 = scalar_lea.vmem %s9588_s7, %s5857_s14 }
 0x5eb   : > { %v5376_v8 = vpop.permute.xlu1 %5375  ;;  %v5338_v39 = vpop.permute.xlu2 %5337 }
 0x5ec   : > { %v5395_v54 = vsel %vm5385_vm15, %v9110_v57, %v5338_v39 }
 0x5ed   : > { %v5336_v28 = vpop.permute.xlu0 %5335 }
 0x5ee   : > { %v5393_v47 = vsel %vm5385_vm15, %v9046_v37, %v5336_v28  ;;  %v6295_v37 = vld [vmem:[%s9586_s5 + $0x30] sm:$0xff] }
 0x5ef   : > { %v5409_v50 = vsel %vm2963_vm2, %v5393_v47, %v5376_v8  ;;  %5660 = vmatpush.bf16.msra.mxu1 %v6295_v37 }
 0x5f6   : > { %6180 = vmatmul.msk.bf16.gmra.mxu1 %vm5467_vm6, %v5409_v50 }
 0x5fa   : > { %v5380_v26 = vpop.permute.xlu2 %5379 }
 0x601   : > { %v5378_v62 = vpop.permute.xlu0 %5377 }
 0x602   : > { %v5411_v6 = vsel %vm2963_vm2, %v5395_v54, %v5378_v62 }
 0x606   : > { %6181 = vmatmul.msk.bf16.gmra.mxu1 %vm5467_vm6, %v5411_v6 }
 0x614   : > { %v5340_v1 = vpop.permute.xlu1 %5339 }
 0x615   : > { %v5397_v5 = vsel %vm5385_vm15, %v9201_v52, %v5340_v1 }
 0x616   : > { %v5413_v16 = vsel %vm2963_vm2, %v5397_v5, %v5380_v26 }
 0x617   : > { %6182 = vmatmul.msk.bf16.gmra.mxu1 %vm5467_vm6, %v5413_v16 }
 0x61c   : > { %v5344_v53 = vpop.permute.xlu2 %5343 }
 0x61d   : > { %v5401_v0 = vsel %vm5385_vm15, %v9319_v31, %v5344_v53 }
 0x621   : > { %v5382_v51 = vpop.permute.xlu1 %5381 }
 0x623   : > { %v5342_v57 = vpop.permute.xlu0 %5341 }
 0x624   : > { %v5399_v13 = vsel %vm5385_vm15, %v9260_v33, %v5342_v57 }
 0x625   : > { %v5415_v9 = vsel %vm2963_vm2, %v5399_v13, %v5382_v51 }
 0x627   : > { %6183 = vmatmul.msk.bf16.gmra.mxu1 %vm5467_vm6, %v5415_v9 }
 0x62c   : > { %v5444_v3 = vpop.permute.xlu2 %5443 }
 0x632   : > { %v5384_v52 = vpop.permute.xlu0 %5383 }
 0x633   : > { %v5417_v61 = vsel %vm2963_vm2, %v5401_v0, %v5384_v52 }
 0x637   : > { %6184 = vmatmul.msk.bf16.gmra.mxu1 %vm5467_vm6, %v5417_v61 }
 0x63a   : > { %v5330_v41 = vpop.permute.xlu0 %5329 }
 0x63b   : > { %v5387_v63 = vsel %vm5385_vm15, %v9315_v36, %v5330_v41 }
 0x63f   : > { %v5623_v11 = vpop.permute.xlu2 %5622 }
 0x640   : > { %v5630_v48 = vsel %vm5385_vm15, %v9402_v42, %v5623_v11 }
 0x646   : > { %v5439_v27 = vpop.permute.xlu1 %5438 }
 0x647   : > { %v5446_v10 = vsel %vm5385_vm15, %v9377_v22, %v5439_v27 }
 0x648   : > { %v5448_v33 = vsel %vm2963_vm2, %v5446_v10, %v5444_v3 }
 0x649   : > { %6185 = vmatmul.msk.bf16.gmra.mxu1 %vm5467_vm6, %v5448_v33 }
 0x64a   : > { %v5493_v34 = vpop.f32.mrf.mxu1 }
 0x64e   : > { %v5370_v56 = vpop.permute.xlu1 %5369 }
 0x64f   : > { %v5403_v31 = vsel %vm2963_vm2, %v5387_v63, %v5370_v56 }
 0x650   : > { %6198 = vmatmul.msk.bf16.vlgmr.msra.gmra.mxu2 %vm5467_vm6, %v5403_v31 }
 0x652   : > { %v5495_v29 = vpop.f32.mrf.mxu1 }
 0x655   : > { %v5628_v49 = vpop.permute.xlu0 %5627 }
 0x656   : > { %v5632_v19 = vsel %vm2963_vm2, %v5630_v48, %v5628_v49 }
 0x659   : > { %6222 = vmatmul.msk.bf16.vlgmr.msra.gmra.mxu1 %vm5467_vm6, %v5407_v46 }
 0x660   : > { %6199 = vmatmul.msk.bf16.gmra.mxu2 %vm5467_vm6, %v9381_v40 }
 0x663   : > { %v5498_v21 = vpop.f32.mrf.mxu1 }
 0x669   : > { %6223 = vmatmul.msk.bf16.gmra.mxu1 %vm5467_vm6, %v5409_v50 }
 0x66b   : > { %v5500_v22 = vpop.f32.mrf.mxu1 }
 0x670   : > { %6200 = vmatmul.msk.bf16.gmra.mxu2 %vm5467_vm6, %v5407_v46 }
 0x673   : > { %v5503_v35 = vpop.f32.mrf.mxu1 }
 0x679   : > { %6224 = vmatmul.msk.bf16.gmra.mxu1 %vm5467_vm6, %v5411_v6 }
 0x67b   : > { %v9459_v58 = vpop.f32.mrf.mxu1 }
 0x680   : > { %6201 = vmatmul.msk.bf16.gmra.mxu2 %vm5467_vm6, %v5409_v50 }
 0x683   : > { %v9462_v36 = vpop.f32.mrf.mxu1 }
 0x689   : > { %6225 = vmatmul.msk.bf16.gmra.mxu1 %vm5467_vm6, %v5413_v16 }
 0x68b   : > { %v9466_v30 = vpop.f32.mrf.mxu1 }
 0x690   : > { %6202 = vmatmul.msk.bf16.gmra.mxu2 %vm5467_vm6, %v5411_v6 }
 0x694   : > { %v9469_v40 = vpop.f32.mrf.mxu1 }
 0x699   : > { %6226 = vmatmul.msk.bf16.gmra.mxu1 %vm5467_vm6, %v5415_v9 }
 0x69c   : > { %v9472_v17 = vpop.f32.mrf.mxu1 }
 0x6a0   : > { %6203 = vmatmul.msk.bf16.gmra.mxu2 %vm5467_vm6, %v5413_v16 }
 0x6a4   : > { %v9475_v60 = vpop.f32.mrf.mxu1 }
 0x6a9   : > { %6227 = vmatmul.msk.bf16.gmra.mxu1 %vm5467_vm6, %v5417_v61 }
 0x6ac   : > { %v9478_v25 = vpop.f32.mrf.mxu1 }
 0x6b0   : > { %6204 = vmatmul.msk.bf16.gmra.mxu2 %vm5467_vm6, %v5415_v9 }
 0x6b4   : > { %v9481_v15 = vpop.f32.mrf.mxu1 }
 0x6b9   : > { %6228 = vmatmul.msk.bf16.gmra.mxu1 %vm5467_vm6, %v5448_v33 }
 0x6bc   : > { %v9484_v4 = vpop.f32.mrf.mxu1 }
 0x6c0   : > { %6205 = vmatmul.msk.bf16.gmra.mxu2 %vm5467_vm6, %v5417_v61 }
 0x6c6   : > { %v9487_v18 = vpop.f32.mrf.mxu1 }
 0x6c9   : > { %6229 = vmatmul.msk.bf16.gmra.mxu1 %vm5467_vm6, %v5632_v19 }
 0x6ce   : > { %v9493_v44 = vpop.f32.mrf.mxu1 }
 0x6d3   : > { %v5562_v24 = vpop.f32.mrf.mxu2 }
 0x6d4   : > { %v5563_v23 = vadd.f32 %v5562_v24, %v5493_v34 }
 0x6d6   : > { %v5662_v46 = vpop.f32.mrf.mxu1 }
 0x6d7   : > { %v5702_v32 = vadd.f32 %v5662_v46, %v5563_v23 }
 0x6d9   : > { %v5721_v42 = vadd.f32 %v9500_v38, %v5702_v32 }
 0x6db   : > { %5738 = vst.msk [vmem:[%s9505_s22] sm:$0xff] %vm5737_vm0, %v5721_v42  ;;  %v5564_v14 = vpop.f32.mrf.mxu2 }
 0x6dc   : > { %v5565_v55 = vadd.f32 %v5564_v14, %v5495_v29 }
 0x6de   : > { %v5664_v7 = vpop.f32.mrf.mxu1 }
 0x6df   : > { %v5703_v2 = vadd.f32 %v5664_v7, %v5565_v55 }
 0x6e1   : > { %v5722_v59 = vadd.f32 %v9500_v38, %v5703_v2 }
 0x6e3   : > { %5739 = vst.msk [vmem:[%s9505_s22 + $0x8] sm:$0xff] %vm5737_vm0, %v5722_v59  ;;  %v5567_v43 = vpop.f32.mrf.mxu2 }
 0x6e4   : > { %v5568_v45 = vadd.f32 %v5567_v43, %v5498_v21 }
 0x6e6   : > { %v5667_v20 = vpop.f32.mrf.mxu1 }
 0x6e7   : > { %v5704_v12 = vadd.f32 %v5667_v20, %v5568_v45 }
 0x6e9   : > { %v5723_v28 = vadd.f32 %v9500_v38, %v5704_v12 }
 0x6eb   : > { %5740 = vst.msk [vmem:[%s9505_s22 + $0x10] sm:$0xff] %vm5737_vm0, %v5723_v28  ;;  %v5569_v8 = vpop.f32.mrf.mxu2 }
 0x6ec   : > { %v5570_v47 = vadd.f32 %v5569_v8, %v5500_v22 }
 0x6ee   : > { %v5669_v50 = vpop.f32.mrf.mxu1 }
 0x6ef   : > { %v5705_v39 = vadd.f32 %v5669_v50, %v5570_v47 }
 0x6f1   : > { %v5724_v54 = vadd.f32 %v9500_v38, %v5705_v39 }
 0x6f3   : > { %5741 = vst.msk [vmem:[%s9505_s22 + $0x18] sm:$0xff] %vm5737_vm0, %v5724_v54  ;;  %v5572_v62 = vpop.f32.mrf.mxu2 }
 0x6f4   : > { %v5573_v6 = vadd.f32 %v5572_v62, %v5503_v35 }
 0x6f6   : > { %v5672_v1 = vpop.f32.mrf.mxu1 }
 0x6f7   : > { %v5706_v26 = vadd.f32 %v5672_v1, %v5573_v6 }
 0x6f9   : > { %v5725_v5 = vadd.f32 %v9500_v38, %v5706_v26 }
 0x6fb   : > { %5742 = vst.msk [vmem:[%s9505_s22 + $0x20] sm:$0xff] %vm5737_vm0, %v5725_v5  ;;  %v5574_v37 = vpop.f32.mrf.mxu2 }
 0x6fc   : > { %v5575_v16 = vadd.f32 %v5574_v37, %v9459_v58 }
 0x6fe   : > { %v5674_v57 = vpop.f32.mrf.mxu1 }
 0x6ff   : > { %v5707_v51 = vadd.f32 %v5674_v57, %v5575_v16 }
 0x701   : > { %v5726_v13 = vadd.f32 %v9500_v38, %v5707_v51 }
 0x703   : > { %5743 = vst.msk [vmem:[%s9505_s22 + $0x28] sm:$0xff] %vm5737_vm0, %v5726_v13  ;;  %v5577_v9 = vpop.f32.mrf.mxu2 }
 0x704   : > { %v5578_v53 = vadd.f32 %v5577_v9, %v9462_v36 }
 0x706   : > { %v5677_v52 = vpop.f32.mrf.mxu1 }
 0x707   : > { %v5708_v0 = vadd.f32 %v5677_v52, %v5578_v53 }
 0x709   : > { %v5727_v61 = vadd.f32 %v9500_v38, %v5708_v0 }
 0x70b   : > { %5744 = vst.msk [vmem:[%s9505_s22 + $0x30] sm:$0xff] %vm5737_vm0, %v5727_v61  ;;  %v5579_v27 = vpop.f32.mrf.mxu2 }
 0x70c   : > { %v5580_v3 = vadd.f32 %v5579_v27, %v9466_v30 }
 0x70e   : > { %v5679_v10 = vpop.f32.mrf.mxu1 }
 0x70f   : > { %v5709_v33 = vadd.f32 %v5679_v10, %v5580_v3 }
 0x711   : > { %v5728_v41 = vadd.f32 %v9500_v38, %v5709_v33 }
 0x713   : > { %5745 = vst.msk [vmem:[%s9505_s22 + $0x38] sm:$0xff] %vm5737_vm0, %v5728_v41  ;;  %v5582_v34 = vpop.f32.mrf.mxu2 }
 0x714   : > { %v5583_v63 = vadd.f32 %v5582_v34, %v9469_v40 }
 0x716   : > { %v5682_v56 = vpop.f32.mrf.mxu1 }
 0x717   : > { %v5710_v31 = vadd.f32 %v5682_v56, %v5583_v63 }
 0x719   : > { %v5729_v29 = vadd.f32 %v9500_v38, %v5710_v31 }
 0x71b   : > { %5746 = vst.msk [vmem:[%s9505_s22 + $0x40] sm:$0xff] %vm5737_vm0, %v5729_v29  ;;  %v5584_v21 = vpop.f32.mrf.mxu2 }
 0x71c   : > { %v5585_v22 = vadd.f32 %v5584_v21, %v9472_v17 }
 0x71e   : > { %v5684_v35 = vpop.f32.mrf.mxu1 }
 0x71f   : > { %v5711_v58 = vadd.f32 %v5684_v35, %v5585_v22 }
 0x721   : > { %v5730_v36 = vadd.f32 %v9500_v38, %v5711_v58 }
 0x723   : > { %5747 = vst.msk [vmem:[%s9505_s22 + $0x48] sm:$0xff] %vm5737_vm0, %v5730_v36  ;;  %v5587_v30 = vpop.f32.mrf.mxu2 }
 0x724   : > { %v5588_v40 = vadd.f32 %v5587_v30, %v9475_v60 }
 0x726   : > { %v5687_v11 = vpop.f32.mrf.mxu1 }
 0x727   : > { %v5712_v49 = vadd.f32 %v5687_v11, %v5588_v40 }
 0x729   : > { %v5731_v48 = vadd.f32 %v9500_v38, %v5712_v49 }
 0x72b   : > { %5748 = vst.msk [vmem:[%s9505_s22 + $0x50] sm:$0xff] %vm5737_vm0, %v5731_v48  ;;  %v5589_v19 = vpop.f32.mrf.mxu2 }
 0x72c   : > { %v5590_v17 = vadd.f32 %v5589_v19, %v9478_v25 }
 0x72e   : > { %v5689_v24 = vpop.f32.mrf.mxu1 }
 0x72f   : > { %v5713_v23 = vadd.f32 %v5689_v24, %v5590_v17 }
 0x731   : > { %v5732_v46 = vadd.f32 %v9500_v38, %v5713_v23 }
 0x733   : > { %5749 = vst.msk [vmem:[%s9505_s22 + $0x58] sm:$0xff] %vm5737_vm0, %v5732_v46  ;;  %v5592_v32 = vpop.f32.mrf.mxu2 }
 0x734   : > { %v5593_v60 = vadd.f32 %v5592_v32, %v9481_v15 }
 0x736   : > { %v5692_v42 = vpop.f32.mrf.mxu1 }
 0x737   : > { %v5714_v14 = vadd.f32 %v5692_v42, %v5593_v60 }
 0x739   : > { %v5733_v55 = vadd.f32 %v9500_v38, %v5714_v14 }
 0x73b   : > { %5750 = vst.msk [vmem:[%s9505_s22 + $0x60] sm:$0xff] %vm5737_vm0, %v5733_v55  ;;  %v5594_v7 = vpop.f32.mrf.mxu2 }
 0x73c   : > { %v5595_v25 = vadd.f32 %v5594_v7, %v9484_v4 }
 0x73e   : > { %v5694_v2 = vpop.f32.mrf.mxu1 }
 0x73f   : > { %v5715_v59 = vadd.f32 %v5694_v2, %v5595_v25 }
 0x741   : > { %v5734_v43 = vadd.f32 %v9500_v38, %v5715_v59 }
 0x743   : > { %5751 = vst.msk [vmem:[%s9505_s22 + $0x68] sm:$0xff] %vm5737_vm0, %v5734_v43  ;;  %v5597_v45 = vpop.f32.mrf.mxu2 }
 0x744   : > { %v5598_v15 = vadd.f32 %v5597_v45, %v9487_v18 }
 0x746   : > { %v5697_v20 = vpop.f32.mrf.mxu1 }
 0x747   : > { %v5716_v12 = vadd.f32 %v5697_v20, %v5598_v15 }
 0x749   : > { %v5735_v28 = vadd.f32 %v9500_v38, %v5716_v12 }
 0x74b   : > { %5752 = vst.msk [vmem:[%s9505_s22 + $0x70] sm:$0xff] %vm5737_vm0, %v5735_v28  ;;  %v5599_v8 = vpop.f32.mrf.mxu2 }
 0x74c   : > { %v5600_v47 = vadd.f32 %v5599_v8, %v9493_v44 }
 0x74e   : > { %v5699_v4 = vpop.f32.mrf.mxu1 }
 0x74f   : > { %v5717_v50 = vadd.f32 %v5699_v4, %v5600_v47 }
 0x751   : > { %v5736_v39 = vadd.f32 %v9500_v38, %v5717_v50 }
 0x753   : > { %5753 = vst.msk [vmem:[%s9505_s22 + $0x78] sm:$0xff] %vm5737_vm0, %v5736_v39 }
 0x754 PF: > { %s17_s28 = sadd.s32 1, %s6398_s28   ;;  %s9923_s24 = smov %s6390_s26 }
 0x755   : > { %p14_p7 = scmp.ge.s32.totalorder %s17_s28, 6   ;;  %s9924_s25 = smov %s6394_s27 }
 0x756   : > { %s9925_s26 = smov %s9928_s29  ;;  %s9926_s27 = smov %s9932_s30 }
 0x757   :  { %16 = sbr.rel (!%p14_p7) target bundleno = 3 (0x3), region = 134 }

</bundles_post_ra>
